<compile_context>
chip_gen: v5e
topology: v5e:2x2
jax: 0.10.0
libtpu: 0.0.40
codegen_flags: <defaults>
</compile_context>

<pallas_src>
import functools

import jax
import jax.numpy as jnp
from jax.experimental import pallas as pl
from jax.experimental.pallas import tpu as pltpu

Z_DIM = 100            # fixed by the module (fc1 in_features)
Z_PAD = 128            # lane-aligned K for fc1 (zero-padded)
H1, H2, H3 = 256, 512, 1024
LANE = 128
SUBLANE = 8


def _round_up(x, m):
    return ((x + m - 1) // m) * m


def generator_kernel(x_ref,
                     w1_ref, b1_ref,
                     w2_ref, b2_ref,
                     w3_ref, b3_ref,
                     w4_ref, b4_ref,
                     o_ref):
    """Fused 4-layer forward for one batch tile; all matmuls on the MXU,
    bf16 operands with f32 accumulation."""
    def leaky_relu(h):
        # F.leaky_relu(h, 0.2) == max(h, 0.2*h)
        return jnp.maximum(h, 0.2 * h)

    h = jnp.dot(x_ref[...], w1_ref[...], preferred_element_type=jnp.float32)
    h = leaky_relu(h + b1_ref[...]).astype(w2_ref.dtype)

    h = jnp.dot(h, w2_ref[...], preferred_element_type=jnp.float32)
    h = leaky_relu(h + b2_ref[...]).astype(w3_ref.dtype)

    h = jnp.dot(h, w3_ref[...], preferred_element_type=jnp.float32)
    h = leaky_relu(h + b3_ref[...]).astype(w4_ref.dtype)

    h = jnp.dot(h, w4_ref[...], preferred_element_type=jnp.float32)
    o_ref[...] = jnp.tanh(h + b4_ref[...]).astype(o_ref.dtype)


def generator_forward(x, params, *, batch_tile=256, compute_dtype=jnp.bfloat16):
    """x: (B, 100) float32. Returns (B, g_output_dim) float32."""
    (w1, b1), (w2, b2), (w3, b3), (w4, b4) = params
    B = x.shape[0]
    g_output_dim = w4.shape[1]

    # ---- tile / padded sizes (MXU- and lane-friendly) ----
    bt = min(batch_tile, _round_up(B, SUBLANE))   # multiple of 8, <= batch_tile
    B_pad = _round_up(B, bt)
    out_pad = _round_up(g_output_dim, LANE)       # lane-dense output stores

    f32 = jnp.float32

    # ---- pad / cast inputs and weights (zero padding keeps the math exact) ----
    x_p = jnp.zeros((B_pad, Z_PAD), compute_dtype)
    x_p = x_p.at[:B, :Z_DIM].set(x.astype(compute_dtype))

    w1_p = jnp.zeros((Z_PAD, H1), compute_dtype).at[:Z_DIM, :].set(
        w1.astype(compute_dtype))
    w2_c = w2.astype(compute_dtype)
    w3_c = w3.astype(compute_dtype)
    w4_p = jnp.zeros((H3, out_pad), compute_dtype).at[:, :g_output_dim].set(
        w4.astype(compute_dtype))

    b1_c = b1.astype(f32)
    b2_c = b2.astype(f32)
    b3_c = b3.astype(f32)
    b4_p = jnp.zeros((1, out_pad), f32).at[:, :g_output_dim].set(b4.astype(f32))

    # Weights / biases: constant index_map -> resident across the batch grid.
    full = lambda arr: pl.BlockSpec(arr.shape, lambda i: (0, 0))

    out = pl.pallas_call(
        generator_kernel,
        out_shape=jax.ShapeDtypeStruct((B_pad, out_pad), f32),
        grid_spec=pltpu.PrefetchScalarGridSpec(
            num_scalar_prefetch=0,
            grid=(B_pad // bt,),
            in_specs=[
                pl.BlockSpec((bt, Z_PAD), lambda i: (i, 0)),   # z tile
                full(w1_p), full(b1_c),
                full(w2_c), full(b2_c),
                full(w3_c), full(b3_c),
                full(w4_p), full(b4_p),
            ],
            out_specs=pl.BlockSpec((bt, out_pad), lambda i: (i, 0)),
        ),
        compiler_params=pltpu.CompilerParams(
            dimension_semantics=("parallel",),
            vmem_limit_bytes=64 << 20,
        ),
    )(x_p, w1_p, b1_c, w2_c, b2_c, w3_c, b3_c, w4_p, b4_p)

    return out[:B, :g_output_dim]


def init_params(key, g_output_dim):
    """Deterministic synthetic weights; mirrors PyTorch Linear's uniform init
    U(-1/sqrt(fan_in), 1/sqrt(fan_in)), stored as (in, out) so y = x @ W + b."""
    dims = [(Z_DIM, H1), (H1, H2), (H2, H3), (H3, g_output_dim)]
    params = []
    for fan_in, fan_out in dims:
        key, kw, kb = jax.random.split(key, 3)
        bound = 1.0 / jnp.sqrt(fan_in)
        w = jax.random.uniform(kw, (fan_in, fan_out), jnp.float32, -bound, bound)
        b = jax.random.uniform(kb, (1, fan_out), jnp.float32, -bound, bound)
        params.append((w, b))
    return params


def reference_forward(x, params):
    """Plain-JAX f32 reference for numerical sanity check."""
    h = x
    for idx, (w, b) in enumerate(params):
        h = h @ w + b
        if idx < 3:
            h = jnp.maximum(h, 0.2 * h)
        else:
            h = jnp.tanh(h)
    return h


if __name__ == "__main__":
    key = jax.random.PRNGKey(0)
    k_params, k_x = jax.random.split(key)

    batch = 2              # small example batch (padded to the 8-row sublane tile)
    g_output_dim = 784     # MNIST 28*28 generator output (padded to 896 lanes)

    params = init_params(k_params, g_output_dim)
    x = jax.random.normal(k_x, (batch, Z_DIM), jnp.float32)

    fwd = jax.jit(functools.partial(generator_forward, batch_tile=256))
    out = jax.block_until_ready(fwd(x, params))

    ref = reference_forward(x, params)
    assert out.shape == (batch, g_output_dim)
    # bf16 matmuls (f32 accumulation) vs f32 reference -> relaxed tolerance.
    assert jnp.allclose(out, ref, atol=5e-2), "mismatch vs reference"

    print("KERNEL_OK")
</pallas_src>

<mosaic_0001>
module attributes {stable_mosaic.version = 11 : i64} {
  func.func @generator_kernel(%arg0: i32, %arg1: memref<8x128xbf16, #tpu.memory_space<vmem>>, %arg2: memref<128x256xbf16, #tpu.memory_space<vmem>>, %arg3: memref<1x256xf32, #tpu.memory_space<vmem>>, %arg4: memref<256x512xbf16, #tpu.memory_space<vmem>>, %arg5: memref<1x512xf32, #tpu.memory_space<vmem>>, %arg6: memref<512x1024xbf16, #tpu.memory_space<vmem>>, %arg7: memref<1x1024xf32, #tpu.memory_space<vmem>>, %arg8: memref<1024x896xbf16, #tpu.memory_space<vmem>>, %arg9: memref<1x896xf32, #tpu.memory_space<vmem>>, %arg10: memref<8x896xf32, #tpu.memory_space<vmem>>) attributes {dimension_semantics = [#tpu.dimension_semantics<parallel>], iteration_bounds = array<i64: 1>, scalar_prefetch = 0 : i64, scratch_operands = 0 : i64, tpu.core_type = #tpu.core_type<tc>, window_params = [{transform_indices = @transform_0, window_bounds = array<i64: 8, 128>}, {pipeline_mode = #tpu.pipeline_mode<synchronous>, transform_indices = @transform_1, window_bounds = array<i64: 128, 256>}, {pipeline_mode = #tpu.pipeline_mode<synchronous>, transform_indices = @transform_2, window_bounds = array<i64: 1, 256>}, {pipeline_mode = #tpu.pipeline_mode<synchronous>, transform_indices = @transform_3, window_bounds = array<i64: 256, 512>}, {pipeline_mode = #tpu.pipeline_mode<synchronous>, transform_indices = @transform_4, window_bounds = array<i64: 1, 512>}, {pipeline_mode = #tpu.pipeline_mode<synchronous>, transform_indices = @transform_5, window_bounds = array<i64: 512, 1024>}, {pipeline_mode = #tpu.pipeline_mode<synchronous>, transform_indices = @transform_6, window_bounds = array<i64: 1, 1024>}, {pipeline_mode = #tpu.pipeline_mode<synchronous>, transform_indices = @transform_7, window_bounds = array<i64: 1024, 896>}, {pipeline_mode = #tpu.pipeline_mode<synchronous>, transform_indices = @transform_8, window_bounds = array<i64: 1, 896>}, {transform_indices = @transform_9, window_bounds = array<i64: 8, 896>}]} {
    %c0 = arith.constant 0 : index
    %c0_0 = arith.constant 0 : index
    %0 = vector.load %arg1[%c0, %c0_0] : memref<8x128xbf16, #tpu.memory_space<vmem>>, vector<8x128xbf16>
    %c0_1 = arith.constant 0 : index
    %c0_2 = arith.constant 0 : index
    %1 = vector.load %arg2[%c0_1, %c0_2] : memref<128x256xbf16, #tpu.memory_space<vmem>>, vector<128x256xbf16>
    %cst = arith.constant dense<0.000000e+00> : vector<8x256xf32>
    %2 = tpu.matmul %0, %1, %cst {dimension_numbers = #tpu.dot_dimension_numbers<[1], [0], [0], [1], [0, 0, 1, 1], [], []>} : vector<8x128xbf16>, vector<128x256xbf16>, vector<8x256xf32> -> vector<8x256xf32>
    %c0_3 = arith.constant 0 : index
    %c0_4 = arith.constant 0 : index
    %3 = vector.load %arg3[%c0_3, %c0_4] : memref<1x256xf32, #tpu.memory_space<vmem>>, vector<1x256xf32>
    %4 = vector.broadcast %3 : vector<1x256xf32> to vector<8x256xf32>
    %5 = arith.addf %2, %4 : vector<8x256xf32>
    %cst_5 = arith.constant 2.000000e-01 : f32
    %6 = vector.broadcast %cst_5 : f32 to vector<8x256xf32>
    %7 = arith.mulf %6, %5 : vector<8x256xf32>
    %8 = arith.maximumf %5, %7 : vector<8x256xf32>
    %9 = arith.truncf %8 : vector<8x256xf32> to vector<8x256xbf16>
    %c0_6 = arith.constant 0 : index
    %c0_7 = arith.constant 0 : index
    %10 = vector.load %arg4[%c0_6, %c0_7] : memref<256x512xbf16, #tpu.memory_space<vmem>>, vector<256x512xbf16>
    %cst_8 = arith.constant dense<0.000000e+00> : vector<8x512xf32>
    %11 = tpu.matmul %9, %10, %cst_8 {dimension_numbers = #tpu.dot_dimension_numbers<[1], [0], [0], [1], [0, 0, 1, 1], [], []>} : vector<8x256xbf16>, vector<256x512xbf16>, vector<8x512xf32> -> vector<8x512xf32>
    %c0_9 = arith.constant 0 : index
    %c0_10 = arith.constant 0 : index
    %12 = vector.load %arg5[%c0_9, %c0_10] : memref<1x512xf32, #tpu.memory_space<vmem>>, vector<1x512xf32>
    %13 = vector.broadcast %12 : vector<1x512xf32> to vector<8x512xf32>
    %14 = arith.addf %11, %13 : vector<8x512xf32>
    %cst_11 = arith.constant 2.000000e-01 : f32
    %15 = vector.broadcast %cst_11 : f32 to vector<8x512xf32>
    %16 = arith.mulf %15, %14 : vector<8x512xf32>
    %17 = arith.maximumf %14, %16 : vector<8x512xf32>
    %18 = arith.truncf %17 : vector<8x512xf32> to vector<8x512xbf16>
    %c0_12 = arith.constant 0 : index
    %c0_13 = arith.constant 0 : index
    %19 = vector.load %arg6[%c0_12, %c0_13] : memref<512x1024xbf16, #tpu.memory_space<vmem>>, vector<512x1024xbf16>
    %cst_14 = arith.constant dense<0.000000e+00> : vector<8x1024xf32>
    %20 = tpu.matmul %18, %19, %cst_14 {dimension_numbers = #tpu.dot_dimension_numbers<[1], [0], [0], [1], [0, 0, 1, 1], [], []>} : vector<8x512xbf16>, vector<512x1024xbf16>, vector<8x1024xf32> -> vector<8x1024xf32>
    %c0_15 = arith.constant 0 : index
    %c0_16 = arith.constant 0 : index
    %21 = vector.load %arg7[%c0_15, %c0_16] : memref<1x1024xf32, #tpu.memory_space<vmem>>, vector<1x1024xf32>
    %22 = vector.broadcast %21 : vector<1x1024xf32> to vector<8x1024xf32>
    %23 = arith.addf %20, %22 : vector<8x1024xf32>
    %cst_17 = arith.constant 2.000000e-01 : f32
    %24 = vector.broadcast %cst_17 : f32 to vector<8x1024xf32>
    %25 = arith.mulf %24, %23 : vector<8x1024xf32>
    %26 = arith.maximumf %23, %25 : vector<8x1024xf32>
    %27 = arith.truncf %26 : vector<8x1024xf32> to vector<8x1024xbf16>
    %c0_18 = arith.constant 0 : index
    %c0_19 = arith.constant 0 : index
    %28 = vector.load %arg8[%c0_18, %c0_19] : memref<1024x896xbf16, #tpu.memory_space<vmem>>, vector<1024x896xbf16>
    %cst_20 = arith.constant dense<0.000000e+00> : vector<8x896xf32>
    %29 = tpu.matmul %27, %28, %cst_20 {dimension_numbers = #tpu.dot_dimension_numbers<[1], [0], [0], [1], [0, 0, 1, 1], [], []>} : vector<8x1024xbf16>, vector<1024x896xbf16>, vector<8x896xf32> -> vector<8x896xf32>
    %c0_21 = arith.constant 0 : index
    %c0_22 = arith.constant 0 : index
    %30 = vector.load %arg9[%c0_21, %c0_22] : memref<1x896xf32, #tpu.memory_space<vmem>>, vector<1x896xf32>
    %31 = vector.broadcast %30 : vector<1x896xf32> to vector<8x896xf32>
    %32 = arith.addf %29, %31 : vector<8x896xf32>
    %33 = math.tanh %32 : vector<8x896xf32>
    %c0_23 = arith.constant 0 : index
    %c0_24 = arith.constant 0 : index
    %34 = vector.load %arg10[%c0_23, %c0_24] : memref<8x896xf32, #tpu.memory_space<vmem>>, vector<8x896xf32>
    tpu.vector_store %arg10[%c0_23, %c0_24], %33 {strides = array<i32>} : memref<8x896xf32, #tpu.memory_space<vmem>>, vector<8x896xf32>,
    return
  }
  func.func @transform_0(%arg0: i32) -> (i32, i32) {
    %c0_i32 = arith.constant 0 : i32
    %c0_i32_0 = arith.constant 0 : i32
    return %arg0, %c0_i32 : i32, i32
  }
  func.func @transform_1(%arg0: i32) -> (i32, i32) {
    %c0_i32 = arith.constant 0 : i32
    %c0_i32_0 = arith.constant 0 : i32
    %c0_i32_1 = arith.constant 0 : i32
    return %c0_i32, %c0_i32_0 : i32, i32
  }
  func.func @transform_2(%arg0: i32) -> (i32, i32) {
    %c0_i32 = arith.constant 0 : i32
    %c0_i32_0 = arith.constant 0 : i32
    %c0_i32_1 = arith.constant 0 : i32
    return %c0_i32, %c0_i32_0 : i32, i32
  }
  func.func @transform_3(%arg0: i32) -> (i32, i32) {
    %c0_i32 = arith.constant 0 : i32
    %c0_i32_0 = arith.constant 0 : i32
    %c0_i32_1 = arith.constant 0 : i32
    return %c0_i32, %c0_i32_0 : i32, i32
  }
  func.func @transform_4(%arg0: i32) -> (i32, i32) {
    %c0_i32 = arith.constant 0 : i32
    %c0_i32_0 = arith.constant 0 : i32
    %c0_i32_1 = arith.constant 0 : i32
    return %c0_i32, %c0_i32_0 : i32, i32
  }
  func.func @transform_5(%arg0: i32) -> (i32, i32) {
    %c0_i32 = arith.constant 0 : i32
    %c0_i32_0 = arith.constant 0 : i32
    %c0_i32_1 = arith.constant 0 : i32
    return %c0_i32, %c0_i32_0 : i32, i32
  }
  func.func @transform_6(%arg0: i32) -> (i32, i32) {
    %c0_i32 = arith.constant 0 : i32
    %c0_i32_0 = arith.constant 0 : i32
    %c0_i32_1 = arith.constant 0 : i32
    return %c0_i32, %c0_i32_0 : i32, i32
  }
  func.func @transform_7(%arg0: i32) -> (i32, i32) {
    %c0_i32 = arith.constant 0 : i32
    %c0_i32_0 = arith.constant 0 : i32
    %c0_i32_1 = arith.constant 0 : i32
    return %c0_i32, %c0_i32_0 : i32, i32
  }
  func.func @transform_8(%arg0: i32) -> (i32, i32) {
    %c0_i32 = arith.constant 0 : i32
    %c0_i32_0 = arith.constant 0 : i32
    %c0_i32_1 = arith.constant 0 : i32
    return %c0_i32, %c0_i32_0 : i32, i32
  }
  func.func @transform_9(%arg0: i32) -> (i32, i32) {
    %c0_i32 = arith.constant 0 : i32
    %c0_i32_0 = arith.constant 0 : i32
    return %arg0, %c0_i32 : i32, i32
  }
}

</mosaic_0001>

<bundles_post_ra>
// kernel: generator_forward.1
= control target key start
LH: loop header
LB: loop body
LE: loop exit
PB: predicated region body
PF: predicated region fallthrough
CT: control target
= control target key end

     0   :  { %s15258_s1 = inlined_call_operand.vmem [shape: bf16[128,256], index: 1, kind: input, shape index: {}]   ;;  %s15259_s3 = inlined_call_operand.vmem [shape: bf16[256,512], index: 3, kind: input, shape index: {}]   ;;  %s15260_s0 = inlined_call_operand.vmem [shape: bf16[8,128], index: 0, kind: input, shape index: {}]   ;;  %s15261_s2 = inlined_call_operand.vmem [shape: f32[1,256], index: 2, kind: input, shape index: {}]   ;;  %s15262_s5 = inlined_call_operand.vmem [shape: bf16[512,1024], index: 5, kind: input, shape index: {}]   ;;  %s15263_s4 = inlined_call_operand.vmem [shape: f32[1,512], index: 4, kind: input, shape index: {}]   ;;  %s15264_s6 = inlined_call_operand.vmem [shape: f32[1,1024], index: 6, kind: input, shape index: {}]   ;;  %s15265_s7 = inlined_call_operand.vmem [shape: bf16[1024,896], index: 7, kind: input, shape index: {}]   ;;  %s15266_s8 = inlined_call_operand.vmem [shape: f32[1,896], index: 8, kind: input, shape index: {}]   ;;  %s15267_s9 = inlined_call_operand.vmem [shape: f32[8,896], index: 9, kind: output, shape index: {}]  }
   0x1   :  { %v6307_v0 = vld [vmem:[%s15258_s1 + $0x70] sm:$0xf]  ;;  %v9400_v1 = vld [vmem:[%s15258_s1 + $0x74] sm:$0xf0]  ;;  %v9399_v2 = vld [vmem:[%s15258_s1 + $0x74] sm:$0xf] }
   0x2   :  { %v6308_v3 = vor.u32 %v9400_v1, %v6307_v0  ;;  %v6309_v4 = vld [vmem:[%s15258_s1 + $0x78] sm:$0xf0]  ;;  %v6299_v5 = vld [vmem:[%s15258_s1 + $0x60] sm:$0xf]  ;;  %v9398_v6 = vld [vmem:[%s15258_s1 + $0x64] sm:$0xf0] }
   0x3   :  { %v6312_v7 = vor.u32 %v9399_v2, %v6309_v4  ;;  %v9397_v8 = vld [vmem:[%s15258_s1 + $0x64] sm:$0xf]  ;;  %v6301_v9 = vld [vmem:[%s15258_s1 + $0x68] sm:$0xf0]  ;;  %v6300_v10 = vor.u32 %v9398_v6, %v6299_v5  ;;  %v6291_v12 = vld [vmem:[%s15258_s1 + $0x50] sm:$0xf] }
   0x4   :  { %135 = vmatpush.bf16.msra.mxu0 %v6308_v3  ;;  %v6304_v11 = vor.u32 %v9397_v8, %v6301_v9  ;;  %v9396_v13 = vld [vmem:[%s15258_s1 + $0x54] sm:$0xf0]  ;;  %v9395_v14 = vld [vmem:[%s15258_s1 + $0x54] sm:$0xf]  ;;  %v6293_v15 = vld [vmem:[%s15258_s1 + $0x58] sm:$0xf0] }
   0x5   :  { %148 = vmatpush.bf16.msra.mxu1 %v6312_v7  ;;  %v6292_v16 = vor.u32 %v9396_v13, %v6291_v12  ;;  %v6296_v17 = vor.u32 %v9395_v14, %v6293_v15  ;;  %v6283_v18 = vld [vmem:[%s15258_s1 + $0x40] sm:$0xf]  ;;  %v9394_v19 = vld [vmem:[%s15258_s1 + $0x44] sm:$0xf0]  ;;  %v9393_v20 = vld [vmem:[%s15258_s1 + $0x44] sm:$0xf] }
   0x6   :  { %v6285_v21 = vld [vmem:[%s15258_s1 + $0x48] sm:$0xf0]  ;;  %v6284_v22 = vor.u32 %v9394_v19, %v6283_v18  ;;  %v6427_v23 = vld [vmem:[%s15259_s3 + $0xe0] sm:$0xf]  ;;  %v9431_v24 = vld [vmem:[%s15259_s3 + $0xec] sm:$0xf0] }
   0x7   :  { %v6555_v25 = vld [vmem:[%s15259_s3 + $0x1e0] sm:$0xf]  ;;  %v6288_v26 = vor.u32 %v9393_v20, %v6285_v21  ;;  %v6275_v27 = vld [vmem:[%s15258_s1 + $0x30] sm:$0xf]  ;;  %v9392_v28 = vld [vmem:[%s15258_s1 + $0x34] sm:$0xf0]  ;;  %v6428_v29 = vor.u32 %v9431_v24, %v6427_v23 }
   0x8   :  { %136 = vmatpush.bf16.msra.mxu0 %v6300_v10  ;;  %v9463_v30 = vld [vmem:[%s15259_s3 + $0x1ec] sm:$0xf0]  ;;  %v9391_v31 = vld [vmem:[%s15258_s1 + $0x34] sm:$0xf]  ;;  %v6277_v32 = vld [vmem:[%s15258_s1 + $0x38] sm:$0xf0]  ;;  %v6276_v38 = vor.u32 %v9392_v28, %v6275_v27 }
   0x9   :  { %149 = vmatpush.bf16.msra.mxu1 %v6304_v11  ;;  %v6556_v33 = vor.u32 %v9463_v30, %v6555_v25  ;;  %v6411_v34 = vld [vmem:[%s15259_s3 + $0xc0] sm:$0xf]  ;;  %561 = vmatpush.bf16.msra.mxu2 %v6428_v29  ;;  %v9427_v35 = vld [vmem:[%s15259_s3 + $0xcc] sm:$0xf0]  ;;  %v9390_v40 = vld [vmem:[%s15258_s1 + $0x24] sm:$0xf0]  ;;  %v6280_v43 = vor.u32 %v9391_v31, %v6277_v32 }
   0xa   :  { %v6539_v36 = vld [vmem:[%s15259_s3 + $0x1c0] sm:$0xf]  ;;  %v9459_v37 = vld [vmem:[%s15259_s3 + $0x1cc] sm:$0xf0]  ;;  %v6412_v41 = vor.u32 %v9427_v35, %v6411_v34  ;;  %v9389_v44 = vld [vmem:[%s15258_s1 + $0x24] sm:$0xf] }
   0xb   :  { %v6267_v39 = vld [vmem:[%s15258_s1 + $0x20] sm:$0xf]  ;;  %574 = vmatpush.bf16.msra.mxu3 %v6556_v33  ;;  %v6540_v42 = vor.u32 %v9459_v37, %v6539_v36  ;;  %v9423_v46 = vld [vmem:[%s15259_s3 + $0xac] sm:$0xf0]  ;;  %v6269_v47 = vld [vmem:[%s15258_s1 + $0x28] sm:$0xf0] }
   0xc   :  { %137 = vmatpush.bf16.msra.mxu0 %v6292_v16  ;;  %v6395_v45 = vld [vmem:[%s15259_s3 + $0xa0] sm:$0xf]  ;;  %v9455_v49 = vld [vmem:[%s15259_s3 + $0x1ac] sm:$0xf0]  ;;  %v6268_v51 = vor.u32 %v9390_v40, %v6267_v39  ;;  %v6272_v56 = vor.u32 %v9389_v44, %v6269_v47  ;;  %v9388_v57 = vld [vmem:[%s15258_s1 + $0x14] sm:$0xf0] }
   0xd   :  { %150 = vmatpush.bf16.msra.mxu1 %v6296_v17  ;;  %v6523_v48 = vld [vmem:[%s15259_s3 + $0x1a0] sm:$0xf]  ;;  %562 = vmatpush.bf16.msra.mxu2 %v6412_v41  ;;  %v6396_v50 = vor.u32 %v9423_v46, %v6395_v45  ;;  %v6259_v52 = vld [vmem:[%s15258_s1 + $0x10] sm:$0xf]  ;;  %v9387_v60 = vld [vmem:[%s15258_s1 + $0x14] sm:$0xf] }
   0xe   :  { %v6524_v53 = vor.u32 %v9455_v49, %v6523_v48  ;;  %v6379_v54 = vld [vmem:[%s15259_s3 + $0x80] sm:$0xf]  ;;  %v9419_v55 = vld [vmem:[%s15259_s3 + $0x8c] sm:$0xf0]  ;;  %v6261_v61 = vld [vmem:[%s15258_s1 + $0x18] sm:$0xf0]  ;;  %v6260_v0 = vor.u32 %v9388_v57, %v6259_v52 }
   0xf   :  { %575 = vmatpush.bf16.msra.mxu3 %v6540_v42  ;;  %v6507_v58 = vld [vmem:[%s15259_s3 + $0x180] sm:$0xf]  ;;  %v9451_v59 = vld [vmem:[%s15259_s3 + $0x18c] sm:$0xf0]  ;;  %v6380_v63 = vor.u32 %v9419_v55, %v6379_v54  ;;  %v9386_v1 = vld [vmem:[%s15258_s1 + $0x4] sm:$0xf0]  ;;  %v6264_v5 = vor.u32 %v9387_v60, %v6261_v61 }
  0x10   :  { %138 = vmatpush.bf16.msra.mxu0 %v6284_v22  ;;  %v6251_v62 = vld [vmem:[%s15258_s1] sm:$0xf]  ;;  %v6508_v2 = vor.u32 %v9451_v59, %v6507_v58  ;;  %v9415_v4 = vld [vmem:[%s15259_s3 + $0x6c] sm:$0xf0]  ;;  %v9385_v6 = vld [vmem:[%s15258_s1 + $0x4] sm:$0xf] }
  0x11   :  { %151 = vmatpush.bf16.msra.mxu1 %v6288_v26  ;;  %563 = vmatpush.bf16.msra.mxu2 %v6396_v50  ;;  %v6363_v3 = vld [vmem:[%s15259_s3 + $0x60] sm:$0xf]  ;;  %v9447_v8 = vld [vmem:[%s15259_s3 + $0x16c] sm:$0xf0]  ;;  %v6253_v9 = vld [vmem:[%s15258_s1 + $0x8] sm:$0xf0]  ;;  %v6252_v15 = vor.u32 %v9386_v1, %v6251_v62 }
  0x12   :  { %v6491_v7 = vld [vmem:[%s15259_s3 + $0x160] sm:$0xf]  ;;  %v9429_v10 = vld [vmem:[%s15259_s3 + $0xe4] sm:$0xf]  ;;  %v6429_v11 = vld [vmem:[%s15259_s3 + $0xf0] sm:$0xf0]  ;;  %v6364_v14 = vor.u32 %v9415_v4, %v6363_v3  ;;  %v6256_v19 = vor.u32 %v9385_v6, %v6253_v9 }
  0x13   :  { %576 = vmatpush.bf16.msra.mxu3 %v6524_v53  ;;  %v9461_v12 = vld [vmem:[%s15259_s3 + $0x1e4] sm:$0xf]  ;;  %v6557_v13 = vld [vmem:[%s15259_s3 + $0x1f0] sm:$0xf0]  ;;  %v6492_v16 = vor.u32 %v9447_v8, %v6491_v7  ;;  %v6347_v17 = vld [vmem:[%s15259_s3 + $0x40] sm:$0xf]  ;;  %v6432_v20 = vor.u32 %v9429_v10, %v6429_v11 }
  0x14   :  { %139 = vmatpush.bf16.msra.mxu0 %v6276_v38  ;;  %v9411_v18 = vld [vmem:[%s15259_s3 + $0x4c] sm:$0xf0]  ;;  %v6475_v21 = vld [vmem:[%s15259_s3 + $0x140] sm:$0xf]  ;;  %v6560_v23 = vor.u32 %v9461_v12, %v6557_v13  ;;  %v9425_v24 = vld [vmem:[%s15259_s3 + $0xc4] sm:$0xf] }
  0x15   :  { %152 = vmatpush.bf16.msra.mxu1 %v6280_v43  ;;  %564 = vmatpush.bf16.msra.mxu2 %v6380_v63  ;;  %v9443_v22 = vld [vmem:[%s15259_s3 + $0x14c] sm:$0xf0]  ;;  %v6413_v25 = vld [vmem:[%s15259_s3 + $0xd0] sm:$0xf0]  ;;  %v9457_v26 = vld [vmem:[%s15259_s3 + $0x1c4] sm:$0xf]  ;;  %v6348_v28 = vor.u32 %v9411_v18, %v6347_v17 }
  0x16   :  { %v6541_v27 = vld [vmem:[%s15259_s3 + $0x1d0] sm:$0xf0]  ;;  %v32_v29 = vld [vmem:[%s15260_s0] sm:$0xf]  ;;  %v6476_v30 = vor.u32 %v9443_v22, %v6475_v21  ;;  %v9407_v32 = vld [vmem:[%s15259_s3 + $0x2c] sm:$0xf0]  ;;  %v6416_v33 = vor.u32 %v9425_v24, %v6413_v25 }
  0x17   :  { %577 = vmatpush.bf16.msra.mxu3 %v6508_v2  ;;  %v6331_v31 = vld [vmem:[%s15259_s3 + $0x20] sm:$0xf]  ;;  %v9439_v35 = vld [vmem:[%s15259_s3 + $0x12c] sm:$0xf0]  ;;  %v6544_v36 = vor.u32 %v9457_v26, %v6541_v27  ;;  %v9421_v37 = vld [vmem:[%s15259_s3 + $0xa4] sm:$0xf] }
  0x18   :  { %140 = vmatpush.bf16.msra.mxu0 %v6268_v51  ;;  %v6459_v34 = vld [vmem:[%s15259_s3 + $0x120] sm:$0xf]  ;;  %v6397_v38 = vld [vmem:[%s15259_s3 + $0xb0] sm:$0xf0]  ;;  %v9453_v39 = vld [vmem:[%s15259_s3 + $0x1a4] sm:$0xf]  ;;  %v6332_v41 = vor.u32 %v9407_v32, %v6331_v31 }
  0x19   :  { %153 = vmatpush.bf16.msra.mxu1 %v6272_v56  ;;  %565 = vmatpush.bf16.msra.mxu2 %v6364_v14  ;;  %v6525_v40 = vld [vmem:[%s15259_s3 + $0x1b0] sm:$0xf0]  ;;  %v9417_v42 = vld [vmem:[%s15259_s3 + $0x84] sm:$0xf]  ;;  %v6460_v43 = vor.u32 %v9439_v35, %v6459_v34  ;;  %v6315_v44 = vld [vmem:[%s15259_s3] sm:$0xf]  ;;  %v6400_v47 = vor.u32 %v9421_v37, %v6397_v38 }
  0x1a   :  { %v9403_v45 = vld [vmem:[%s15259_s3 + $0xc] sm:$0xf0]  ;;  %v6443_v46 = vld [vmem:[%s15259_s3 + $0x100] sm:$0xf]  ;;  %v6435_v49 = vld [vmem:[%s15259_s3 + $0xe8] sm:$0xf]  ;;  %v6528_v51 = vor.u32 %v9453_v39, %v6525_v40 }
  0x1b   :  { %578 = vmatpush.bf16.msra.mxu3 %v6492_v16  ;;  %v9435_v48 = vld [vmem:[%s15259_s3 + $0x10c] sm:$0xf0]  ;;  %v9432_v50 = vld [vmem:[%s15259_s3 + $0xf4] sm:$0xf0]  ;;  %v6381_v52 = vld [vmem:[%s15259_s3 + $0x90] sm:$0xf0]  ;;  %v6316_v57 = vor.u32 %v9403_v45, %v6315_v44 }
  0x1c   :  { %141 = vmatpush.bf16.msra.mxu0 %v6260_v0  ;;  %v6563_v53 = vld [vmem:[%s15259_s3 + $0x1e8] sm:$0xf]  ;;  %v9464_v54 = vld [vmem:[%s15259_s3 + $0x1f4] sm:$0xf0]  ;;  %v9449_v55 = vld [vmem:[%s15259_s3 + $0x184] sm:$0xf]  ;;  %v6444_v58 = vor.u32 %v9435_v48, %v6443_v46  ;;  %v6436_v59 = vor.u32 %v9432_v50, %v6435_v49  ;;  %v6384_v60 = vor.u32 %v9417_v42, %v6381_v52 }
  0x1d   :  { %154 = vmatpush.bf16.msra.mxu1 %v6264_v5  ;;  %566 = vmatpush.bf16.msra.mxu2 %v6348_v28  ;;  %v6509_v56 = vld [vmem:[%s15259_s3 + $0x190] sm:$0xf0]  ;;  %v9413_v61 = vld [vmem:[%s15259_s3 + $0x64] sm:$0xf]  ;;  %v6564_v62 = vor.u32 %v9464_v54, %v6563_v53  ;;  %v6419_v63 = vld [vmem:[%s15259_s3 + $0xc8] sm:$0xf] }
  0x1e   :  { %v9428_v0 = vld [vmem:[%s15259_s3 + $0xd4] sm:$0xf0]  ;;  %v6512_v1 = vor.u32 %v9449_v55, %v6509_v56  ;;  %v6365_v2 = vld [vmem:[%s15259_s3 + $0x70] sm:$0xf0]  ;;  %v6547_v3 = vld [vmem:[%s15259_s3 + $0x1c8] sm:$0xf] }
  0x1f   :  { %579 = vmatpush.bf16.msra.mxu3 %v6476_v30  ;;  %v9460_v4 = vld [vmem:[%s15259_s3 + $0x1d4] sm:$0xf0]  ;;  %v9445_v5 = vld [vmem:[%s15259_s3 + $0x164] sm:$0xf]  ;;  %v6493_v6 = vld [vmem:[%s15259_s3 + $0x170] sm:$0xf0]  ;;  %v6420_v7 = vor.u32 %v9428_v0, %v6419_v63  ;;  %v6368_v8 = vor.u32 %v9413_v61, %v6365_v2 }
  0x20   :  { %142 = vmatpush.bf16.msra.mxu0 %v6252_v15  ;;  %v6548_v9 = vor.u32 %v9460_v4, %v6547_v3  ;;  %v6496_v10 = vor.u32 %v9445_v5, %v6493_v6  ;;  %v9409_v11 = vld [vmem:[%s15259_s3 + $0x44] sm:$0xf]  ;;  %v6349_v12 = vld [vmem:[%s15259_s3 + $0x50] sm:$0xf0]  ;;  %v9430_v27 = vld [vmem:[%s15259_s3 + $0xec] sm:$0xf] }
  0x21   :  { %155 = vmatpush.bf16.msra.mxu1 %v6256_v19  ;;  %567 = vmatpush.bf16.msra.mxu2 %v6332_v41  ;;  %v9441_v13 = vld [vmem:[%s15259_s3 + $0x144] sm:$0xf]  ;;  %v6477_v14 = vld [vmem:[%s15259_s3 + $0x150] sm:$0xf0]  ;;  %v6352_v15 = vor.u32 %v9409_v11, %v6349_v12  ;;  %v6437_v28 = vld [vmem:[%s15259_s3 + $0xf8] sm:$0xf0] }
  0x22   :  { %v6480_v16 = vor.u32 %v9441_v13, %v6477_v14  ;;  %v9405_v17 = vld [vmem:[%s15259_s3 + $0x24] sm:$0xf]  ;;  %v6333_v18 = vld [vmem:[%s15259_s3 + $0x30] sm:$0xf0]  ;;  %v6565_v30 = vld [vmem:[%s15259_s3 + $0x1f8] sm:$0xf0] }
  0x23   :  { %143 = vmatmul.bf16.vlgmr.msra.gmra.mxu0 %v32_v29  ;;  %580 = vmatpush.bf16.msra.mxu3 %v6460_v43  ;;  %v9437_v19 = vld [vmem:[%s15259_s3 + $0x124] sm:$0xf]  ;;  %v6336_v21 = vor.u32 %v9405_v17, %v6333_v18  ;;  %v6317_v24 = vld [vmem:[%s15259_s3 + $0x10] sm:$0xf0]  ;;  %v9426_v35 = vld [vmem:[%s15259_s3 + $0xcc] sm:$0xf] }
  0x24   :  { %587 = vmatpush.bf16.msrb.mxu0 %v6432_v20  ;;  %156 = vmatmul.bf16.vlgmr.msra.gmra.mxu1 %v32_v29  ;;  %v6461_v20 = vld [vmem:[%s15259_s3 + $0x130] sm:$0xf0]  ;;  %v9433_v25 = vld [vmem:[%s15259_s3 + $0x104] sm:$0xf]  ;;  %v9462_v29 = vld [vmem:[%s15259_s3 + $0x1ec] sm:$0xf] }
  0x25   :  { %600 = vmatpush.bf16.msrb.mxu1 %v6560_v23  ;;  %568 = vmatpush.bf16.msra.mxu2 %v6316_v57  ;;  %v6464_v22 = vor.u32 %v9437_v19, %v6461_v20  ;;  %v9401_v23 = vld [vmem:[%s15259_s3 + $0x4] sm:$0xf]  ;;  %v6445_v26 = vld [vmem:[%s15259_s3 + $0x110] sm:$0xf0]  ;;  %v6568_v34 = vor.u32 %v9462_v29, %v6565_v30  ;;  %v9458_v37 = vld [vmem:[%s15259_s3 + $0x1cc] sm:$0xf] }
  0x26   :  { %v6320_v31 = vor.u32 %v9401_v23, %v6317_v24  ;;  %v6448_v32 = vor.u32 %v9433_v25, %v6445_v26  ;;  %v6549_v38 = vld [vmem:[%s15259_s3 + $0x1d8] sm:$0xf0]  ;;  %v6403_v41 = vld [vmem:[%s15259_s3 + $0xa8] sm:$0xf]  ;;  %v9424_v42 = vld [vmem:[%s15259_s3 + $0xb4] sm:$0xf0] }
  0x27   :  { %581 = vmatpush.bf16.msra.mxu3 %v6444_v58  ;;  %v6552_v40 = vor.u32 %v9458_v37, %v6549_v38  ;;  %v6404_v43 = vor.u32 %v9424_v42, %v6403_v41  ;;  %v6531_v44 = vld [vmem:[%s15259_s3 + $0x1a8] sm:$0xf]  ;;  %v9456_v45 = vld [vmem:[%s15259_s3 + $0x1b4] sm:$0xf0]  ;;  %v9422_v46 = vld [vmem:[%s15259_s3 + $0xac] sm:$0xf] }
  0x28   :  { %588 = vmatpush.bf16.msrb.mxu0 %v6416_v33  ;;  %v6440_v33 = vor.u32 %v9430_v27, %v6437_v28  ;;  %v6405_v48 = vld [vmem:[%s15259_s3 + $0xb8] sm:$0xf0]  ;;  %v9454_v49 = vld [vmem:[%s15259_s3 + $0x1ac] sm:$0xf]  ;;  %v6387_v53 = vld [vmem:[%s15259_s3 + $0x88] sm:$0xf] }
  0x29   :  { %601 = vmatpush.bf16.msrb.mxu1 %v6544_v36  ;;  %613 = vmatpush.bf16.msrb.mxu2 %v6436_v59  ;;  %v6421_v36 = vld [vmem:[%s15259_s3 + $0xd8] sm:$0xf0]  ;;  %v9420_v54 = vld [vmem:[%s15259_s3 + $0x94] sm:$0xf0]  ;;  %v6515_v55 = vld [vmem:[%s15259_s3 + $0x188] sm:$0xf] }
  0x2a   :  { %v6424_v39 = vor.u32 %v9426_v35, %v6421_v36  ;;  %v6533_v50 = vld [vmem:[%s15259_s3 + $0x1b8] sm:$0xf0]  ;;  %v6388_v56 = vor.u32 %v9420_v54, %v6387_v53  ;;  %v9452_v57 = vld [vmem:[%s15259_s3 + $0x194] sm:$0xf0]  ;;  %v9418_v58 = vld [vmem:[%s15259_s3 + $0x8c] sm:$0xf] }
  0x2b   :  { %626 = vmatpush.bf16.msrb.mxu3 %v6564_v62  ;;  %v6536_v52 = vor.u32 %v9454_v49, %v6533_v50  ;;  %v6389_v59 = vld [vmem:[%s15259_s3 + $0x98] sm:$0xf0]  ;;  %v9450_v62 = vld [vmem:[%s15259_s3 + $0x18c] sm:$0xf]  ;;  %v9416_v2 = vld [vmem:[%s15259_s3 + $0x74] sm:$0xf0] }
  0x2c   :  { %589 = vmatpush.bf16.msrb.mxu0 %v6400_v47  ;;  %v6532_v47 = vor.u32 %v9456_v45, %v6531_v44  ;;  %v6392_v61 = vor.u32 %v9418_v58, %v6389_v59  ;;  %v6517_v63 = vld [vmem:[%s15259_s3 + $0x198] sm:$0xf0]  ;;  %v6499_v3 = vld [vmem:[%s15259_s3 + $0x168] sm:$0xf]  ;;  %v9448_v5 = vld [vmem:[%s15259_s3 + $0x174] sm:$0xf0] }
  0x2d   :  { %602 = vmatpush.bf16.msrb.mxu1 %v6528_v51  ;;  %614 = vmatpush.bf16.msrb.mxu2 %v6420_v7  ;;  %v6408_v51 = vor.u32 %v9422_v46, %v6405_v48  ;;  %v6520_v0 = vor.u32 %v9450_v62, %v6517_v63  ;;  %v9414_v6 = vld [vmem:[%s15259_s3 + $0x6c] sm:$0xf]  ;;  %v6373_v7 = vld [vmem:[%s15259_s3 + $0x78] sm:$0xf0]  ;;  %v6355_v12 = vld [vmem:[%s15259_s3 + $0x48] sm:$0xf] }
  0x2e   :  { %v6501_v11 = vld [vmem:[%s15259_s3 + $0x178] sm:$0xf0]  ;;  %v9412_v14 = vld [vmem:[%s15259_s3 + $0x54] sm:$0xf0]  ;;  %v9410_v19 = vld [vmem:[%s15259_s3 + $0x4c] sm:$0xf] }
  0x2f   :  { %627 = vmatpush.bf16.msrb.mxu3 %v6548_v9  ;;  %v6376_v9 = vor.u32 %v9414_v6, %v6373_v7  ;;  %v6356_v17 = vor.u32 %v9412_v14, %v6355_v12  ;;  %v6357_v20 = vld [vmem:[%s15259_s3 + $0x58] sm:$0xf0]  ;;  %v6339_v24 = vld [vmem:[%s15259_s3 + $0x28] sm:$0xf]  ;;  %v9408_v25 = vld [vmem:[%s15259_s3 + $0x34] sm:$0xf0] }
  0x30   :  { %590 = vmatpush.bf16.msrb.mxu0 %v6384_v60  ;;  %v6516_v60 = vor.u32 %v9452_v57, %v6515_v55  ;;  %v6485_v23 = vld [vmem:[%s15259_s3 + $0x158] sm:$0xf0]  ;;  %v6467_v27 = vld [vmem:[%s15259_s3 + $0x128] sm:$0xf]  ;;  %v9440_v28 = vld [vmem:[%s15259_s3 + $0x134] sm:$0xf0]  ;;  %v6340_v30 = vor.u32 %v9408_v25, %v6339_v24 }
  0x31   :  { %603 = vmatpush.bf16.msrb.mxu1 %v6512_v1  ;;  %615 = vmatpush.bf16.msrb.mxu2 %v6404_v43  ;;  %v6371_v1 = vld [vmem:[%s15259_s3 + $0x68] sm:$0xf]  ;;  %v9406_v29 = vld [vmem:[%s15259_s3 + $0x2c] sm:$0xf]  ;;  %v9404_v36 = vld [vmem:[%s15259_s3 + $0x14] sm:$0xf0] }
  0x32   :  { %v6372_v4 = vor.u32 %v9416_v2, %v6371_v1  ;;  %v6323_v35 = vld [vmem:[%s15259_s3 + $0x8] sm:$0xf]  ;;  %v9402_v41 = vld [vmem:[%s15259_s3 + $0xc] sm:$0xf]  ;;  %v6325_v42 = vld [vmem:[%s15259_s3 + $0x18] sm:$0xf0] }
  0x33   :  { %628 = vmatpush.bf16.msrb.mxu3 %v6532_v47  ;;  %v9434_v43 = vld [vmem:[%s15259_s3 + $0x10c] sm:$0xf]  ;;  %v6453_v44 = vld [vmem:[%s15259_s3 + $0x118] sm:$0xf0]  ;;  %v6324_v45 = vor.u32 %v9404_v36, %v6323_v35  ;;  %v6328_v47 = vor.u32 %v9402_v41, %v6325_v42  ;;  %v49_v49 = vld [vmem:[%s15261_s2] sm:$0x3] }
  0x34   :  { %591 = vmatpush.bf16.msrb.mxu0 %v6368_v8  ;;  %v6500_v8 = vor.u32 %v9448_v5, %v6499_v3  ;;  %v6456_v48 = vor.u32 %v9434_v43, %v6453_v44  ;;  %v51_v50 = vperm.slane %v49_v49, 0  ;;  %v9589_v58 = vld [vmem:[%s15262_s5 + $0x3dc] sm:$0xf0] }
  0x35   :  { %604 = vmatpush.bf16.msrb.mxu1 %v6496_v10  ;;  %616 = vmatpush.bf16.msrb.mxu2 %v6388_v56  ;;  %v9446_v10 = vld [vmem:[%s15259_s3 + $0x16c] sm:$0xf]  ;;  %v7051_v56 = vld [vmem:[%s15262_s5 + $0x3c0] sm:$0xf] }
  0x36   :  { %v6504_v13 = vor.u32 %v9446_v10, %v6501_v11  ;;  %v6795_v59 = vld [vmem:[%s15262_s5 + $0x1c0] sm:$0xf]  ;;  %v7052_v5 = vor.u32 %v9589_v58, %v7051_v56 }
  0x37   :  { %629 = vmatpush.bf16.msrb.mxu3 %v6516_v60  ;;  %v7563_v62 = vld [vmem:[%s15262_s5 + $0x7c0] sm:$0xf] }
  0x38   :  { %592 = vmatpush.bf16.msrb.mxu0 %v6352_v15  ;;  %v6483_v15 = vld [vmem:[%s15259_s3 + $0x148] sm:$0xf]  ;;  %v7307_v1 = vld [vmem:[%s15262_s5 + $0x5c0] sm:$0xf] }
  0x39   :  { %605 = vmatpush.bf16.msrb.mxu1 %v6480_v16  ;;  %617 = vmatpush.bf16.msrb.mxu2 %v6372_v4  ;;  %v9444_v16 = vld [vmem:[%s15259_s3 + $0x154] sm:$0xf0]  ;;  %v9653_v2 = vld [vmem:[%s15262_s5 + $0x5dc] sm:$0xf0] }
  0x3a   :  { %v6484_v18 = vor.u32 %v9444_v16, %v6483_v15  ;;  %v7019_v6 = vld [vmem:[%s15262_s5 + $0x380] sm:$0xf]  ;;  %v7308_v15 = vor.u32 %v9653_v2, %v7307_v1 }
  0x3b   :  { %630 = vmatpush.bf16.msrb.mxu3 %v6500_v8  ;;  %v9581_v7 = vld [vmem:[%s15262_s5 + $0x39c] sm:$0xf0] }
  0x3c   :  { %593 = vmatpush.bf16.msrb.mxu0 %v6336_v21  ;;  %v9442_v21 = vld [vmem:[%s15259_s3 + $0x14c] sm:$0xf]  ;;  %v6763_v11 = vld [vmem:[%s15262_s5 + $0x180] sm:$0xf] }
  0x3d   :  { %606 = vmatpush.bf16.msrb.mxu1 %v6464_v22  ;;  %v6360_v22 = vor.u32 %v9410_v19, %v6357_v20  ;;  %v6488_v26 = vor.u32 %v9442_v21, %v6485_v23  ;;  %618 = vmatpush.bf16.msrb.mxu2 %v6356_v17  ;;  %v9517_v12 = vld [vmem:[%s15262_s5 + $0x19c] sm:$0xf0]  ;;  %v7020_v20 = vor.u32 %v9581_v7, %v7019_v6 }
  0x3e   :  { %v7531_v14 = vld [vmem:[%s15262_s5 + $0x780] sm:$0xf]  ;;  %v6764_v23 = vor.u32 %v9517_v12, %v6763_v11 }
  0x3f   :  { %631 = vmatpush.bf16.msrb.mxu3 %v6484_v18  ;;  %v9709_v17 = vld [vmem:[%s15262_s5 + $0x79c] sm:$0xf0] }
  0x40   :  { %594 = vmatpush.bf16.msrb.mxu0 %v6320_v31  ;;  %v6341_v31 = vld [vmem:[%s15259_s3 + $0x38] sm:$0xf0]  ;;  %v7275_v18 = vld [vmem:[%s15262_s5 + $0x580] sm:$0xf] }
  0x41   :  { %607 = vmatpush.bf16.msrb.mxu1 %v6448_v32  ;;  %v9438_v32 = vld [vmem:[%s15259_s3 + $0x12c] sm:$0xf]  ;;  %v6344_v37 = vor.u32 %v9406_v29, %v6341_v31  ;;  %619 = vmatpush.bf16.msrb.mxu2 %v6340_v30  ;;  %v9645_v19 = vld [vmem:[%s15262_s5 + $0x59c] sm:$0xf0] }
  0x42   :  { %v6987_v21 = vld [vmem:[%s15262_s5 + $0x340] sm:$0xf] }
  0x43   :  { %v6731_v24 = vld [vmem:[%s15262_s5 + $0x140] sm:$0xf] }
  0x44   :  { %639 = vmatpush.bf16.msra.mxu0 %v6440_v33  ;;  %v6469_v33 = vld [vmem:[%s15259_s3 + $0x138] sm:$0xf0]  ;;  %v9509_v25 = vld [vmem:[%s15262_s5 + $0x15c] sm:$0xf0] }
  0x45   :  { %652 = vmatpush.bf16.msra.mxu1 %v6568_v34  ;;  %v6468_v34 = vor.u32 %v9440_v28, %v6467_v27  ;;  %v6472_v38 = vor.u32 %v9438_v32, %v6469_v33  ;;  %620 = vmatpush.bf16.msrb.mxu2 %v6324_v45  ;;  %v7499_v27 = vld [vmem:[%s15262_s5 + $0x740] sm:$0xf]  ;;  %v7276_v28 = vor.u32 %v9645_v19, %v7275_v18 }
  0x46   :  { %v9701_v29 = vld [vmem:[%s15262_s5 + $0x75c] sm:$0xf0]  ;;  %v6732_v35 = vor.u32 %v9509_v25, %v6731_v24  ;;  %v7053_v25 = vld [vmem:[%s15262_s5 + $0x3e0] sm:$0xf0] }
  0x47   :  { %632 = vmatpush.bf16.msrb.mxu3 %v6468_v34  ;;  %v7243_v30 = vld [vmem:[%s15262_s5 + $0x540] sm:$0xf] }
  0x48   :  { %640 = vmatpush.bf16.msra.mxu0 %v6424_v39  ;;  %v6451_v39 = vld [vmem:[%s15259_s3 + $0x108] sm:$0xf]  ;;  %v9637_v31 = vld [vmem:[%s15262_s5 + $0x55c] sm:$0xf0] }
  0x49   :  { %653 = vmatpush.bf16.msra.mxu1 %v6552_v40  ;;  %v9436_v40 = vld [vmem:[%s15259_s3 + $0x114] sm:$0xf0]  ;;  %v6955_v33 = vld [vmem:[%s15262_s5 + $0x300] sm:$0xf] }
  0x4a   :  { %v6452_v46 = vor.u32 %v9436_v40, %v6451_v39  ;;  %v9565_v34 = vld [vmem:[%s15262_s5 + $0x31c] sm:$0xf0]  ;;  %v7244_v40 = vor.u32 %v9637_v31, %v7243_v30 }
  0x4b   :  { %v6699_v36 = vld [vmem:[%s15262_s5 + $0x100] sm:$0xf]  ;;  %v6956_v44 = vor.u32 %v9565_v34, %v6955_v33  ;;  %v7565_v33 = vld [vmem:[%s15262_s5 + $0x7e0] sm:$0xf0] }
  0x4c   :  { %641 = vmatpush.bf16.msra.mxu0 %v6408_v51  ;;  %633 = vmatpush.bf16.msrb.mxu3 %v6452_v46  ;;  %v52_v51 = vperm.slane %v49_v49, 1  ;;  %v7467_v39 = vld [vmem:[%s15262_s5 + $0x700] sm:$0xf] }
  0x4d   :  { %654 = vmatpush.bf16.msra.mxu1 %v6536_v52  ;;  %v9693_v41 = vld [vmem:[%s15262_s5 + $0x71c] sm:$0xf0] }
  0x4e   :  { %v7211_v42 = vld [vmem:[%s15262_s5 + $0x500] sm:$0xf] }
  0x4f   :  { %v9629_v43 = vld [vmem:[%s15262_s5 + $0x51c] sm:$0xf0] }
  0x50   :  { %642 = vmatpush.bf16.msra.mxu0 %v6392_v61  ;;  %v9525_v61 = vld [vmem:[%s15262_s5 + $0x1dc] sm:$0xf0] }
  0x51   :  { %655 = vmatpush.bf16.msra.mxu1 %v6520_v0  ;;  %v9717_v0 = vld [vmem:[%s15262_s5 + $0x7dc] sm:$0xf0]  ;;  %v6796_v8 = vor.u32 %v9525_v61, %v6795_v59 }
  0x52   :  { %v6923_v45 = vld [vmem:[%s15262_s5 + $0x2c0] sm:$0xf] }
  0x53   :  { %v9557_v46 = vld [vmem:[%s15262_s5 + $0x2dc] sm:$0xf0] }
  0x54   :  { %643 = vmatpush.bf16.msra.mxu0 %v6376_v9  ;;  %v9493_v49 = vld [vmem:[%s15262_s5 + $0xdc] sm:$0xf0]  ;;  %v6924_v56 = vor.u32 %v9557_v46, %v6923_v45  ;;  %v6989_v45 = vld [vmem:[%s15262_s5 + $0x360] sm:$0xf0] }
  0x55   :  { %656 = vmatpush.bf16.msra.mxu1 %v6504_v13  ;;  %v7564_v13 = vor.u32 %v9717_v0, %v7563_v62  ;;  %v9549_v58 = vld [vmem:[%s15262_s5 + $0x29c] sm:$0xf0]  ;;  %v9505_v46 = vld [vmem:[%s15262_s5 + $0x144] sm:$0xf] }
  0x56   :  { %v9485_v61 = vld [vmem:[%s15262_s5 + $0x9c] sm:$0xf0] }
  0x57   :  { %v9677_v1 = vld [vmem:[%s15262_s5 + $0x69c] sm:$0xf0] }
  0x58   :  { %644 = vmatpush.bf16.msra.mxu0 %v6360_v22  ;;  %v9573_v22 = vld [vmem:[%s15262_s5 + $0x35c] sm:$0xf0] }
  0x59   :  { %657 = vmatpush.bf16.msra.mxu1 %v6488_v26  ;;  %v7532_v26 = vor.u32 %v9709_v17, %v7531_v14  ;;  %v6988_v32 = vor.u32 %v9573_v22, %v6987_v21  ;;  %v7147_v2 = vld [vmem:[%s15262_s5 + $0x480] sm:$0xf] }
  0x5a   :  { %v9541_v6 = vld [vmem:[%s15262_s5 + $0x25c] sm:$0xf0] }
  0x5b   :  { %v7371_v11 = vld [vmem:[%s15262_s5 + $0x640] sm:$0xf] }
  0x5c   :  { %645 = vmatpush.bf16.msra.mxu0 %v6344_v37  ;;  %v9501_v37 = vld [vmem:[%s15262_s5 + $0x11c] sm:$0xf0] }
  0x5d   :  { %658 = vmatpush.bf16.msra.mxu1 %v6472_v38  ;;  %v7500_v38 = vor.u32 %v9701_v29, %v7499_v27  ;;  %v7115_v14 = vld [vmem:[%s15262_s5 + $0x440] sm:$0xf]  ;;  %v6797_v27 = vld [vmem:[%s15262_s5 + $0x1e0] sm:$0xf0] }
  0x5e   :  { %v6827_v17 = vld [vmem:[%s15262_s5 + $0x200] sm:$0xf] }
  0x5f   :  { %v9533_v18 = vld [vmem:[%s15262_s5 + $0x21c] sm:$0xf0] }
  0x60   :  { %646 = vmatpush.bf16.msra.mxu0 %v6328_v47  ;;  %v6700_v47 = vor.u32 %v9501_v37, %v6699_v36  ;;  %v6571_v21 = vld [vmem:[%s15262_s5] sm:$0xf]  ;;  %v6828_v30 = vor.u32 %v9533_v18, %v6827_v17  ;;  %v7021_v37 = vld [vmem:[%s15262_s5 + $0x3a0] sm:$0xf0] }
  0x61   :  { %659 = vmatpush.bf16.msra.mxu1 %v6456_v48  ;;  %v6667_v48 = vld [vmem:[%s15262_s5 + $0xc0] sm:$0xf]  ;;  %v6637_v17 = vld [vmem:[%s15262_s5 + $0xa0] sm:$0xf0] }
  0x62   :  { %v6668_v59 = vor.u32 %v9493_v49, %v6667_v48  ;;  %v9469_v22 = vld [vmem:[%s15262_s5 + $0x1c] sm:$0xf0] }
  0x63   :  { %v9661_v29 = vld [vmem:[%s15262_s5 + $0x61c] sm:$0xf0]  ;;  %v6572_v31 = vor.u32 %v9469_v22, %v6571_v21  ;;  %v9529_v22 = vld [vmem:[%s15262_s5 + $0x204] sm:$0xf] }
  0xa0   :  { %v144_v52 = vpop.f32.mrf.mxu0 }
  0xa1   :  { %v145_v53 = vadd.f32 %v144_v52, %v51_v50  ;;  %v157_v54 = vpop.f32.mrf.mxu1  ;;  %v7468_v50 = vor.u32 %v9693_v41, %v7467_v39  ;;  %v7212_v52 = vor.u32 %v9629_v43, %v7211_v42  ;;  %v6765_v39 = vld [vmem:[%s15262_s5 + $0x1a0] sm:$0xf0] }
  0xa2   :  { %v158_v55 = vadd.f32 %v157_v54, %v52_v51  ;;  %v7435_v51 = vld [vmem:[%s15262_s5 + $0x6c0] sm:$0xf]  ;;  %v9569_v43 = vld [vmem:[%s15262_s5 + $0x344] sm:$0xf] }
  0xa3   :  { %v161_v57 = vmul.f32 0.2, %v145_v53  ;;  %v7179_v54 = vld [vmem:[%s15262_s5 + $0x4c0] sm:$0xf]  ;;  %v6992_v48 = vor.u32 %v9569_v43, %v6989_v45  ;;  %v9673_v43 = vld [vmem:[%s15262_s5 + $0x684] sm:$0xf] }
  0xa4   :  { %v162_v60 = vmul.f32 0.2, %v158_v55 }
  0xa5   :  { %v163_v63 = vmax.f32 %v145_v53, %v161_v57  ;;  %v9685_v53 = vld [vmem:[%s15262_s5 + $0x6dc] sm:$0xf0] }
  0xa6   :  { %v164_v3 = vmax.f32 %v158_v55, %v162_v60  ;;  %v9621_v55 = vld [vmem:[%s15262_s5 + $0x4dc] sm:$0xf0]  ;;  %v7436_v62 = vor.u32 %v9685_v53, %v7435_v51  ;;  %v6957_v51 = vld [vmem:[%s15262_s5 + $0x320] sm:$0xf0] }
  0xa7   :  { %v10746_v4 = vpack.c.bf16 %v163_v63, %v163_v63  ;;  %v6891_v57 = vld [vmem:[%s15262_s5 + $0x280] sm:$0xf]  ;;  %v7180_v0 = vor.u32 %v9621_v55, %v7179_v54  ;;  %v9553_v53 = vld [vmem:[%s15262_s5 + $0x2c4] sm:$0xf] }
  0xa8   :  { %v10754_v9 = vpack.c.bf16 %v164_v3, %v164_v3  ;;  %v146_v10 = vpop.f32.mrf.mxu0  ;;  %v6635_v60 = vld [vmem:[%s15262_s5 + $0x80] sm:$0xf]  ;;  %v6925_v54 = vld [vmem:[%s15262_s5 + $0x2e0] sm:$0xf0] }
  0xa9   :  { %v159_v16 = vpop.f32.mrf.mxu1  ;;  %569 = vmatmul.bf16.vlgmr.msra.gmra.mxu2 %v10746_v4  ;;  %595 = vmatmul.bf16.vlgmr.msrb.gmra.mxu0 %v10746_v4  ;;  %v7403_v63 = vld [vmem:[%s15262_s5 + $0x680] sm:$0xf]  ;;  %v6636_v7 = vor.u32 %v9485_v61, %v6635_v60  ;;  %v6928_v55 = vor.u32 %v9553_v53, %v6925_v54  ;;  %v6893_v60 = vld [vmem:[%s15262_s5 + $0x2a0] sm:$0xf0] }
  0xaa   :  { %582 = vmatmul.bf16.vlgmr.msra.gmra.mxu3 %v10754_v9  ;;  %608 = vmatmul.bf16.vlgmr.msrb.gmra.mxu1 %v10754_v9  ;;  %v9613_v3 = vld [vmem:[%s15262_s5 + $0x49c] sm:$0xf0]  ;;  %v7404_v10 = vor.u32 %v9677_v1, %v7403_v63  ;;  %v9705_v61 = vld [vmem:[%s15262_s5 + $0x784] sm:$0xf] }
  0xab   :  { %2244 = vmatpush.bf16.msra.mxu3 %v7052_v5  ;;  %2231 = vmatpush.bf16.msra.mxu2 %v6796_v8  ;;  %v6892_v5 = vor.u32 %v9549_v58, %v6891_v57  ;;  %v6603_v8 = vld [vmem:[%s15262_s5 + $0x40] sm:$0xf]  ;;  %v7148_v12 = vor.u32 %v9613_v3, %v7147_v2  ;;  %v6701_v57 = vld [vmem:[%s15262_s5 + $0x120] sm:$0xf0] }
  0xac   :  { %2270 = vmatpush.bf16.msrb.mxu1 %v7564_v13  ;;  %2257 = vmatpush.bf16.msrb.mxu0 %v7308_v15  ;;  %v9669_v13 = vld [vmem:[%s15262_s5 + $0x65c] sm:$0xf0]  ;;  %v7533_v63 = vld [vmem:[%s15262_s5 + $0x7a0] sm:$0xf0] }
  0xad   :  { %v9605_v15 = vld [vmem:[%s15262_s5 + $0x45c] sm:$0xf0]  ;;  %v7536_v2 = vor.u32 %v9705_v61, %v7533_v63  ;;  %v7149_v53 = vld [vmem:[%s15262_s5 + $0x4a0] sm:$0xf0] }
  0xae   :  { %v7116_v24 = vor.u32 %v9605_v15, %v7115_v14  ;;  %v9597_v1 = vld [vmem:[%s15262_s5 + $0x41c] sm:$0xf0]  ;;  %v7501_v14 = vld [vmem:[%s15262_s5 + $0x760] sm:$0xf0] }
  0xaf   :  { %2245 = vmatpush.bf16.msra.mxu3 %v7020_v20  ;;  %2232 = vmatpush.bf16.msra.mxu2 %v6764_v23  ;;  %v9585_v20 = vld [vmem:[%s15262_s5 + $0x3c4] sm:$0xf]  ;;  %v7372_v23 = vor.u32 %v9669_v13, %v7371_v11 }
  0xb0   :  { %2271 = vmatpush.bf16.msrb.mxu1 %v7532_v26  ;;  %2258 = vmatpush.bf16.msrb.mxu0 %v7276_v28  ;;  %v9521_v26 = vld [vmem:[%s15262_s5 + $0x1c4] sm:$0xf]  ;;  %v7339_v28 = vld [vmem:[%s15262_s5 + $0x600] sm:$0xf]  ;;  %v7056_v34 = vor.u32 %v9585_v20, %v7053_v25 }
  0xb1   :  { %v6800_v36 = vor.u32 %v9521_v26, %v6797_v27  ;;  %v6861_v11 = vld [vmem:[%s15262_s5 + $0x260] sm:$0xf0] }
  0xb2   :  { %v7277_v20 = vld [vmem:[%s15262_s5 + $0x5a0] sm:$0xf0] }
  0xb3   :  { %2246 = vmatpush.bf16.msra.mxu3 %v6988_v32  ;;  %2233 = vmatpush.bf16.msra.mxu2 %v6732_v35  ;;  %v9713_v32 = vld [vmem:[%s15262_s5 + $0x7c4] sm:$0xf] }
  0xb4   :  { %2272 = vmatpush.bf16.msrb.mxu1 %v7500_v38  ;;  %2259 = vmatpush.bf16.msrb.mxu0 %v7244_v40  ;;  %v9577_v35 = vld [vmem:[%s15262_s5 + $0x384] sm:$0xf]  ;;  %v7340_v40 = vor.u32 %v9661_v29, %v7339_v28  ;;  %v7568_v41 = vor.u32 %v9713_v32, %v7565_v33 }
  0xb5   :  { %v9513_v38 = vld [vmem:[%s15262_s5 + $0x184] sm:$0xf]  ;;  %v7024_v42 = vor.u32 %v9577_v35, %v7021_v37 }
  0xb6   :  { %v7469_v26 = vld [vmem:[%s15262_s5 + $0x720] sm:$0xf0] }
  0xb7   :  { %2247 = vmatpush.bf16.msra.mxu3 %v6956_v44  ;;  %2234 = vmatpush.bf16.msra.mxu2 %v6700_v47  ;;  %v6768_v44 = vor.u32 %v9513_v38, %v6765_v39  ;;  %v6733_v47 = vld [vmem:[%s15262_s5 + $0x160] sm:$0xf0] }
  0xb8   :  { %2273 = vmatpush.bf16.msrb.mxu1 %v7468_v50  ;;  %2260 = vmatpush.bf16.msrb.mxu0 %v7212_v52  ;;  %v6736_v49 = vor.u32 %v9505_v46, %v6733_v47  ;;  %v9561_v50 = vld [vmem:[%s15262_s5 + $0x304] sm:$0xf] }
  0xb9   :  { %621 = vmatmul.bf16.vlgmr.msrb.gmra.mxu2 %v10746_v4  ;;  %647 = vmatmul.bf16.vlgmr.msra.gmra.mxu0 %v10746_v4  ;;  %v6859_v4 = vld [vmem:[%s15262_s5 + $0x240] sm:$0xf]  ;;  %v6960_v52 = vor.u32 %v9561_v50, %v6957_v51  ;;  %v9473_v28 = vld [vmem:[%s15262_s5 + $0x44] sm:$0xf] }
  0xba   :  { %634 = vmatmul.bf16.vlgmr.msrb.gmra.mxu3 %v10754_v9  ;;  %660 = vmatmul.bf16.vlgmr.msra.gmra.mxu1 %v10754_v9  ;;  %v9477_v9 = vld [vmem:[%s15262_s5 + $0x5c] sm:$0xf0]  ;;  %v6860_v16 = vor.u32 %v9541_v6, %v6859_v4  ;;  %v6669_v4 = vld [vmem:[%s15262_s5 + $0xe0] sm:$0xf0] }
  0xbb   :  { %2248 = vmatpush.bf16.msra.mxu3 %v6924_v56  ;;  %2235 = vmatpush.bf16.msra.mxu2 %v6668_v59  ;;  %v6604_v19 = vor.u32 %v9477_v9, %v6603_v8  ;;  %v9497_v56 = vld [vmem:[%s15262_s5 + $0x104] sm:$0xf] }
  0xbc   :  { %2274 = vmatpush.bf16.msrb.mxu1 %v7436_v62  ;;  %2261 = vmatpush.bf16.msrb.mxu0 %v7180_v0  ;;  %v6704_v58 = vor.u32 %v9497_v56, %v6701_v57  ;;  %v9545_v59 = vld [vmem:[%s15262_s5 + $0x284] sm:$0xf]  ;;  %v7083_v0 = vld [vmem:[%s15262_s5 + $0x400] sm:$0xf] }
  0xbd   :  { %v6896_v62 = vor.u32 %v9545_v59, %v6893_v60  ;;  %v7084_v3 = vor.u32 %v9597_v1, %v7083_v0  ;;  %v9649_v6 = vld [vmem:[%s15262_s5 + $0x5c4] sm:$0xf] }
  0xbe   :  { %v7309_v8 = vld [vmem:[%s15262_s5 + $0x5e0] sm:$0xf0] }
  0xbf   :  { %2249 = vmatpush.bf16.msra.mxu3 %v6892_v5  ;;  %2236 = vmatpush.bf16.msra.mxu2 %v6636_v7  ;;  %v9489_v5 = vld [vmem:[%s15262_s5 + $0xc4] sm:$0xf]  ;;  %v7312_v9 = vor.u32 %v9649_v6, %v7309_v8  ;;  %v7059_v8 = vld [vmem:[%s15262_s5 + $0x3c8] sm:$0xf] }
  0xc0   :  { %2275 = vmatpush.bf16.msrb.mxu1 %v7404_v10  ;;  %2262 = vmatpush.bf16.msrb.mxu0 %v7148_v12  ;;  %v6672_v7 = vor.u32 %v9489_v5, %v6669_v4  ;;  %v9537_v10 = vld [vmem:[%s15262_s5 + $0x244] sm:$0xf] }
  0xc1   :  { %v9697_v12 = vld [vmem:[%s15262_s5 + $0x744] sm:$0xf]  ;;  %v6864_v13 = vor.u32 %v9537_v10, %v6861_v11 }
  0xc2   :  { %v7504_v15 = vor.u32 %v9697_v12, %v7501_v14  ;;  %v6605_v29 = vld [vmem:[%s15262_s5 + $0x60] sm:$0xf0] }
  0xc3   :  { %2250 = vmatpush.bf16.msra.mxu3 %v6860_v16  ;;  %2237 = vmatpush.bf16.msra.mxu2 %v6604_v19  ;;  %v9481_v16 = vld [vmem:[%s15262_s5 + $0x84] sm:$0xf] }
  0xc4   :  { %2276 = vmatpush.bf16.msrb.mxu1 %v7372_v23  ;;  %2263 = vmatpush.bf16.msrb.mxu0 %v7116_v24  ;;  %v6640_v18 = vor.u32 %v9481_v16, %v6637_v17  ;;  %v9641_v19 = vld [vmem:[%s15262_s5 + $0x584] sm:$0xf] }
  0xc5   :  { %v7280_v21 = vor.u32 %v9641_v19, %v7277_v20  ;;  %v6829_v23 = vld [vmem:[%s15262_s5 + $0x220] sm:$0xf0]  ;;  %v7027_v19 = vld [vmem:[%s15262_s5 + $0x388] sm:$0xf] }
  0xc6   :  { %v9689_v24 = vld [vmem:[%s15262_s5 + $0x704] sm:$0xf]  ;;  %v6832_v25 = vor.u32 %v9529_v22, %v6829_v23  ;;  %v9582_v20 = vld [vmem:[%s15262_s5 + $0x3a4] sm:$0xf0] }
  0xc7   :  { %2251 = vmatpush.bf16.msra.mxu3 %v6828_v30  ;;  %2238 = vmatpush.bf16.msra.mxu2 %v6572_v31  ;;  %v7472_v27 = vor.u32 %v9689_v24, %v7469_v26  ;;  %v9633_v30 = vld [vmem:[%s15262_s5 + $0x544] sm:$0xf]  ;;  %v6608_v31 = vor.u32 %v9473_v28, %v6605_v29  ;;  %v6803_v22 = vld [vmem:[%s15262_s5 + $0x1c8] sm:$0xf]  ;;  %v7028_v24 = vor.u32 %v9582_v20, %v7027_v19 }
  0xc8   :  { %2277 = vmatpush.bf16.msrb.mxu1 %v7340_v40  ;;  %2264 = vmatpush.bf16.msrb.mxu0 %v7084_v3  ;;  %v7245_v32 = vld [vmem:[%s15262_s5 + $0x560] sm:$0xf0]  ;;  %v9526_v23 = vld [vmem:[%s15262_s5 + $0x1e4] sm:$0xf0] }
  0xc9   :  { %v7248_v33 = vor.u32 %v9633_v30, %v7245_v32  ;;  %v7437_v35 = vld [vmem:[%s15262_s5 + $0x6e0] sm:$0xf0]  ;;  %v9574_v28 = vld [vmem:[%s15262_s5 + $0x364] sm:$0xf0]  ;;  %v6804_v30 = vor.u32 %v9526_v23, %v6803_v22 }
  0xca   :  { %v9465_v37 = vld [vmem:[%s15262_s5 + $0x4] sm:$0xf]  ;;  %v6643_v22 = vld [vmem:[%s15262_s5 + $0x88] sm:$0xf] }
  0xcb   :  { %2296 = vmatpush.bf16.msrb.mxu3 %v7056_v34  ;;  %2283 = vmatpush.bf16.msrb.mxu2 %v6800_v36  ;;  %v9681_v34 = vld [vmem:[%s15262_s5 + $0x6c4] sm:$0xf] }
  0xcc   :  { %2322 = vmatpush.bf16.msra.mxu1 %v7568_v41  ;;  %2309 = vmatpush.bf16.msra.mxu0 %v7312_v9  ;;  %v7440_v36 = vor.u32 %v9681_v34, %v7437_v35  ;;  %v6573_v38 = vld [vmem:[%s15262_s5 + $0x20] sm:$0xf0]  ;;  %v9590_v9 = vld [vmem:[%s15262_s5 + $0x3e4] sm:$0xf0] }
  0xcd   :  { %v9625_v39 = vld [vmem:[%s15262_s5 + $0x504] sm:$0xf]  ;;  %v6576_v40 = vor.u32 %v9465_v37, %v6573_v38  ;;  %v9518_v34 = vld [vmem:[%s15262_s5 + $0x1a4] sm:$0xf0] }
  0xce   :  { %v7213_v41 = vld [vmem:[%s15262_s5 + $0x520] sm:$0xf0] }
  0xcf   :  { %2297 = vmatpush.bf16.msrb.mxu3 %v7024_v42  ;;  %2284 = vmatpush.bf16.msrb.mxu2 %v6768_v44  ;;  %v7216_v42 = vor.u32 %v9625_v39, %v7213_v41  ;;  %v7405_v44 = vld [vmem:[%s15262_s5 + $0x6a0] sm:$0xf0]  ;;  %v6963_v39 = vld [vmem:[%s15262_s5 + $0x308] sm:$0xf] }
  0xd0   :  { %2323 = vmatpush.bf16.msra.mxu1 %v7536_v2  ;;  %2310 = vmatpush.bf16.msra.mxu0 %v7280_v21  ;;  %v7408_v45 = vor.u32 %v9673_v43, %v7405_v44  ;;  %v9617_v46 = vld [vmem:[%s15262_s5 + $0x4c4] sm:$0xf]  ;;  %v6739_v44 = vld [vmem:[%s15262_s5 + $0x148] sm:$0xf] }
  0xd1   :  { %v7181_v47 = vld [vmem:[%s15262_s5 + $0x4e0] sm:$0xf0] }
  0xd2   :  { %v7373_v50 = vld [vmem:[%s15262_s5 + $0x660] sm:$0xf0] }
  0xd3   :  { %2298 = vmatpush.bf16.msrb.mxu3 %v6992_v48  ;;  %2285 = vmatpush.bf16.msrb.mxu2 %v6736_v49  ;;  %v7184_v48 = vor.u32 %v9617_v46, %v7181_v47  ;;  %v9665_v49 = vld [vmem:[%s15262_s5 + $0x644] sm:$0xf]  ;;  %v6931_v47 = vld [vmem:[%s15262_s5 + $0x2c8] sm:$0xf] }
  0xd4   :  { %2324 = vmatpush.bf16.msra.mxu1 %v7504_v15  ;;  %2311 = vmatpush.bf16.msra.mxu0 %v7248_v33  ;;  %v7376_v51 = vor.u32 %v9665_v49, %v7373_v50  ;;  %v7341_v56 = vld [vmem:[%s15262_s5 + $0x620] sm:$0xf0]  ;;  %v7060_v15 = vor.u32 %v9590_v9, %v7059_v8  ;;  %v6771_v33 = vld [vmem:[%s15262_s5 + $0x188] sm:$0xf] }
  0xd5   :  { %v9601_v59 = vld [vmem:[%s15262_s5 + $0x444] sm:$0xf]  ;;  %v6772_v41 = vor.u32 %v9518_v34, %v6771_v33  ;;  %v7571_v50 = vld [vmem:[%s15262_s5 + $0x7c8] sm:$0xf] }
  0xd6   :  { %v7117_v60 = vld [vmem:[%s15262_s5 + $0x460] sm:$0xf0]  ;;  %v7315_v9 = vld [vmem:[%s15262_s5 + $0x5c8] sm:$0xf] }
  0xd7   :  { %2299 = vmatpush.bf16.msrb.mxu3 %v6960_v52  ;;  %2286 = vmatpush.bf16.msrb.mxu2 %v6704_v58  ;;  %v9609_v52 = vld [vmem:[%s15262_s5 + $0x484] sm:$0xf]  ;;  %v11109_v58 = vld [vmem:[%s15263_s4] sm:$0xf]  ;;  %v7120_v61 = vor.u32 %v9601_v59, %v7117_v60  ;;  %v7475_v33 = vld [vmem:[%s15262_s5 + $0x708] sm:$0xf] }
  0xd8   :  { %2325 = vmatpush.bf16.msra.mxu1 %v7472_v27  ;;  %2312 = vmatpush.bf16.msra.mxu0 %v7216_v42  ;;  %v7152_v54 = vor.u32 %v9609_v52, %v7149_v53  ;;  %v9593_v63 = vld [vmem:[%s15262_s5 + $0x404] sm:$0xf]  ;;  %v233_v6 = vperm.slane %v11109_v58, 0  ;;  %v236_v26 = vperm.slane %v11109_v58, 3  ;;  %v6995_v27 = vld [vmem:[%s15262_s5 + $0x348] sm:$0xf] }
  0xd9   :  { %v7085_v0 = vld [vmem:[%s15262_s5 + $0x420] sm:$0xf0]  ;;  %v235_v43 = vperm.slane %v11109_v58, 2  ;;  %v9694_v34 = vld [vmem:[%s15262_s5 + $0x724] sm:$0xf0] }
  0xda   :  { %v7088_v1 = vor.u32 %v9593_v63, %v7085_v0 }
  0xdb   :  { %2300 = vmatpush.bf16.msrb.mxu3 %v6928_v55  ;;  %2287 = vmatpush.bf16.msrb.mxu2 %v6672_v7  ;;  %v9657_v55 = vld [vmem:[%s15262_s5 + $0x604] sm:$0xf] }
  0xdc   :  { %2326 = vmatpush.bf16.msra.mxu1 %v7440_v36  ;;  %2313 = vmatpush.bf16.msra.mxu0 %v7184_v48  ;;  %v7344_v57 = vor.u32 %v9657_v55, %v7341_v56  ;;  %v6996_v36 = vor.u32 %v9574_v28, %v6995_v27  ;;  %v9558_v48 = vld [vmem:[%s15262_s5 + $0x2e4] sm:$0xf0] }
  0xdd   :  { %v6932_v60 = vor.u32 %v9558_v48, %v6931_v47  ;;  %v9646_v27 = vld [vmem:[%s15262_s5 + $0x5a4] sm:$0xf0] }
  0xde   :  { %v9686_v47 = vld [vmem:[%s15262_s5 + $0x6e4] sm:$0xf0] }
  0xdf   :  { %2301 = vmatpush.bf16.msrb.mxu3 %v6896_v62  ;;  %2288 = vmatpush.bf16.msrb.mxu2 %v6640_v18  ;;  %v234_v62 = vperm.slane %v11109_v58, 1  ;;  %v9502_v58 = vld [vmem:[%s15262_s5 + $0x124] sm:$0xf0] }
  0xe0   :  { %2327 = vmatpush.bf16.msra.mxu1 %v7408_v45  ;;  %2314 = vmatpush.bf16.msra.mxu0 %v7152_v54  ;;  %v9510_v45 = vld [vmem:[%s15262_s5 + $0x164] sm:$0xf0] }
  0xe1   :  { %v6740_v53 = vor.u32 %v9510_v45, %v6739_v44  ;;  %v7476_v44 = vor.u32 %v9694_v34, %v7475_v33  ;;  %v7123_v33 = vld [vmem:[%s15262_s5 + $0x448] sm:$0xf] }
  0xe2   :  { %v9606_v34 = vld [vmem:[%s15262_s5 + $0x464] sm:$0xf0] }
  0xe3   :  { %2302 = vmatpush.bf16.msrb.mxu3 %v6864_v13  ;;  %2289 = vmatpush.bf16.msrb.mxu2 %v6608_v31 }
  0xe4   :  { %2328 = vmatpush.bf16.msra.mxu1 %v7376_v51  ;;  %2315 = vmatpush.bf16.msra.mxu0 %v7120_v61  ;;  %v9718_v51 = vld [vmem:[%s15262_s5 + $0x7e4] sm:$0xf0] }
  0xe5   :  { %v7572_v61 = vor.u32 %v9718_v51, %v7571_v50  ;;  %v9578_v50 = vld [vmem:[%s15262_s5 + $0x38c] sm:$0xf] }
  0xe6   :  { %v7029_v51 = vld [vmem:[%s15262_s5 + $0x3a8] sm:$0xf0] }
  0xe7   :  { %2303 = vmatpush.bf16.msrb.mxu3 %v6832_v25  ;;  %2290 = vmatpush.bf16.msrb.mxu2 %v6576_v40  ;;  %v9566_v40 = vld [vmem:[%s15262_s5 + $0x324] sm:$0xf0] }
  0xe8   :  { %2329 = vmatpush.bf16.msra.mxu1 %v7344_v57  ;;  %2316 = vmatpush.bf16.msra.mxu0 %v7088_v1  ;;  %v6964_v46 = vor.u32 %v9566_v40, %v6963_v39  ;;  %v6707_v57 = vld [vmem:[%s15262_s5 + $0x108] sm:$0xf] }
  0xe9   :  { %v6611_v39 = vld [vmem:[%s15262_s5 + $0x48] sm:$0xf] }
  0xea   :  { %v9478_v40 = vld [vmem:[%s15262_s5 + $0x64] sm:$0xf0] }
  0xeb   :  { %v6612_v48 = vor.u32 %v9478_v40, %v6611_v39  ;;  %v9546_v40 = vld [vmem:[%s15262_s5 + $0x28c] sm:$0xf] }
 0x126   :  { %v596_v2 = vpop.f32.mrf.mxu0 }
 0x127   :  { %v597_v3 = vadd.f32 %v596_v2, %v234_v62  ;;  %v609_v5 = vpop.f32.mrf.mxu1  ;;  %v6899_v62 = vld [vmem:[%s15262_s5 + $0x288] sm:$0xf] }
 0x128   :  { %v9550_v2 = vld [vmem:[%s15262_s5 + $0x2a4] sm:$0xf0] }
 0x129   :  { %v610_v4 = vadd.f32 %v609_v5, %v597_v3  ;;  %v7539_v3 = vld [vmem:[%s15262_s5 + $0x788] sm:$0xf] }
 0x12a   :  { %v9710_v5 = vld [vmem:[%s15262_s5 + $0x7a4] sm:$0xf0] }
 0x12b   :  { %v666_v7 = vmul.f32 0.2, %v610_v4 }
 0x12c   :  { %v570_v10 = vpop.f32.mrf.mxu2 }
 0x12d   :  { %v670_v11 = vmax.f32 %v610_v4, %v666_v7  ;;  %v571_v12 = vadd.f32 %v570_v10, %v233_v6  ;;  %v583_v13 = vpop.f32.mrf.mxu3  ;;  %v6708_v4 = vor.u32 %v9502_v58, %v6707_v57  ;;  %v6675_v6 = vld [vmem:[%s15262_s5 + $0xc8] sm:$0xf]  ;;  %v9522_v57 = vld [vmem:[%s15262_s5 + $0x1cc] sm:$0xf] }
 0x12e   :  { %v598_v14 = vpop.f32.mrf.mxu0  ;;  %v9494_v7 = vld [vmem:[%s15262_s5 + $0xe4] sm:$0xf0]  ;;  %v6805_v58 = vld [vmem:[%s15262_s5 + $0x1e8] sm:$0xf0] }
 0x12f   :  { %v11131_v16 = vpack.c.bf16 %v670_v11, %v670_v11  ;;  %v584_v17 = vadd.f32 %v583_v13, %v571_v12  ;;  %v611_v18 = vpop.f32.mrf.mxu1  ;;  %v9654_v10 = vld [vmem:[%s15262_s5 + $0x5e4] sm:$0xf0]  ;;  %v6900_v11 = vor.u32 %v9550_v2, %v6899_v62  ;;  %v7540_v12 = vor.u32 %v9710_v5, %v7539_v3  ;;  %v6997_v2 = vld [vmem:[%s15262_s5 + $0x368] sm:$0xf0] }
 0x130   :  { %v6867_v13 = vld [vmem:[%s15262_s5 + $0x248] sm:$0xf]  ;;  %v6676_v20 = vor.u32 %v9494_v7, %v6675_v6  ;;  %v6808_v3 = vor.u32 %v9522_v57, %v6805_v58  ;;  %v9514_v7 = vld [vmem:[%s15262_s5 + $0x18c] sm:$0xf] }
 0x131   :  { %v665_v21 = vmul.f32 0.2, %v584_v17  ;;  %2252 = vmatmul.bf16.vlgmr.msra.gmra.mxu3 %v11131_v16  ;;  %v9702_v18 = vld [vmem:[%s15262_s5 + $0x764] sm:$0xf0]  ;;  %v9698_v57 = vld [vmem:[%s15262_s5 + $0x74c] sm:$0xf] }
 0x132   :  { %2348 = vmatpush.bf16.msra.mxu3 %v7060_v15  ;;  %v9542_v15 = vld [vmem:[%s15262_s5 + $0x264] sm:$0xf0]  ;;  %v7509_v58 = vld [vmem:[%s15262_s5 + $0x768] sm:$0xf0] }
 0x133   :  { %v669_v25 = vmax.f32 %v584_v17, %v665_v21  ;;  %v7507_v17 = vld [vmem:[%s15262_s5 + $0x748] sm:$0xf]  ;;  %v7316_v21 = vor.u32 %v9654_v10, %v7315_v9  ;;  %v6868_v28 = vor.u32 %v9542_v15, %v6867_v13  ;;  %v9562_v13 = vld [vmem:[%s15262_s5 + $0x30c] sm:$0xf] }
 0x134   :  { %v572_v29 = vpop.f32.mrf.mxu2  ;;  %v7187_v5 = vld [vmem:[%s15262_s5 + $0x4c8] sm:$0xf] }
 0x135   :  { %v11153_v31 = vpack.c.bf16 %v669_v25, %v669_v25  ;;  %v585_v32 = vpop.f32.mrf.mxu3  ;;  %v9486_v25 = vld [vmem:[%s15262_s5 + $0xa4] sm:$0xf0]  ;;  %v7508_v29 = vor.u32 %v9702_v18, %v7507_v17 }
 0x136   :  { %2349 = vmatpush.bf16.msra.mxu3 %v7028_v24  ;;  %v648_v35 = vpop.f32.mrf.mxu0  ;;  %v9534_v32 = vld [vmem:[%s15262_s5 + $0x224] sm:$0xf0] }
 0x137   :  { %v649_v37 = vadd.f32 %v648_v35, %v236_v26  ;;  %v661_v38 = vpop.f32.mrf.mxu1  ;;  %2239 = vmatmul.bf16.vlgmr.msra.gmra.mxu2 %v11153_v31  ;;  %v7283_v26 = vld [vmem:[%s15262_s5 + $0x588] sm:$0xf]  ;;  %v6644_v35 = vor.u32 %v9486_v25, %v6643_v22 }
 0x138   :  { %2335 = vmatpush.bf16.msra.mxu2 %v6804_v30  ;;  %v6835_v30 = vld [vmem:[%s15262_s5 + $0x208] sm:$0xf] }
 0x139   :  { %v662_v42 = vadd.f32 %v661_v38, %v649_v37  ;;  %v9586_v37 = vld [vmem:[%s15262_s5 + $0x3cc] sm:$0xf]  ;;  %v7379_v10 = vld [vmem:[%s15262_s5 + $0x648] sm:$0xf] }
 0x13a   :  { %2350 = vmatpush.bf16.msra.mxu3 %v6996_v36  ;;  %v7284_v36 = vor.u32 %v9646_v27, %v7283_v26  ;;  %v7061_v38 = vld [vmem:[%s15262_s5 + $0x3e8] sm:$0xf0]  ;;  %v7155_v17 = vld [vmem:[%s15262_s5 + $0x488] sm:$0xf] }
 0x13b   :  { %v668_v49 = vmul.f32 0.2, %v662_v42  ;;  %v7064_v45 = vor.u32 %v9586_v37, %v7061_v38  ;;  %v9614_v18 = vld [vmem:[%s15262_s5 + $0x4a4] sm:$0xf0]  ;;  %v9554_v26 = vld [vmem:[%s15262_s5 + $0x2cc] sm:$0xf] }
 0x13c   :  { %2336 = vmatpush.bf16.msra.mxu2 %v6772_v41  ;;  %v622_v52 = vpop.f32.mrf.mxu2  ;;  %v7251_v41 = vld [vmem:[%s15262_s5 + $0x548] sm:$0xf]  ;;  %v7156_v27 = vor.u32 %v9614_v18, %v7155_v17  ;;  %v6709_v37 = vld [vmem:[%s15262_s5 + $0x128] sm:$0xf0] }
 0x13d   :  { %v672_v54 = vmax.f32 %v662_v42, %v668_v49  ;;  %v623_v55 = vadd.f32 %v622_v52, %v235_v43  ;;  %v635_v56 = vpop.f32.mrf.mxu3  ;;  %v9638_v42 = vld [vmem:[%s15262_s5 + $0x564] sm:$0xf0]  ;;  %v6836_v43 = vor.u32 %v9534_v32, %v6835_v30  ;;  %v7573_v30 = vld [vmem:[%s15262_s5 + $0x7e8] sm:$0xf0] }
 0x13e   :  { %2351 = vmatpush.bf16.msra.mxu3 %v6964_v46  ;;  %v650_v59 = vpop.f32.mrf.mxu0  ;;  %v7443_v46 = vld [vmem:[%s15262_s5 + $0x6c8] sm:$0xf]  ;;  %v7252_v49 = vor.u32 %v9638_v42, %v7251_v41  ;;  %v7124_v41 = vor.u32 %v9606_v34, %v7123_v33  ;;  %v6901_v42 = vld [vmem:[%s15262_s5 + $0x2a8] sm:$0xf0]  ;;  %v6811_v33 = vld [vmem:[%s15262_s5 + $0x1d0] sm:$0xf] }
 0x13f   :  { %v11196_v63 = vpack.c.bf16 %v672_v54, %v672_v54  ;;  %v636_v0 = vadd.f32 %v635_v56, %v623_v55  ;;  %v663_v1 = vpop.f32.mrf.mxu1  ;;  %v6579_v52 = vld [vmem:[%s15262_s5 + $0x8] sm:$0xf]  ;;  %v7444_v56 = vor.u32 %v9686_v47, %v7443_v46  ;;  %v7032_v59 = vor.u32 %v9578_v50, %v7029_v51  ;;  %v9650_v50 = vld [vmem:[%s15262_s5 + $0x5cc] sm:$0xf]  ;;  %v9527_v34 = vld [vmem:[%s15262_s5 + $0x1ec] sm:$0xf0] }
 0x140   :  { %2337 = vmatpush.bf16.msra.mxu2 %v6740_v53  ;;  %v9470_v53 = vld [vmem:[%s15262_s5 + $0x24] sm:$0xf0]  ;;  %v9570_v1 = vld [vmem:[%s15262_s5 + $0x34c] sm:$0xf] }
 0x141   :  { %v667_v8 = vmul.f32 0.2, %v636_v0  ;;  %2278 = vmatmul.bf16.vlgmr.msrb.gmra.mxu1 %v11196_v63  ;;  %2304 = vmatmul.bf16.vlgmr.msrb.gmra.mxu3 %v11131_v16  ;;  %v7219_v54 = vld [vmem:[%s15262_s5 + $0x508] sm:$0xf]  ;;  %v6580_v62 = vor.u32 %v9470_v53, %v6579_v52  ;;  %v7000_v9 = vor.u32 %v9570_v1, %v6997_v2  ;;  %v7317_v51 = vld [vmem:[%s15262_s5 + $0x5e8] sm:$0xf0]  ;;  %v6904_v52 = vor.u32 %v9546_v40, %v6901_v42 }
 0x142   :  { %2352 = vmatpush.bf16.msra.mxu3 %v6932_v60  ;;  %2374 = vmatpush.bf16.msrb.mxu1 %v7572_v61  ;;  %v9630_v55 = vld [vmem:[%s15262_s5 + $0x524] sm:$0xf0]  ;;  %v7285_v1 = vld [vmem:[%s15262_s5 + $0x5a8] sm:$0xf0]  ;;  %v7003_v40 = vld [vmem:[%s15262_s5 + $0x350] sm:$0xf]  ;;  %v6812_v42 = vor.u32 %v9527_v34, %v6811_v33 }
 0x143   :  { %v671_v14 = vmax.f32 %v636_v0, %v667_v8  ;;  %v7411_v60 = vld [vmem:[%s15262_s5 + $0x688] sm:$0xf]  ;;  %v7220_v0 = vor.u32 %v9630_v55, %v7219_v54  ;;  %v6773_v8 = vld [vmem:[%s15262_s5 + $0x1a8] sm:$0xf0] }
 0x144   :  { %2338 = vmatpush.bf16.msra.mxu2 %v6708_v4  ;;  %v624_v19 = vpop.f32.mrf.mxu2  ;;  %v9678_v61 = vld [vmem:[%s15262_s5 + $0x6a4] sm:$0xf0]  ;;  %v6776_v15 = vor.u32 %v9514_v7, %v6773_v8  ;;  %v9538_v54 = vld [vmem:[%s15262_s5 + $0x24c] sm:$0xf] }
 0x145   :  { %v11236_v23 = vpack.c.bf16 %v671_v14, %v671_v14  ;;  %v637_v24 = vpop.f32.mrf.mxu3  ;;  %v9622_v4 = vld [vmem:[%s15262_s5 + $0x4e4] sm:$0xf0]  ;;  %v7412_v6 = vor.u32 %v9678_v61, %v7411_v60  ;;  %v6965_v14 = vld [vmem:[%s15262_s5 + $0x328] sm:$0xf0]  ;;  %v7320_v60 = vor.u32 %v9650_v50, %v7317_v51 }
 0x146   :  { %2353 = vmatpush.bf16.msra.mxu3 %v6900_v11  ;;  %2375 = vmatpush.bf16.msrb.mxu1 %v7540_v12  ;;  %v9670_v11 = vld [vmem:[%s15262_s5 + $0x664] sm:$0xf0]  ;;  %v7188_v12 = vor.u32 %v9622_v4, %v7187_v5  ;;  %v6968_v22 = vor.u32 %v9562_v13, %v6965_v14  ;;  %v9482_v61 = vld [vmem:[%s15262_s5 + $0x8c] sm:$0xf] }
 0x147   :  { %2265 = vmatmul.bf16.vlgmr.msrb.gmra.mxu0 %v11236_v23  ;;  %2291 = vmatmul.bf16.vlgmr.msrb.gmra.mxu2 %v11153_v31  ;;  %v7380_v19 = vor.u32 %v9670_v11, %v7379_v10  ;;  %v7347_v24 = vld [vmem:[%s15262_s5 + $0x608] sm:$0xf]  ;;  %v9530_v5 = vld [vmem:[%s15262_s5 + $0x20c] sm:$0xf]  ;;  %v7067_v10 = vld [vmem:[%s15262_s5 + $0x3d0] sm:$0xf] }
 0x148   :  { %2339 = vmatpush.bf16.msra.mxu2 %v6676_v20  ;;  %2361 = vmatpush.bf16.msrb.mxu0 %v7316_v21  ;;  %v9506_v20 = vld [vmem:[%s15262_s5 + $0x14c] sm:$0xf]  ;;  %v9662_v25 = vld [vmem:[%s15262_s5 + $0x624] sm:$0xf0]  ;;  %v9591_v11 = vld [vmem:[%s15262_s5 + $0x3ec] sm:$0xf0] }
 0x149   :  { %v6741_v21 = vld [vmem:[%s15262_s5 + $0x168] sm:$0xf0]  ;;  %v7091_v46 = vld [vmem:[%s15262_s5 + $0x408] sm:$0xf] }
 0x14a   :  { %2354 = vmatpush.bf16.msra.mxu3 %v6868_v28  ;;  %2376 = vmatpush.bf16.msrb.mxu1 %v7508_v29  ;;  %v6933_v28 = vld [vmem:[%s15262_s5 + $0x2e8] sm:$0xf0]  ;;  %v6744_v32 = vor.u32 %v9506_v20, %v6741_v21  ;;  %v9598_v47 = vld [vmem:[%s15262_s5 + $0x424] sm:$0xf0] }
 0x14b   :  { %v9714_v29 = vld [vmem:[%s15262_s5 + $0x7cc] sm:$0xf]  ;;  %v6936_v38 = vor.u32 %v9554_v26, %v6933_v28  ;;  %v7092_v55 = vor.u32 %v9598_v47, %v7091_v46  ;;  %v9583_v26 = vld [vmem:[%s15262_s5 + $0x3ac] sm:$0xf0] }
 0x14c   :  { %2340 = vmatpush.bf16.msra.mxu2 %v6644_v35  ;;  %2362 = vmatpush.bf16.msrb.mxu0 %v7284_v36  ;;  %v7348_v35 = vor.u32 %v9662_v25, %v7347_v24  ;;  %v9498_v36 = vld [vmem:[%s15262_s5 + $0x10c] sm:$0xf]  ;;  %v7576_v39 = vor.u32 %v9714_v29, %v7573_v30  ;;  %v7035_v25 = vld [vmem:[%s15262_s5 + $0x390] sm:$0xf] }
 0x14d   :  { %v6837_v4 = vld [vmem:[%s15262_s5 + $0x228] sm:$0xf0]  ;;  %v6779_v46 = vld [vmem:[%s15262_s5 + $0x190] sm:$0xf] }
 0x14e   :  { %2355 = vmatpush.bf16.msra.mxu3 %v6836_v43  ;;  %2377 = vmatpush.bf16.msrb.mxu1 %v7476_v44  ;;  %v9706_v43 = vld [vmem:[%s15262_s5 + $0x78c] sm:$0xf]  ;;  %v6840_v17 = vor.u32 %v9530_v5, %v6837_v4  ;;  %v9519_v47 = vld [vmem:[%s15262_s5 + $0x1ac] sm:$0xf0] }
 0x14f   :  { %v7541_v44 = vld [vmem:[%s15262_s5 + $0x7a8] sm:$0xf0]  ;;  %v9719_v5 = vld [vmem:[%s15262_s5 + $0x7ec] sm:$0xf0] }
 0x150   :  { %2341 = vmatpush.bf16.msra.mxu2 %v6612_v48  ;;  %2363 = vmatpush.bf16.msrb.mxu0 %v7252_v49  ;;  %v9490_v48 = vld [vmem:[%s15262_s5 + $0xcc] sm:$0xf]  ;;  %v7544_v53 = vor.u32 %v9706_v43, %v7541_v44 }
 0x151   :  { %2330 = vmatmul.bf16.vlgmr.msra.gmra.mxu1 %v11196_v63  ;;  %2356 = vmatmul.bf16.vlgmr.msra.gmra.mxu3 %v11131_v16  ;;  %v6677_v49 = vld [vmem:[%s15262_s5 + $0xe8] sm:$0xf0] }
 0x152   :  { %2400 = vmatpush.bf16.msrb.mxu3 %v7064_v45  ;;  %2378 = vmatpush.bf16.msrb.mxu1 %v7444_v56  ;;  %v6712_v45 = vor.u32 %v9498_v36, %v6709_v37  ;;  %v6869_v56 = vld [vmem:[%s15262_s5 + $0x268] sm:$0xf0] }
 0x153   :  { %v6872_v2 = vor.u32 %v9538_v54, %v6869_v56  ;;  %v7477_v7 = vld [vmem:[%s15262_s5 + $0x728] sm:$0xf0]  ;;  %v6780_v54 = vor.u32 %v9519_v47, %v6779_v46  ;;  %v9695_v46 = vld [vmem:[%s15262_s5 + $0x72c] sm:$0xf0] }
 0x154   :  { %2342 = vmatpush.bf16.msra.mxu2 %v6580_v62  ;;  %2364 = vmatpush.bf16.msrb.mxu0 %v7220_v0  ;;  %v6645_v62 = vld [vmem:[%s15262_s5 + $0xa8] sm:$0xf0] }
 0x155   :  { %v9642_v0 = vld [vmem:[%s15262_s5 + $0x58c] sm:$0xf]  ;;  %v6648_v8 = vor.u32 %v9482_v61, %v6645_v62 }
 0x156   :  { %2401 = vmatpush.bf16.msrb.mxu3 %v7032_v59  ;;  %2379 = vmatpush.bf16.msrb.mxu1 %v7412_v6  ;;  %v6680_v59 = vor.u32 %v9490_v48, %v6677_v49  ;;  %v9690_v6 = vld [vmem:[%s15262_s5 + $0x70c] sm:$0xf] }
 0x157   :  { %2317 = vmatmul.bf16.vlgmr.msra.gmra.mxu0 %v11236_v23  ;;  %2343 = vmatmul.bf16.vlgmr.msra.gmra.mxu2 %v11153_v31  ;;  %v6613_v13 = vld [vmem:[%s15262_s5 + $0x68] sm:$0xf0]  ;;  %v7480_v18 = vor.u32 %v9690_v6, %v7477_v7 }
 0x158   :  { %2387 = vmatpush.bf16.msrb.mxu2 %v6808_v3  ;;  %2365 = vmatpush.bf16.msrb.mxu0 %v7188_v12  ;;  %v7512_v3 = vor.u32 %v9698_v57, %v7509_v58  ;;  %v9474_v12 = vld [vmem:[%s15262_s5 + $0x4c] sm:$0xf]  ;;  %v6747_v58 = vld [vmem:[%s15262_s5 + $0x150] sm:$0xf] }
 0x159   :  { %v9634_v14 = vld [vmem:[%s15262_s5 + $0x54c] sm:$0xf] }
 0x15a   :  { %2402 = vmatpush.bf16.msrb.mxu3 %v7000_v9  ;;  %2380 = vmatpush.bf16.msrb.mxu1 %v7380_v19  ;;  %v7288_v9 = vor.u32 %v9642_v0, %v7285_v1  ;;  %v7068_v19 = vor.u32 %v9591_v11, %v7067_v10  ;;  %v9682_v20 = vld [vmem:[%s15262_s5 + $0x6cc] sm:$0xf]  ;;  %v6939_v0 = vld [vmem:[%s15262_s5 + $0x2d0] sm:$0xf] }
 0x15b   :  { %v7445_v21 = vld [vmem:[%s15262_s5 + $0x6e8] sm:$0xf0]  ;;  %v9503_v10 = vld [vmem:[%s15262_s5 + $0x12c] sm:$0xf0] }
 0x15c   :  { %2388 = vmatpush.bf16.msrb.mxu2 %v6776_v15  ;;  %2366 = vmatpush.bf16.msrb.mxu0 %v7156_v27  ;;  %v7253_v15 = vld [vmem:[%s15262_s5 + $0x568] sm:$0xf0] }
 0x15d   :  { %v7256_v24 = vor.u32 %v9634_v14, %v7253_v15  ;;  %v9466_v27 = vld [vmem:[%s15262_s5 + $0xc] sm:$0xf]  ;;  %v9551_v15 = vld [vmem:[%s15262_s5 + $0x2ac] sm:$0xf0] }
 0x15e   :  { %2403 = vmatpush.bf16.msrb.mxu3 %v6968_v22  ;;  %2381 = vmatpush.bf16.msrb.mxu1 %v7348_v35  ;;  %v6616_v22 = vor.u32 %v9474_v12, %v6613_v13  ;;  %v6581_v28 = vld [vmem:[%s15262_s5 + $0x28] sm:$0xf0]  ;;  %v7036_v35 = vor.u32 %v9583_v26, %v7035_v25  ;;  %v6907_v13 = vld [vmem:[%s15262_s5 + $0x290] sm:$0xf] }
 0x15f   :  { %v9626_v29 = vld [vmem:[%s15262_s5 + $0x50c] sm:$0xf]  ;;  %v7323_v25 = vld [vmem:[%s15262_s5 + $0x5d0] sm:$0xf] }
 0x160   :  { %2389 = vmatpush.bf16.msrb.mxu2 %v6744_v32  ;;  %2367 = vmatpush.bf16.msrb.mxu0 %v7124_v41  ;;  %v7221_v30 = vld [vmem:[%s15262_s5 + $0x528] sm:$0xf0]  ;;  %v7448_v32 = vor.u32 %v9682_v20, %v7445_v21  ;;  %v9575_v41 = vld [vmem:[%s15262_s5 + $0x36c] sm:$0xf0] }
 0x161   :  { %2382 = vmatmul.bf16.vlgmr.msrb.gmra.mxu1 %v11196_v63  ;;  %v9674_v36 = vld [vmem:[%s15262_s5 + $0x68c] sm:$0xf]  ;;  %v7004_v48 = vor.u32 %v9575_v41, %v7003_v40  ;;  %v9655_v26 = vld [vmem:[%s15262_s5 + $0x5ec] sm:$0xf0] }
 0x162   :  { %2404 = vmatpush.bf16.msrb.mxu3 %v6936_v38  ;;  %2426 = vmatpush.bf16.msra.mxu1 %v7576_v39  ;;  %v7413_v37 = vld [vmem:[%s15262_s5 + $0x6a8] sm:$0xf0]  ;;  %v6584_v38 = vor.u32 %v9466_v27, %v6581_v28  ;;  %v7224_v39 = vor.u32 %v9626_v29, %v7221_v30  ;;  %v6908_v27 = vor.u32 %v9551_v15, %v6907_v13  ;;  %v6875_v30 = vld [vmem:[%s15262_s5 + $0x250] sm:$0xf]  ;;  %v9571_v13 = vld [vmem:[%s15262_s5 + $0x354] sm:$0xf] }
 0x163   :  { %v9618_v43 = vld [vmem:[%s15262_s5 + $0x4cc] sm:$0xf]  ;;  %v7324_v34 = vor.u32 %v9655_v26, %v7323_v25  ;;  %v9647_v40 = vld [vmem:[%s15262_s5 + $0x5ac] sm:$0xf0]  ;;  %v7005_v15 = vld [vmem:[%s15262_s5 + $0x370] sm:$0xf0] }
 0x164   :  { %2390 = vmatpush.bf16.msrb.mxu2 %v6712_v45  ;;  %2368 = vmatpush.bf16.msrb.mxu0 %v7092_v55  ;;  %v7189_v44 = vld [vmem:[%s15262_s5 + $0x4e8] sm:$0xf0]  ;;  %v7416_v45 = vor.u32 %v9674_v36, %v7413_v37  ;;  %v9703_v36 = vld [vmem:[%s15262_s5 + $0x76c] sm:$0xf0] }
 0x165   :  { %v9666_v49 = vld [vmem:[%s15262_s5 + $0x64c] sm:$0xf]  ;;  %v7192_v51 = vor.u32 %v9618_v43, %v7189_v44  ;;  %v6651_v37 = vld [vmem:[%s15262_s5 + $0x90] sm:$0xf] }
 0x166   :  { %2405 = vmatpush.bf16.msrb.mxu3 %v6904_v52  ;;  %2427 = vmatpush.bf16.msra.mxu1 %v7544_v53  ;;  %v7381_v50 = vld [vmem:[%s15262_s5 + $0x668] sm:$0xf0]  ;;  %v6971_v52 = vld [vmem:[%s15262_s5 + $0x310] sm:$0xf] }
 0x167   :  { %2369 = vmatmul.bf16.vlgmr.msrb.gmra.mxu0 %v11236_v23  ;;  %v9567_v53 = vld [vmem:[%s15262_s5 + $0x32c] sm:$0xf0]  ;;  %v9610_v55 = vld [vmem:[%s15262_s5 + $0x48c] sm:$0xf]  ;;  %v7384_v57 = vor.u32 %v9666_v49, %v7381_v50  ;;  %v9587_v49 = vld [vmem:[%s15262_s5 + $0x3d4] sm:$0xf] }
 0x168   :  { %2391 = vmatpush.bf16.msrb.mxu2 %v6680_v59  ;;  %2413 = vmatpush.bf16.msra.mxu0 %v7320_v60  ;;  %v7157_v56 = vld [vmem:[%s15262_s5 + $0x4a8] sm:$0xf0]  ;;  %v9511_v59 = vld [vmem:[%s15262_s5 + $0x16c] sm:$0xf0]  ;;  %v6972_v60 = vor.u32 %v9567_v53, %v6971_v52  ;;  %v7069_v50 = vld [vmem:[%s15262_s5 + $0x3f0] sm:$0xf0] }
 0x169   :  { %v9658_v61 = vld [vmem:[%s15262_s5 + $0x60c] sm:$0xf]  ;;  %v7160_v1 = vor.u32 %v9610_v55, %v7157_v56  ;;  %v6748_v4 = vor.u32 %v9511_v59, %v6747_v58  ;;  %v9535_v44 = vld [vmem:[%s15262_s5 + $0x22c] sm:$0xf0] }
 0x16a   :  { %2406 = vmatpush.bf16.msrb.mxu3 %v6872_v2  ;;  %2428 = vmatpush.bf16.msra.mxu1 %v7512_v3  ;;  %v7349_v62 = vld [vmem:[%s15262_s5 + $0x628] sm:$0xf0]  ;;  %v9559_v2 = vld [vmem:[%s15262_s5 + $0x2ec] sm:$0xf0] }
 0x16b   :  { %v7579_v3 = vld [vmem:[%s15262_s5 + $0x7d0] sm:$0xf]  ;;  %v9602_v6 = vld [vmem:[%s15262_s5 + $0x44c] sm:$0xf]  ;;  %v6940_v11 = vor.u32 %v9559_v2, %v6939_v0  ;;  %v7037_v0 = vld [vmem:[%s15262_s5 + $0x3b0] sm:$0xf0] }
 0x16c   :  { %2392 = vmatpush.bf16.msrb.mxu2 %v6648_v8  ;;  %2414 = vmatpush.bf16.msra.mxu0 %v7288_v9  ;;  %v7125_v7 = vld [vmem:[%s15262_s5 + $0x468] sm:$0xf0]  ;;  %v7352_v8 = vor.u32 %v9658_v61, %v7349_v62  ;;  %v6715_v9 = vld [vmem:[%s15262_s5 + $0x110] sm:$0xf]  ;;  %v7580_v12 = vor.u32 %v9719_v5, %v7579_v3  ;;  %v9579_v62 = vld [vmem:[%s15262_s5 + $0x394] sm:$0xf] }
 0x16d   :  { %v7128_v14 = vor.u32 %v9602_v6, %v7125_v7  ;;  %v9594_v20 = vld [vmem:[%s15262_s5 + $0x40c] sm:$0xf]  ;;  %v9479_v52 = vld [vmem:[%s15262_s5 + $0x6c] sm:$0xf0]  ;;  %v6813_v6 = vld [vmem:[%s15262_s5 + $0x1f0] sm:$0xf0] }
 0x16e   :  { %2407 = vmatpush.bf16.msrb.mxu3 %v6840_v17  ;;  %2429 = vmatpush.bf16.msra.mxu1 %v7480_v18  ;;  %v7547_v17 = vld [vmem:[%s15262_s5 + $0x790] sm:$0xf]  ;;  %v7093_v21 = vld [vmem:[%s15262_s5 + $0x428] sm:$0xf0] }
 0x16f   :  { %v9711_v18 = vld [vmem:[%s15262_s5 + $0x7ac] sm:$0xf0]  ;;  %v7096_v29 = vor.u32 %v9594_v20, %v7093_v21  ;;  %v6781_v20 = vld [vmem:[%s15262_s5 + $0x1b0] sm:$0xf0] }
 0x170   :  { %2393 = vmatpush.bf16.msrb.mxu2 %v6616_v22  ;;  %2415 = vmatpush.bf16.msra.mxu0 %v7256_v24  ;;  %v6683_v22 = vld [vmem:[%s15262_s5 + $0xd0] sm:$0xf]  ;;  %v7548_v28 = vor.u32 %v9711_v18, %v7547_v17 }
 0x171   :  { %2408 = vmatmul.bf16.vlgmr.msrb.gmra.mxu3 %v11131_v16  ;;  %v9495_v24 = vld [vmem:[%s15262_s5 + $0xec] sm:$0xf0] }
 0x172   :  { %2452 = vmatpush.bf16.msra.mxu3 %v7068_v19  ;;  %2430 = vmatpush.bf16.msra.mxu1 %v7448_v32  ;;  %v6716_v19 = vor.u32 %v9503_v10, %v6715_v9  ;;  %v9543_v32 = vld [vmem:[%s15262_s5 + $0x26c] sm:$0xf0]  ;;  %v6684_v33 = vor.u32 %v9495_v24, %v6683_v22  ;;  %v7008_v22 = vor.u32 %v9571_v13, %v7005_v15  ;;  %v7293_v13 = vld [vmem:[%s15262_s5 + $0x5b0] sm:$0xf0] }
 0x173   :  { %v6876_v41 = vor.u32 %v9543_v32, %v6875_v30  ;;  %v7259_v53 = vld [vmem:[%s15262_s5 + $0x550] sm:$0xf]  ;;  %v9531_v15 = vld [vmem:[%s15262_s5 + $0x214] sm:$0xf] }
 0x174   :  { %2394 = vmatpush.bf16.msrb.mxu2 %v6584_v38  ;;  %2416 = vmatpush.bf16.msra.mxu0 %v7224_v39  ;;  %v9487_v38 = vld [vmem:[%s15262_s5 + $0xac] sm:$0xf0] }
 0x175   :  { %v7291_v39 = vld [vmem:[%s15262_s5 + $0x590] sm:$0xf]  ;;  %v6652_v47 = vor.u32 %v9487_v38, %v6651_v37 }
 0x176   :  { %2453 = vmatpush.bf16.msra.mxu3 %v7036_v35  ;;  %2431 = vmatpush.bf16.msra.mxu1 %v7416_v45  ;;  %v7515_v35 = vld [vmem:[%s15262_s5 + $0x750] sm:$0xf] }
 0x177   :  { %2395 = vmatmul.bf16.vlgmr.msrb.gmra.mxu2 %v11153_v31  ;;  %v7516_v43 = vor.u32 %v9703_v36, %v7515_v35  ;;  %v7483_v45 = vld [vmem:[%s15262_s5 + $0x710] sm:$0xf] }
 0x178   :  { %2439 = vmatpush.bf16.msra.mxu2 %v6812_v42  ;;  %2417 = vmatpush.bf16.msra.mxu0 %v7192_v51  ;;  %v6843_v42 = vld [vmem:[%s15262_s5 + $0x210] sm:$0xf]  ;;  %v7484_v56 = vor.u32 %v9695_v46, %v7483_v45 }
 0x179   :  { %v6619_v51 = vld [vmem:[%s15262_s5 + $0x50] sm:$0xf]  ;;  %v6844_v55 = vor.u32 %v9535_v44, %v6843_v42  ;;  %v7581_v44 = vld [vmem:[%s15262_s5 + $0x7f0] sm:$0xf0] }
 0x17a   :  { %2454 = vmatpush.bf16.msra.mxu3 %v7004_v48  ;;  %2432 = vmatpush.bf16.msra.mxu1 %v7384_v57  ;;  %v7292_v48 = vor.u32 %v9647_v40, %v7291_v39  ;;  %v7072_v57 = vor.u32 %v9587_v49, %v7069_v50  ;;  %v7451_v58 = vld [vmem:[%s15262_s5 + $0x6d0] sm:$0xf]  ;;  %v9555_v40 = vld [vmem:[%s15262_s5 + $0x2d4] sm:$0xf] }
 0x17b   :  { %v9687_v59 = vld [vmem:[%s15262_s5 + $0x6ec] sm:$0xf0] }
 0x17c   :  { %2440 = vmatpush.bf16.msra.mxu2 %v6780_v54  ;;  %2418 = vmatpush.bf16.msra.mxu0 %v7160_v1  ;;  %v9639_v54 = vld [vmem:[%s15262_s5 + $0x56c] sm:$0xf0]  ;;  %v7452_v7 = vor.u32 %v9687_v59, %v7451_v58 }
 0x17d   :  { %v7260_v61 = vor.u32 %v9639_v54, %v7259_v53  ;;  %v6587_v1 = vld [vmem:[%s15262_s5 + $0x10] sm:$0xf]  ;;  %v6909_v53 = vld [vmem:[%s15262_s5 + $0x2b0] sm:$0xf0] }
 0x17e   :  { %2455 = vmatpush.bf16.msra.mxu3 %v6972_v60  ;;  %2433 = vmatpush.bf16.msra.mxu1 %v7352_v8  ;;  %v6620_v60 = vor.u32 %v9479_v52, %v6619_v51  ;;  %v9471_v2 = vld [vmem:[%s15262_s5 + $0x2c] sm:$0xf0]  ;;  %v7040_v8 = vor.u32 %v9579_v62, %v7037_v0  ;;  %v9547_v52 = vld [vmem:[%s15262_s5 + $0x294] sm:$0xf] }
 0x17f   :  { %v7227_v3 = vld [vmem:[%s15262_s5 + $0x510] sm:$0xf]  ;;  %v6588_v9 = vor.u32 %v9471_v2, %v6587_v1  ;;  %v9651_v62 = vld [vmem:[%s15262_s5 + $0x5d4] sm:$0xf]  ;;  %v6912_v1 = vor.u32 %v9547_v52, %v6909_v53  ;;  %v7011_v52 = vld [vmem:[%s15262_s5 + $0x358] sm:$0xf] }
 0x180   :  { %2441 = vmatpush.bf16.msra.mxu2 %v6748_v4  ;;  %2419 = vmatpush.bf16.msra.mxu0 %v7128_v14  ;;  %v9631_v5 = vld [vmem:[%s15262_s5 + $0x52c] sm:$0xf0]  ;;  %v9523_v4 = vld [vmem:[%s15262_s5 + $0x1d4] sm:$0xf] }
 0x181   :  { %2434 = vmatmul.bf16.vlgmr.msra.gmra.mxu1 %v11196_v63  ;;  %v7228_v10 = vor.u32 %v9631_v5, %v7227_v3  ;;  %v6816_v14 = vor.u32 %v9523_v4, %v6813_v6  ;;  %v7195_v17 = vld [vmem:[%s15262_s5 + $0x4d0] sm:$0xf]  ;;  %v7325_v0 = vld [vmem:[%s15262_s5 + $0x5f0] sm:$0xf0] }
 0x182   :  { %2456 = vmatpush.bf16.msra.mxu3 %v6940_v11  ;;  %2478 = vmatpush.bf16.msrb.mxu1 %v7580_v12  ;;  %v7419_v11 = vld [vmem:[%s15262_s5 + $0x690] sm:$0xf]  ;;  %v9539_v4 = vld [vmem:[%s15262_s5 + $0x254] sm:$0xf] }
 0x183   :  { %v9679_v12 = vld [vmem:[%s15262_s5 + $0x6ac] sm:$0xf0]  ;;  %v6877_v6 = vld [vmem:[%s15262_s5 + $0x270] sm:$0xf0] }
 0x184   :  { %2442 = vmatpush.bf16.msra.mxu2 %v6716_v19  ;;  %2420 = vmatpush.bf16.msra.mxu0 %v7096_v29  ;;  %v9623_v18 = vld [vmem:[%s15262_s5 + $0x4ec] sm:$0xf0]  ;;  %v9515_v19 = vld [vmem:[%s15262_s5 + $0x194] sm:$0xf]  ;;  %v7420_v21 = vor.u32 %v9679_v12, %v7419_v11 }
 0x185   :  { %v7196_v24 = vor.u32 %v9623_v18, %v7195_v17  ;;  %v7387_v25 = vld [vmem:[%s15262_s5 + $0x650] sm:$0xf]  ;;  %v6973_v29 = vld [vmem:[%s15262_s5 + $0x330] sm:$0xf0] }
 0x186   :  { %2457 = vmatpush.bf16.msra.mxu3 %v6908_v27  ;;  %2479 = vmatpush.bf16.msrb.mxu1 %v7548_v28  ;;  %v9671_v26 = vld [vmem:[%s15262_s5 + $0x66c] sm:$0xf0]  ;;  %v9563_v27 = vld [vmem:[%s15262_s5 + $0x314] sm:$0xf]  ;;  %v6784_v28 = vor.u32 %v9515_v19, %v6781_v20 }
 0x187   :  { %2421 = vmatmul.bf16.vlgmr.msra.gmra.mxu0 %v11236_v23  ;;  %v7163_v30 = vld [vmem:[%s15262_s5 + $0x490] sm:$0xf]  ;;  %v7388_v35 = vor.u32 %v9671_v26, %v7387_v25  ;;  %v6976_v37 = vor.u32 %v9563_v27, %v6973_v29  ;;  %v6653_v11 = vld [vmem:[%s15262_s5 + $0xb0] sm:$0xf0]  ;;  %v9592_v25 = vld [vmem:[%s15262_s5 + $0x3f4] sm:$0xf0] }
 0x188   :  { %2443 = vmatpush.bf16.msra.mxu2 %v6684_v33  ;;  %2465 = vmatpush.bf16.msrb.mxu0 %v7324_v34  ;;  %v9615_v32 = vld [vmem:[%s15262_s5 + $0x4ac] sm:$0xf0]  ;;  %v9507_v33 = vld [vmem:[%s15262_s5 + $0x154] sm:$0xf] }
 0x189   :  { %v6749_v34 = vld [vmem:[%s15262_s5 + $0x170] sm:$0xf0]  ;;  %v7355_v36 = vld [vmem:[%s15262_s5 + $0x610] sm:$0xf]  ;;  %v7164_v38 = vor.u32 %v9615_v32, %v7163_v30 }
 0x18a   :  { %2458 = vmatpush.bf16.msra.mxu3 %v6876_v41  ;;  %2480 = vmatpush.bf16.msrb.mxu1 %v7516_v43  ;;  %v9663_v39 = vld [vmem:[%s15262_s5 + $0x62c] sm:$0xf0]  ;;  %v6941_v41 = vld [vmem:[%s15262_s5 + $0x2f0] sm:$0xf0]  ;;  %v6752_v42 = vor.u32 %v9507_v33, %v6749_v34 }
 0x18b   :  { %v9715_v43 = vld [vmem:[%s15262_s5 + $0x7d4] sm:$0xf]  ;;  %v7131_v45 = vld [vmem:[%s15262_s5 + $0x450] sm:$0xf]  ;;  %v7356_v49 = vor.u32 %v9663_v39, %v7355_v36  ;;  %v6944_v50 = vor.u32 %v9555_v40, %v6941_v41  ;;  %v9584_v39 = vld [vmem:[%s15262_s5 + $0x3b4] sm:$0xf0] }
 0x18c   :  { %2444 = vmatpush.bf16.msra.mxu2 %v6652_v47  ;;  %2466 = vmatpush.bf16.msrb.mxu0 %v7292_v48  ;;  %v9607_v46 = vld [vmem:[%s15262_s5 + $0x46c] sm:$0xf0]  ;;  %v9499_v47 = vld [vmem:[%s15262_s5 + $0x114] sm:$0xf]  ;;  %v7584_v51 = vor.u32 %v9715_v43, %v7581_v44  ;;  %v6819_v44 = vld [vmem:[%s15262_s5 + $0x1d8] sm:$0xf] }
 0x18d   :  { %v6717_v48 = vld [vmem:[%s15262_s5 + $0x130] sm:$0xf0]  ;;  %v7132_v54 = vor.u32 %v9607_v46, %v7131_v45  ;;  %v7099_v58 = vld [vmem:[%s15262_s5 + $0x410] sm:$0xf]  ;;  %v9528_v45 = vld [vmem:[%s15262_s5 + $0x1f4] sm:$0xf0] }
 0x18e   :  { %2459 = vmatpush.bf16.msra.mxu3 %v6844_v55  ;;  %2481 = vmatpush.bf16.msrb.mxu1 %v7484_v56  ;;  %v6720_v55 = vor.u32 %v9499_v47, %v6717_v48  ;;  %v9707_v56 = vld [vmem:[%s15262_s5 + $0x794] sm:$0xf]  ;;  %v9599_v59 = vld [vmem:[%s15262_s5 + $0x42c] sm:$0xf0]  ;;  %v6820_v53 = vor.u32 %v9528_v45, %v6819_v44 }
 0x18f   :  { %v7100_v3 = vor.u32 %v9599_v59, %v7099_v58  ;;  %v9643_v12 = vld [vmem:[%s15262_s5 + $0x594] sm:$0xf]  ;;  %v9520_v58 = vld [vmem:[%s15262_s5 + $0x1b4] sm:$0xf0] }
 0x190   :  { %2445 = vmatpush.bf16.msra.mxu2 %v6620_v60  ;;  %2467 = vmatpush.bf16.msrb.mxu0 %v7260_v61  ;;  %v9491_v60 = vld [vmem:[%s15262_s5 + $0xd4] sm:$0xf] }
 0x191   :  { %2460 = vmatmul.bf16.vlgmr.msra.gmra.mxu3 %v11131_v16  ;;  %v6685_v61 = vld [vmem:[%s15262_s5 + $0xf0] sm:$0xf0] }
 0x192   :  { %2504 = vmatpush.bf16.msrb.mxu3 %v7072_v57  ;;  %2482 = vmatpush.bf16.msrb.mxu1 %v7452_v7  ;;  %v7549_v57 = vld [vmem:[%s15262_s5 + $0x7b0] sm:$0xf0]  ;;  %v6688_v5 = vor.u32 %v9491_v60, %v6685_v61 }
 0x193   :  { %v7552_v2 = vor.u32 %v9707_v56, %v7549_v57  ;;  %v9699_v7 = vld [vmem:[%s15262_s5 + $0x754] sm:$0xf]  ;;  %v6787_v57 = vld [vmem:[%s15262_s5 + $0x198] sm:$0xf] }
 0x194   :  { %2446 = vmatpush.bf16.msra.mxu2 %v6588_v9  ;;  %2468 = vmatpush.bf16.msrb.mxu0 %v7228_v10  ;;  %v7517_v9 = vld [vmem:[%s15262_s5 + $0x770] sm:$0xf0] }
 0x195   :  { %v9483_v10 = vld [vmem:[%s15262_s5 + $0x94] sm:$0xf]  ;;  %v7520_v17 = vor.u32 %v9699_v7, %v7517_v9  ;;  %v9512_v7 = vld [vmem:[%s15262_s5 + $0x174] sm:$0xf0] }
 0x196   :  { %2505 = vmatpush.bf16.msrb.mxu3 %v7040_v8  ;;  %2483 = vmatpush.bf16.msrb.mxu1 %v7420_v21  ;;  %v7328_v8 = vor.u32 %v9651_v62, %v7325_v0  ;;  %v6656_v18 = vor.u32 %v9483_v10, %v6653_v11  ;;  %v6845_v19 = vld [vmem:[%s15262_s5 + $0x230] sm:$0xf0] }
 0x197   :  { %2447 = vmatmul.bf16.vlgmr.msra.gmra.mxu2 %v11153_v31  ;;  %v9691_v20 = vld [vmem:[%s15262_s5 + $0x714] sm:$0xf]  ;;  %v6848_v30 = vor.u32 %v9531_v15, %v6845_v19 }
 0x198   :  { %2491 = vmatpush.bf16.msrb.mxu2 %v6816_v14  ;;  %2469 = vmatpush.bf16.msrb.mxu0 %v7196_v24  ;;  %v6880_v14 = vor.u32 %v9539_v4, %v6877_v6  ;;  %v7485_v21 = vld [vmem:[%s15262_s5 + $0x730] sm:$0xf0]  ;;  %v7075_v24 = vld [vmem:[%s15262_s5 + $0x3d8] sm:$0xf] }
 0x199   :  { %v9475_v26 = vld [vmem:[%s15262_s5 + $0x54] sm:$0xf]  ;;  %v7488_v32 = vor.u32 %v9691_v20, %v7485_v21  ;;  %v7076_v33 = vor.u32 %v9592_v25, %v7075_v24  ;;  %v6755_v6 = vld [vmem:[%s15262_s5 + $0x158] sm:$0xf] }
 0x19a   :  { %2506 = vmatpush.bf16.msrb.mxu3 %v7008_v22  ;;  %2484 = vmatpush.bf16.msrb.mxu1 %v7388_v35  ;;  %v7296_v22 = vor.u32 %v9643_v12, %v7293_v13  ;;  %v6621_v27 = vld [vmem:[%s15262_s5 + $0x70] sm:$0xf0]  ;;  %v6947_v13 = vld [vmem:[%s15262_s5 + $0x2d8] sm:$0xf]  ;;  %v6756_v15 = vor.u32 %v9512_v7, %v6755_v6 }
 0x19b   :  { %v7261_v29 = vld [vmem:[%s15262_s5 + $0x570] sm:$0xf0]  ;;  %v6624_v36 = vor.u32 %v9475_v26, %v6621_v27  ;;  %v6723_v21 = vld [vmem:[%s15262_s5 + $0x118] sm:$0xf] }
 0x19c   :  { %2492 = vmatpush.bf16.msrb.mxu2 %v6784_v28  ;;  %2470 = vmatpush.bf16.msrb.mxu0 %v7164_v38  ;;  %v9635_v28 = vld [vmem:[%s15262_s5 + $0x554] sm:$0xf]  ;;  %v7043_v38 = vld [vmem:[%s15262_s5 + $0x398] sm:$0xf] }
 0x19d   :  { %v9683_v34 = vld [vmem:[%s15262_s5 + $0x6d4] sm:$0xf]  ;;  %v7044_v47 = vor.u32 %v9584_v39, %v7043_v38  ;;  %v9496_v38 = vld [vmem:[%s15262_s5 + $0xf4] sm:$0xf0] }
 0x19e   :  { %2507 = vmatpush.bf16.msrb.mxu3 %v6976_v37  ;;  %2485 = vmatpush.bf16.msrb.mxu1 %v7356_v49  ;;  %v7453_v35 = vld [vmem:[%s15262_s5 + $0x6f0] sm:$0xf0]  ;;  %v7264_v37 = vor.u32 %v9635_v28, %v7261_v29  ;;  %v6915_v28 = vld [vmem:[%s15262_s5 + $0x298] sm:$0xf] }
 0x19f   :  { %v9467_v40 = vld [vmem:[%s15262_s5 + $0x14] sm:$0xf]  ;;  %v7456_v46 = vor.u32 %v9683_v34, %v7453_v35  ;;  %v9552_v29 = vld [vmem:[%s15262_s5 + $0x2b4] sm:$0xf0] }
 0x1a0   :  { %2493 = vmatpush.bf16.msrb.mxu2 %v6752_v42  ;;  %2471 = vmatpush.bf16.msrb.mxu0 %v7132_v54  ;;  %v6589_v41 = vld [vmem:[%s15262_s5 + $0x30] sm:$0xf0]  ;;  %v9576_v54 = vld [vmem:[%s15262_s5 + $0x374] sm:$0xf0] }
 0x1a1   :  { %2486 = vmatmul.bf16.vlgmr.msrb.gmra.mxu1 %v11196_v63  ;;  %v9627_v42 = vld [vmem:[%s15262_s5 + $0x514] sm:$0xf]  ;;  %v6592_v48 = vor.u32 %v9467_v40, %v6589_v41  ;;  %v7012_v60 = vor.u32 %v9576_v54, %v7011_v52  ;;  %v9712_v34 = vld [vmem:[%s15262_s5 + $0x7b4] sm:$0xf0]  ;;  %v6916_v41 = vor.u32 %v9552_v29, %v6915_v28 }
 0x1a2   :  { %2508 = vmatpush.bf16.msrb.mxu3 %v6944_v50  ;;  %2530 = vmatpush.bf16.msra.mxu1 %v7584_v51  ;;  %v7229_v43 = vld [vmem:[%s15262_s5 + $0x530] sm:$0xf0]  ;;  %v7331_v39 = vld [vmem:[%s15262_s5 + $0x5d8] sm:$0xf] }
 0x1a3   :  { %v7232_v49 = vor.u32 %v9627_v42, %v7229_v43  ;;  %v9675_v50 = vld [vmem:[%s15262_s5 + $0x694] sm:$0xf]  ;;  %v9656_v40 = vld [vmem:[%s15262_s5 + $0x5f4] sm:$0xf0]  ;;  %v12014_v43 = vld [vmem:[%s15264_s6] sm:$0xff] }
 0x1a4   :  { %2494 = vmatpush.bf16.msrb.mxu2 %v6720_v55  ;;  %2472 = vmatpush.bf16.msrb.mxu0 %v7100_v3  ;;  %v7421_v51 = vld [vmem:[%s15262_s5 + $0x6b0] sm:$0xf0]  ;;  %v9568_v3 = vld [vmem:[%s15262_s5 + $0x334] sm:$0xf0]  ;;  %v935_v54 = vperm.slane %v12014_v43, 0 }
 0x1a5   :  { %v9619_v55 = vld [vmem:[%s15262_s5 + $0x4d4] sm:$0xf]  ;;  %v7424_v59 = vor.u32 %v9675_v50, %v7421_v51  ;;  %v7332_v50 = vor.u32 %v9656_v40, %v7331_v39  ;;  %v9704_v51 = vld [vmem:[%s15262_s5 + $0x774] sm:$0xf0] }
 0x1a6   :  { %2509 = vmatpush.bf16.msrb.mxu3 %v6912_v1  ;;  %2531 = vmatpush.bf16.msra.mxu1 %v7552_v2  ;;  %v7197_v56 = vld [vmem:[%s15262_s5 + $0x4f0] sm:$0xf0]  ;;  %v6979_v1 = vld [vmem:[%s15262_s5 + $0x318] sm:$0xf]  ;;  %v6788_v2 = vor.u32 %v9520_v58, %v6787_v57 }
 0x1a7   :  { %2473 = vmatmul.bf16.vlgmr.msrb.gmra.mxu0 %v11236_v23  ;;  %v7200_v61 = vor.u32 %v9619_v55, %v7197_v56  ;;  %v9667_v62 = vld [vmem:[%s15262_s5 + $0x654] sm:$0xf]  ;;  %v6980_v10 = vor.u32 %v9568_v3, %v6979_v1  ;;  %v6659_v52 = vld [vmem:[%s15262_s5 + $0x98] sm:$0xf] }
 0x1a8   :  { %2495 = vmatpush.bf16.msrb.mxu2 %v6688_v5  ;;  %2517 = vmatpush.bf16.msra.mxu0 %v7328_v8  ;;  %v7389_v0 = vld [vmem:[%s15262_s5 + $0x670] sm:$0xf0]  ;;  %v7299_v55 = vld [vmem:[%s15262_s5 + $0x598] sm:$0xf] }
 0x1a9   :  { %v9611_v5 = vld [vmem:[%s15262_s5 + $0x494] sm:$0xf]  ;;  %v7392_v8 = vor.u32 %v9667_v62, %v7389_v0  ;;  %v9648_v56 = vld [vmem:[%s15262_s5 + $0x5b4] sm:$0xf0] }
 0x1aa   :  { %2510 = vmatpush.bf16.msrb.mxu3 %v6880_v14  ;;  %2532 = vmatpush.bf16.msra.mxu1 %v7520_v17  ;;  %v7165_v4 = vld [vmem:[%s15262_s5 + $0x4b0] sm:$0xf0]  ;;  %v9560_v14 = vld [vmem:[%s15262_s5 + $0x2f4] sm:$0xf0]  ;;  %v7300_v3 = vor.u32 %v9648_v56, %v7299_v55  ;;  %v9564_v56 = vld [vmem:[%s15262_s5 + $0x31c] sm:$0xf] }
 0x1ab   :  { %v9659_v9 = vld [vmem:[%s15262_s5 + $0x614] sm:$0xf]  ;;  %v7168_v11 = vor.u32 %v9611_v5, %v7165_v4  ;;  %v7587_v17 = vld [vmem:[%s15262_s5 + $0x7d8] sm:$0xf]  ;;  %v6948_v26 = vor.u32 %v9560_v14, %v6947_v13  ;;  %v9588_v5 = vld [vmem:[%s15262_s5 + $0x3dc] sm:$0xf] }
 0x1ac   :  { %2496 = vmatpush.bf16.msrb.mxu2 %v6656_v18  ;;  %2518 = vmatpush.bf16.msra.mxu0 %v7296_v22  ;;  %v7357_v12 = vld [vmem:[%s15262_s5 + $0x630] sm:$0xf0]  ;;  %v9720_v18 = vld [vmem:[%s15262_s5 + $0x7f4] sm:$0xf0]  ;;  %v7077_v4 = vld [vmem:[%s15262_s5 + $0x3f8] sm:$0xf0] }
 0x1ad   :  { %v9603_v19 = vld [vmem:[%s15262_s5 + $0x454] sm:$0xf]  ;;  %v9504_v22 = vld [vmem:[%s15262_s5 + $0x134] sm:$0xf0]  ;;  %v7360_v24 = vor.u32 %v9659_v9, %v7357_v12  ;;  %v7588_v27 = vor.u32 %v9720_v18, %v7587_v17  ;;  %v7080_v13 = vor.u32 %v9588_v5, %v7077_v4 }
 0x1ae   :  { %2511 = vmatpush.bf16.msrb.mxu3 %v6848_v30  ;;  %2533 = vmatpush.bf16.msra.mxu1 %v7488_v32  ;;  %v7133_v20 = vld [vmem:[%s15262_s5 + $0x470] sm:$0xf0]  ;;  %v6724_v32 = vor.u32 %v9504_v22, %v6723_v21  ;;  %v9536_v62 = vld [vmem:[%s15262_s5 + $0x234] sm:$0xf0]  ;;  %v7045_v21 = vld [vmem:[%s15262_s5 + $0x3b8] sm:$0xf0] }
 0x1af   :  { %v7136_v30 = vor.u32 %v9603_v19, %v7133_v20  ;;  %v9595_v35 = vld [vmem:[%s15262_s5 + $0x414] sm:$0xf]  ;;  %v7491_v0 = vld [vmem:[%s15262_s5 + $0x718] sm:$0xf]  ;;  %v9580_v20 = vld [vmem:[%s15262_s5 + $0x39c] sm:$0xf] }
 0x1b0   :  { %2497 = vmatpush.bf16.msrb.mxu2 %v6624_v36  ;;  %2519 = vmatpush.bf16.msra.mxu0 %v7264_v37  ;;  %v7101_v36 = vld [vmem:[%s15262_s5 + $0x430] sm:$0xf0]  ;;  %v6691_v37 = vld [vmem:[%s15262_s5 + $0xd8] sm:$0xf] }
 0x1b1   :  { %2512 = vmatmul.bf16.vlgmr.msrb.gmra.mxu3 %v11131_v16  ;;  %v7104_v44 = vor.u32 %v9595_v35, %v7101_v36  ;;  %v6692_v45 = vor.u32 %v9496_v38, %v6691_v37  ;;  %v9696_v1 = vld [vmem:[%s15262_s5 + $0x734] sm:$0xf0]  ;;  %v7048_v35 = vor.u32 %v9580_v20, %v7045_v21 }
 0x1b2   :  { %2556 = vmatpush.bf16.msra.mxu3 %v7076_v33  ;;  %2534 = vmatpush.bf16.msra.mxu1 %v7456_v46  ;;  %v7555_v33 = vld [vmem:[%s15262_s5 + $0x798] sm:$0xf]  ;;  %v7492_v12 = vor.u32 %v9696_v1, %v7491_v0  ;;  %v9508_v0 = vld [vmem:[%s15262_s5 + $0x15c] sm:$0xf] }
 0x1b3   :  { %v7556_v42 = vor.u32 %v9712_v34, %v7555_v33  ;;  %v6883_v46 = vld [vmem:[%s15262_s5 + $0x258] sm:$0xf]  ;;  %v6757_v1 = vld [vmem:[%s15262_s5 + $0x178] sm:$0xf0] }
 0x1b4   :  { %2498 = vmatpush.bf16.msrb.mxu2 %v6592_v48  ;;  %2520 = vmatpush.bf16.msra.mxu0 %v7232_v49  ;;  %v11979_v25 = vpop.f32.mrf.mxu3  ;;  %v7523_v48 = vld [vmem:[%s15262_s5 + $0x758] sm:$0xf] }
 0x1b5   :  { %v6627_v6 = vld [vmem:[%s15262_s5 + $0x58] sm:$0xf] }
 0x1b6   :  { %2557 = vmatpush.bf16.msra.mxu3 %v7044_v47  ;;  %2535 = vmatpush.bf16.msra.mxu1 %v7424_v59  ;;  %v9544_v47 = vld [vmem:[%s15262_s5 + $0x274] sm:$0xf0] }
 0x1b7   :  { %2499 = vmatmul.bf16.vlgmr.msrb.gmra.mxu2 %v11153_v31  ;;  %v6884_v58 = vor.u32 %v9544_v47, %v6883_v46  ;;  %v6851_v59 = vld [vmem:[%s15262_s5 + $0x218] sm:$0xf] }
 0x1b8   :  { %2543 = vmatpush.bf16.msra.mxu2 %v6820_v53  ;;  %2521 = vmatpush.bf16.msra.mxu0 %v7200_v61  ;;  %v9488_v53 = vld [vmem:[%s15262_s5 + $0xb4] sm:$0xf0] }
 0x1b9   :  { %v6660_v61 = vor.u32 %v9488_v53, %v6659_v52  ;;  %v7267_v9 = vld [vmem:[%s15262_s5 + $0x558] sm:$0xf] }
 0x1ba   :  { %2558 = vmatpush.bf16.msra.mxu3 %v7012_v60  ;;  %2536 = vmatpush.bf16.msra.mxu1 %v7392_v8  ;;  %v2240_v49 = vpop.f32.mrf.mxu2  ;;  %v7524_v60 = vor.u32 %v9704_v51, %v7523_v48  ;;  %v9480_v8 = vld [vmem:[%s15262_s5 + $0x74] sm:$0xf0]  ;;  %v9516_v48 = vld [vmem:[%s15262_s5 + $0x19c] sm:$0xf] }
 0x1bb   :  { %v2241_v7 = vadd.f32 %v2240_v49, %v935_v54  ;;  %v7459_v14 = vld [vmem:[%s15262_s5 + $0x6d8] sm:$0xf]  ;;  %v6628_v18 = vor.u32 %v9480_v8, %v6627_v6  ;;  %v6789_v49 = vld [vmem:[%s15262_s5 + $0x1b8] sm:$0xf0] }
 0x1bc   :  { %2544 = vmatpush.bf16.msra.mxu2 %v6788_v2  ;;  %2522 = vmatpush.bf16.msra.mxu0 %v7168_v11  ;;  %v2255_v57 = vpop.f32.mrf.mxu3  ;;  %v6852_v11 = vor.u32 %v9536_v62, %v6851_v59  ;;  %v6595_v22 = vld [vmem:[%s15262_s5 + $0x18] sm:$0xf]  ;;  %v9556_v8 = vld [vmem:[%s15262_s5 + $0x2dc] sm:$0xf] }
 0x1bd   :  { %v9632_v28 = vld [vmem:[%s15262_s5 + $0x534] sm:$0xf0]  ;;  %v6792_v57 = vor.u32 %v9516_v48, %v6789_v49  ;;  %v9700_v48 = vld [vmem:[%s15262_s5 + $0x75c] sm:$0xf] }
 0x1be   :  { %2559 = vmatpush.bf16.msra.mxu3 %v6980_v10  ;;  %2537 = vmatpush.bf16.msra.mxu1 %v7360_v24  ;;  %v2279_v2 = vpop.f32.mrf.mxu1  ;;  %v9640_v10 = vld [vmem:[%s15262_s5 + $0x574] sm:$0xf0]  ;;  %v2254_v24 = vadd.f32 %v11979_v25, %v2241_v7  ;;  %v9524_v25 = vld [vmem:[%s15262_s5 + $0x1dc] sm:$0xf] }
 0x1bf   :  { %v7268_v19 = vor.u32 %v9640_v10, %v7267_v9  ;;  %v7427_v39 = vld [vmem:[%s15262_s5 + $0x698] sm:$0xf]  ;;  %v6949_v9 = vld [vmem:[%s15262_s5 + $0x2f8] sm:$0xf0]  ;;  %v6760_v10 = vor.u32 %v9508_v0, %v6757_v1 }
 0x1c0   :  { %2545 = vmatpush.bf16.msra.mxu2 %v6756_v15  ;;  %2523 = vmatpush.bf16.msra.mxu0 %v7136_v30  ;;  %v9688_v15 = vld [vmem:[%s15262_s5 + $0x6f4] sm:$0xf0]  ;;  %v6952_v20 = vor.u32 %v9556_v8, %v6949_v9  ;;  %v7493_v0 = vld [vmem:[%s15262_s5 + $0x738] sm:$0xf0] }
 0x1c1   :  { %2538 = vmatmul.bf16.vlgmr.msra.gmra.mxu1 %v11196_v63  ;;  %v7460_v34 = vor.u32 %v9688_v15, %v7459_v14  ;;  %v9680_v40 = vld [vmem:[%s15262_s5 + $0x6b4] sm:$0xf0]  ;;  %v9500_v15 = vld [vmem:[%s15262_s5 + $0x11c] sm:$0xf] }
 0x1c2   :  { %2560 = vmatpush.bf16.msra.mxu3 %v6948_v26  ;;  %2582 = vmatpush.bf16.msrb.mxu1 %v7588_v27  ;;  %v2242_v17 = vpop.f32.mrf.mxu2  ;;  %v9472_v26 = vld [vmem:[%s15262_s5 + $0x34] sm:$0xf0]  ;;  %v6629_v8 = vld [vmem:[%s15262_s5 + $0x78] sm:$0xf0] }
 0x1c3   :  { %v7235_v27 = vld [vmem:[%s15262_s5 + $0x518] sm:$0xf]  ;;  %v6596_v37 = vor.u32 %v9472_v26, %v6595_v22  ;;  %v6725_v17 = vld [vmem:[%s15262_s5 + $0x138] sm:$0xf0] }
 0x1c4   :  { %2546 = vmatpush.bf16.msra.mxu2 %v6724_v32  ;;  %2524 = vmatpush.bf16.msra.mxu0 %v7104_v44  ;;  %v2266_v29 = vpop.f32.mrf.mxu0  ;;  %v12098_v30 = vpop.f32.mrf.mxu3  ;;  %v6821_v32 = vld [vmem:[%s15262_s5 + $0x1f8] sm:$0xf0]  ;;  %v7236_v38 = vor.u32 %v9632_v28, %v7235_v27  ;;  %v7203_v46 = vld [vmem:[%s15262_s5 + $0x4d8] sm:$0xf]  ;;  %v6728_v27 = vor.u32 %v9500_v15, %v6725_v17 }
 0x1c5   :  { %v2267_v33 = vadd.f32 %v2266_v29, %v2254_v24  ;;  %v6824_v44 = vor.u32 %v9524_v25, %v6821_v32  ;;  %v9624_v47 = vld [vmem:[%s15262_s5 + $0x4f4] sm:$0xf0]  ;;  %v9548_v22 = vld [vmem:[%s15262_s5 + $0x29c] sm:$0xf] }
 0x1c6   :  { %2561 = vmatpush.bf16.msra.mxu3 %v6916_v41  ;;  %2583 = vmatpush.bf16.msrb.mxu1 %v7556_v42  ;;  %v2281_v36 = vpop.f32.mrf.mxu1  ;;  %v9572_v41 = vld [vmem:[%s15262_s5 + $0x35c] sm:$0xf]  ;;  %v7204_v53 = vor.u32 %v9624_v47, %v7203_v46  ;;  %v7395_v54 = vld [vmem:[%s15262_s5 + $0x658] sm:$0xf] }
 0x1c7   :  { %2525 = vmatmul.bf16.vlgmr.msra.gmra.mxu0 %v11236_v23  ;;  %v12115_v42 = vadd.f32 %v2279_v2, %v2267_v33  ;;  %v9672_v55 = vld [vmem:[%s15262_s5 + $0x674] sm:$0xf0]  ;;  %v6917_v24 = vld [vmem:[%s15262_s5 + $0x2b8] sm:$0xf0] }
 0x1c8   :  { %2547 = vmatpush.bf16.msra.mxu2 %v6692_v45  ;;  %2569 = vmatpush.bf16.msrb.mxu0 %v7332_v50  ;;  %v7013_v45 = vld [vmem:[%s15262_s5 + $0x378] sm:$0xf0]  ;;  %v7428_v50 = vor.u32 %v9680_v40, %v7427_v39  ;;  %v7171_v59 = vld [vmem:[%s15262_s5 + $0x498] sm:$0xf]  ;;  %v7396_v2 = vor.u32 %v9672_v55, %v7395_v54  ;;  %v6920_v40 = vor.u32 %v9548_v22, %v6917_v24 }
 0x1c9   :  { %v7016_v52 = vor.u32 %v9572_v41, %v7013_v45  ;;  %v9664_v7 = vld [vmem:[%s15262_s5 + $0x634] sm:$0xf0]  ;;  %v9708_v28 = vld [vmem:[%s15262_s5 + $0x79c] sm:$0xf] }
 0x1ca   :  { %2562 = vmatpush.bf16.msra.mxu3 %v6884_v58  ;;  %2584 = vmatpush.bf16.msrb.mxu1 %v7524_v60  ;;  %v12133_v51 = vpop.f32.mrf.mxu2  ;;  %v6981_v58 = vld [vmem:[%s15262_s5 + $0x338] sm:$0xf0]  ;;  %v9616_v60 = vld [vmem:[%s15262_s5 + $0x4b4] sm:$0xf0] }
 0x1cb   :  { %v6984_v4 = vor.u32 %v9564_v56, %v6981_v58  ;;  %v7172_v6 = vor.u32 %v9616_v60, %v7171_v59  ;;  %v9608_v14 = vld [vmem:[%s15262_s5 + $0x474] sm:$0xf0]  ;;  %v7557_v29 = vld [vmem:[%s15262_s5 + $0x7b8] sm:$0xf0] }
 0x1cc   :  { %2548 = vmatpush.bf16.msra.mxu2 %v6660_v61  ;;  %2570 = vmatpush.bf16.msrb.mxu0 %v7300_v3  ;;  %v2268_v61 = vpop.f32.mrf.mxu0  ;;  %v2307_v62 = vpop.f32.mrf.mxu3  ;;  %v7363_v3 = vld [vmem:[%s15262_s5 + $0x618] sm:$0xf]  ;;  %v6693_v36 = vld [vmem:[%s15262_s5 + $0xf8] sm:$0xf0]  ;;  %v7560_v41 = vor.u32 %v9708_v28, %v7557_v29  ;;  %v7791_v28 = vld [vmem:[%s15265_s7 + $0x188] sm:$0xf] }
 0x1cd   :  { %v7107_v25 = vld [vmem:[%s15262_s5 + $0x418] sm:$0xf]  ;;  %v9540_v46 = vld [vmem:[%s15262_s5 + $0x25c] sm:$0xf]  ;;  %v9773_v29 = vld [vmem:[%s15265_s7 + $0x1a0] sm:$0xf0] }
 0x1ce   :  { %2563 = vmatpush.bf16.msra.mxu3 %v6852_v11  ;;  %2585 = vmatpush.bf16.msrb.mxu1 %v7492_v12  ;;  %v12163_v5 = vpop.f32.mrf.mxu1  ;;  %v9716_v11 = vld [vmem:[%s15262_s5 + $0x7dc] sm:$0xf] }
 0x1cf   :  { %v7589_v12 = vld [vmem:[%s15262_s5 + $0x7f8] sm:$0xf0] }
 0x1d0   :  { %2549 = vmatpush.bf16.msra.mxu2 %v6628_v18  ;;  %2571 = vmatpush.bf16.msrb.mxu0 %v7268_v19  ;;  %v7364_v18 = vor.u32 %v9664_v7, %v7363_v3  ;;  %v7592_v21 = vor.u32 %v9716_v11, %v7589_v12  ;;  %v6885_v47 = vld [vmem:[%s15262_s5 + $0x278] sm:$0xf0] }
 0x1d1   :  { %2564 = vmatmul.bf16.vlgmr.msra.gmra.mxu3 %v11131_v16  ;;  %v9644_v54 = vld [vmem:[%s15262_s5 + $0x59c] sm:$0xf]  ;;  %v6888_v56 = vor.u32 %v9540_v46, %v6885_v47 }
 0x1d2   :  { %2608 = vmatpush.bf16.msrb.mxu3 %v7080_v13  ;;  %2586 = vmatpush.bf16.msrb.mxu1 %v7460_v34  ;;  %v7139_v13 = vld [vmem:[%s15262_s5 + $0x458] sm:$0xf]  ;;  %v2294_v19 = vpop.f32.mrf.mxu2  ;;  %v7301_v55 = vld [vmem:[%s15262_s5 + $0x5b8] sm:$0xf0] }
 0x1d3   :  { %v7140_v26 = vor.u32 %v9608_v14, %v7139_v13  ;;  %v9600_v34 = vld [vmem:[%s15262_s5 + $0x434] sm:$0xf0]  ;;  %v6853_v61 = vld [vmem:[%s15262_s5 + $0x238] sm:$0xf0]  ;;  %v7304_v3 = vor.u32 %v9644_v54, %v7301_v55 }
 0x1d4   :  { %2550 = vmatpush.bf16.msra.mxu2 %v6596_v37  ;;  %2572 = vmatpush.bf16.msrb.mxu0 %v7236_v38  ;;  %v12207_v32 = vpop.f32.mrf.mxu0  ;;  %v12209_v33 = vpop.f32.mrf.mxu3  ;;  %v9652_v37 = vld [vmem:[%s15262_s5 + $0x5dc] sm:$0xf] }
 0x1d5   :  { %v7333_v38 = vld [vmem:[%s15262_s5 + $0x5f8] sm:$0xf0] }
 0x1d6   :  { %2609 = vmatpush.bf16.msrb.mxu3 %v7048_v35  ;;  %2587 = vmatpush.bf16.msrb.mxu1 %v7428_v50  ;;  %v9492_v35 = vld [vmem:[%s15262_s5 + $0xdc] sm:$0xf]  ;;  %v2333_v39 = vpop.f32.mrf.mxu1  ;;  %v7336_v49 = vor.u32 %v9652_v37, %v7333_v38 }
 0x1d7   :  { %2551 = vmatmul.bf16.vlgmr.msra.gmra.mxu2 %v11153_v31  ;;  %v6696_v45 = vor.u32 %v9492_v35, %v6693_v36  ;;  %v7525_v50 = vld [vmem:[%s15262_s5 + $0x778] sm:$0xf0] }
 0x1d8   :  { %2595 = vmatpush.bf16.msrb.mxu2 %v6824_v44  ;;  %2573 = vmatpush.bf16.msrb.mxu0 %v7204_v53  ;;  %v7108_v44 = vor.u32 %v9600_v34, %v7107_v25  ;;  %v6661_v53 = vld [vmem:[%s15262_s5 + $0xb8] sm:$0xf0]  ;;  %v7528_v59 = vor.u32 %v9700_v48, %v7525_v50  ;;  %v936_v48 = vperm.slane %v12014_v43, 1  ;;  %v9766_v50 = vld [vmem:[%s15265_s7 + $0x168] sm:$0xf0] }
 0x1d9   :  { %v9692_v62 = vld [vmem:[%s15262_s5 + $0x71c] sm:$0xf] }
 0x1da   :  { %2610 = vmatpush.bf16.msrb.mxu3 %v7016_v52  ;;  %2588 = vmatpush.bf16.msrb.mxu1 %v7396_v2  ;;  %v9484_v52 = vld [vmem:[%s15262_s5 + $0x9c] sm:$0xf]  ;;  %v12254_v58 = vpop.f32.mrf.mxu2  ;;  %v7496_v13 = vor.u32 %v9692_v62, %v7493_v0  ;;  %v2293_v0 = vadd.f32 %v12133_v51, %v936_v48  ;;  %v7847_v48 = vld [vmem:[%s15265_s7 + $0x1f8] sm:$0xf] }
 0x1db   :  { %v6664_v60 = vor.u32 %v9484_v52, %v6661_v53  ;;  %v9476_v7 = vld [vmem:[%s15262_s5 + $0x5c] sm:$0xf] }
 0x1dc   :  { %2596 = vmatpush.bf16.msrb.mxu2 %v6792_v57  ;;  %2574 = vmatpush.bf16.msrb.mxu0 %v7172_v6  ;;  %v9532_v57 = vld [vmem:[%s15262_s5 + $0x21c] sm:$0xf]  ;;  %v2320_v1 = vpop.f32.mrf.mxu0  ;;  %v2359_v2 = vpop.f32.mrf.mxu3  ;;  %v9829_v6 = vld [vmem:[%s15265_s7 + $0x360] sm:$0xf0] }
 0x1dd   :  { %v9636_v9 = vld [vmem:[%s15262_s5 + $0x55c] sm:$0xf]  ;;  %v6856_v12 = vor.u32 %v9532_v57, %v6853_v61  ;;  %v7931_v57 = vld [vmem:[%s15265_s7 + $0x2a0] sm:$0xf]  ;;  %v7735_v1 = vld [vmem:[%s15265_s7 + $0x118] sm:$0xf] }
 0x1de   :  { %2611 = vmatpush.bf16.msrb.mxu3 %v6984_v4  ;;  %2589 = vmatpush.bf16.msrb.mxu1 %v7364_v18  ;;  %v8015_v4 = vld [vmem:[%s15265_s7 + $0x348] sm:$0xf]  ;;  %v12284_v11 = vpop.f32.mrf.mxu1  ;;  %v9684_v15 = vld [vmem:[%s15262_s5 + $0x6dc] sm:$0xf]  ;;  %v6632_v18 = vor.u32 %v9476_v7, %v6629_v8  ;;  %v9759_v2 = vld [vmem:[%s15265_s7 + $0x130] sm:$0xf0] }
 0x1df   :  { %v8016_v14 = vor.u32 %v9829_v6, %v8015_v4  ;;  %v7461_v17 = vld [vmem:[%s15262_s5 + $0x6f8] sm:$0xf0]  ;;  %v7903_v8 = vld [vmem:[%s15265_s7 + $0x268] sm:$0xf] }
 0x1e0   :  { %2597 = vmatpush.bf16.msrb.mxu2 %v6760_v10  ;;  %2575 = vmatpush.bf16.msrb.mxu0 %v7140_v26  ;;  %v7269_v10 = vld [vmem:[%s15262_s5 + $0x578] sm:$0xf0]  ;;  %v7464_v34 = vor.u32 %v9684_v15, %v7461_v17  ;;  %v2306_v15 = vadd.f32 %v12098_v30, %v2293_v0 }
 0x1e1   :  { %2590 = vmatmul.bf16.vlgmr.msrb.gmra.mxu1 %v11196_v63  ;;  %v7272_v19 = vor.u32 %v9636_v9, %v7269_v10  ;;  %v9468_v22 = vld [vmem:[%s15262_s5 + $0x1c] sm:$0xf]  ;;  %v7736_v10 = vor.u32 %v9759_v2, %v7735_v1 }
 0x1e2   :  { %2612 = vmatpush.bf16.msrb.mxu3 %v6952_v20  ;;  %2634 = vmatpush.bf16.msra.mxu1 %v7592_v21  ;;  %v7987_v20 = vld [vmem:[%s15265_s7 + $0x310] sm:$0xf]  ;;  %v9822_v21 = vld [vmem:[%s15265_s7 + $0x328] sm:$0xf0]  ;;  %v6597_v24 = vld [vmem:[%s15262_s5 + $0x38] sm:$0xf0]  ;;  %v2346_v25 = vpop.f32.mrf.mxu2 }
 0x1e3   :  { %v9628_v26 = vld [vmem:[%s15262_s5 + $0x51c] sm:$0xf]  ;;  %v7988_v35 = vor.u32 %v9822_v21, %v7987_v20  ;;  %v6600_v36 = vor.u32 %v9468_v22, %v6597_v24  ;;  %v2319_v21 = vadd.f32 %v12207_v32, %v2306_v15  ;;  %v7875_v24 = vld [vmem:[%s15265_s7 + $0x230] sm:$0xf]  ;;  %v9934_v25 = vld [vmem:[%s15265_s7 + $0x6a8] sm:$0xf0] }
 0x1e4   :  { %2598 = vmatpush.bf16.msrb.mxu2 %v6728_v27  ;;  %2576 = vmatpush.bf16.msrb.mxu0 %v7108_v44  ;;  %v7237_v27 = vld [vmem:[%s15262_s5 + $0x538] sm:$0xf0]  ;;  %v7792_v44 = vor.u32 %v9773_v29, %v7791_v28  ;;  %v8435_v32 = vld [vmem:[%s15265_s7 + $0x690] sm:$0xf] }
 0x1e5   :  { %v7240_v37 = vor.u32 %v9628_v26, %v7237_v27  ;;  %v9676_v38 = vld [vmem:[%s15262_s5 + $0x69c] sm:$0xf]  ;;  %v9794_v26 = vld [vmem:[%s15265_s7 + $0x248] sm:$0xf0] }
 0x1e6   :  { %2613 = vmatpush.bf16.msrb.mxu3 %v6920_v40  ;;  %2635 = vmatpush.bf16.msra.mxu1 %v7560_v41  ;;  %v7429_v39 = vld [vmem:[%s15262_s5 + $0x6b8] sm:$0xf0]  ;;  %v7959_v40 = vld [vmem:[%s15265_s7 + $0x2d8] sm:$0xf]  ;;  %v12326_v41 = vpop.f32.mrf.mxu0 }
 0x1e7   :  { %2577 = vmatmul.bf16.vlgmr.msrb.gmra.mxu0 %v11236_v23  ;;  %v9620_v46 = vld [vmem:[%s15262_s5 + $0x4dc] sm:$0xf]  ;;  %v7432_v52 = vor.u32 %v9676_v38, %v7429_v39  ;;  %v8239_v38 = vld [vmem:[%s15265_s7 + $0x508] sm:$0xf]  ;;  %v9885_v39 = vld [vmem:[%s15265_s7 + $0x520] sm:$0xf0] }
 0x1e8   :  { %2599 = vmatpush.bf16.msrb.mxu2 %v6696_v45  ;;  %2621 = vmatpush.bf16.msra.mxu0 %v7336_v49  ;;  %v9815_v45 = vld [vmem:[%s15265_s7 + $0x2f0] sm:$0xf0]  ;;  %v7205_v47 = vld [vmem:[%s15262_s5 + $0x4f8] sm:$0xf0]  ;;  %v2385_v49 = vpop.f32.mrf.mxu1 }
 0x1e9   :  { %v7960_v53 = vor.u32 %v9815_v45, %v7959_v40  ;;  %v7208_v54 = vor.u32 %v9620_v46, %v7205_v47  ;;  %v9668_v55 = vld [vmem:[%s15262_s5 + $0x65c] sm:$0xf]  ;;  %v2332_v40 = vadd.f32 %v12163_v5, %v2319_v21  ;;  %v8436_v45 = vor.u32 %v9934_v25, %v8435_v32  ;;  %v9787_v49 = vld [vmem:[%s15265_s7 + $0x210] sm:$0xf0]  ;;  %v8407_v5 = vld [vmem:[%s15265_s7 + $0x658] sm:$0xf] }
 0x1ea   :  { %2614 = vmatpush.bf16.msrb.mxu3 %v6888_v56  ;;  %2636 = vmatpush.bf16.msra.mxu1 %v7528_v59  ;;  %v7397_v56 = vld [vmem:[%s15262_s5 + $0x678] sm:$0xf0]  ;;  %v9913_v21 = vld [vmem:[%s15265_s7 + $0x600] sm:$0xf0]  ;;  %v8687_v25 = vld [vmem:[%s15265_s7 + $0x888] sm:$0xf] }
 0x1eb   :  { %v9612_v61 = vld [vmem:[%s15262_s5 + $0x49c] sm:$0xf] }
 0x1ec   :  { %2600 = vmatpush.bf16.msrb.mxu2 %v6664_v60  ;;  %2622 = vmatpush.bf16.msra.mxu0 %v7304_v3  ;;  %v9808_v60 = vld [vmem:[%s15265_s7 + $0x2b8] sm:$0xf0]  ;;  %v7400_v3 = vor.u32 %v9668_v55, %v7397_v56  ;;  %v8211_v55 = vld [vmem:[%s15265_s7 + $0x4d0] sm:$0xf]  ;;  %v2648_v56 = vmul.f32 0.2, %v2332_v40 }
 0x1ed   :  { %v7173_v62 = vld [vmem:[%s15262_s5 + $0x4b8] sm:$0xf0]  ;;  %v7932_v6 = vor.u32 %v9808_v60, %v7931_v57  ;;  %v937_v57 = vperm.slane %v12014_v43, 2  ;;  %v7848_v60 = vor.u32 %v9787_v49, %v7847_v48  ;;  %v8127_v48 = vld [vmem:[%s15265_s7 + $0x428] sm:$0xf] }
 0x1ee   :  { %2615 = vmatpush.bf16.msrb.mxu3 %v6856_v12  ;;  %2637 = vmatpush.bf16.msra.mxu1 %v7496_v13  ;;  %v9660_v4 = vld [vmem:[%s15262_s5 + $0x61c] sm:$0xf]  ;;  %v7176_v51 = vor.u32 %v9612_v61, %v7173_v62  ;;  %v2372_v9 = vpop.f32.mrf.mxu0  ;;  %v8463_v12 = vld [vmem:[%s15265_s7 + $0x6c8] sm:$0xf]  ;;  %v9941_v13 = vld [vmem:[%s15265_s7 + $0x6e0] sm:$0xf0] }
 0x1ef   :  { %v7365_v7 = vld [vmem:[%s15262_s5 + $0x638] sm:$0xf0]  ;;  %v8464_v30 = vor.u32 %v9941_v13, %v8463_v12  ;;  %v7819_v61 = vld [vmem:[%s15265_s7 + $0x1c0] sm:$0xf]  ;;  %v9871_v9 = vld [vmem:[%s15265_s7 + $0x4b0] sm:$0xf0] }
 0x1f0   :  { %2601 = vmatpush.bf16.msrb.mxu2 %v6632_v18  ;;  %2623 = vmatpush.bf16.msra.mxu0 %v7272_v19  ;;  %v7141_v17 = vld [vmem:[%s15262_s5 + $0x478] sm:$0xf0]  ;;  %v7707_v18 = vld [vmem:[%s15265_s7 + $0xe0] sm:$0xf]  ;;  %v7368_v20 = vor.u32 %v9660_v4, %v7365_v7  ;;  %v9731_v7 = vld [vmem:[%s15265_s7 + $0x50] sm:$0xf0] }
 0x1f1   :  { %2616 = vmatmul.bf16.vlgmr.msrb.gmra.mxu3 %v11131_v16  ;;  %v7763_v16 = vld [vmem:[%s15265_s7 + $0x150] sm:$0xf]  ;;  %v9752_v19 = vld [vmem:[%s15265_s7 + $0xf8] sm:$0xf0]  ;;  %v10053_v12 = vld [vmem:[%s15265_s7 + $0xa60] sm:$0xf0] }
 0x1f2   :  { %5516 = vmatpush.bf16.msra.mxu3 %v8016_v14  ;;  %2638 = vmatpush.bf16.msra.mxu1 %v7464_v34  ;;  %v7764_v59 = vor.u32 %v9766_v50, %v7763_v16  ;;  %v9604_v14 = vld [vmem:[%s15262_s5 + $0x45c] sm:$0xf]  ;;  %v7708_v29 = vor.u32 %v9752_v19, %v7707_v18  ;;  %v8240_v16 = vor.u32 %v9885_v39, %v8239_v38  ;;  %v9927_v50 = vld [vmem:[%s15265_s7 + $0x670] sm:$0xf0]  ;;  %v2647_v13 = vmul.f32 0.2, %v12115_v42 }
 0x1f3   :  { %v7144_v28 = vor.u32 %v9604_v14, %v7141_v17  ;;  %v9596_v34 = vld [vmem:[%s15262_s5 + $0x41c] sm:$0xf]  ;;  %v8408_v62 = vor.u32 %v9927_v50, %v8407_v5  ;;  %v2656_v17 = vmax.f32 %v2332_v40, %v2648_v56  ;;  %v8659_v50 = vld [vmem:[%s15265_s7 + $0x850] sm:$0xf] }
 0x1f4   :  { %2602 = vmatpush.bf16.msrb.mxu2 %v6600_v36  ;;  %2624 = vmatpush.bf16.msra.mxu0 %v7240_v37  ;;  %v12408_v27 = vpop.f32.mrf.mxu3  ;;  %v7679_v36 = vld [vmem:[%s15265_s7 + $0xa8] sm:$0xf]  ;;  %v9745_v37 = vld [vmem:[%s15265_s7 + $0xc0] sm:$0xf0]  ;;  %v9780_v2 = vld [vmem:[%s15265_s7 + $0x1d8] sm:$0xf0] }
 0x1f5   :  { %v7680_v47 = vor.u32 %v9745_v37, %v7679_v36  ;;  %v9920_v4 = vld [vmem:[%s15265_s7 + $0x638] sm:$0xf0]  ;;  %v7820_v15 = vor.u32 %v9780_v2, %v7819_v61  ;;  %v10046_v37 = vld [vmem:[%s15265_s7 + $0xa28] sm:$0xf0]  ;;  %v12527_v38 = vpack.c.bf16 %v2656_v17, %v2656_v17  ;;  %v8295_v61 = vld [vmem:[%s15265_s7 + $0x578] sm:$0xf] }
 0x1f6   :  { %5517 = vmatpush.bf16.msra.mxu3 %v7988_v35  ;;  %2639 = vmatpush.bf16.msra.mxu1 %v7432_v52  ;;  %v7109_v35 = vld [vmem:[%s15262_s5 + $0x438] sm:$0xf0]  ;;  %v7651_v52 = vld [vmem:[%s15265_s7 + $0x70] sm:$0xf]  ;;  %v9983_v2 = vld [vmem:[%s15265_s7 + $0x830] sm:$0xf0] }
 0x1f7   :  { %2603 = vmatmul.bf16.vlgmr.msrb.gmra.mxu2 %v11153_v31  ;;  %v9801_v31 = vld [vmem:[%s15265_s7 + $0x280] sm:$0xf0]  ;;  %v7112_v46 = vor.u32 %v9596_v34, %v7109_v35  ;;  %v9864_v32 = vld [vmem:[%s15265_s7 + $0x478] sm:$0xf0]  ;;  %v2655_v35 = vmax.f32 %v12115_v42, %v2647_v13 }
 0x1f8   :  { %5503 = vmatpush.bf16.msra.mxu2 %v7792_v44  ;;  %2625 = vmatpush.bf16.msra.mxu0 %v7208_v54  ;;  %v7904_v22 = vor.u32 %v9801_v31, %v7903_v8  ;;  %v7876_v44 = vor.u32 %v9794_v26, %v7875_v24  ;;  %v8183_v8 = vld [vmem:[%s15265_s7 + $0x498] sm:$0xf]  ;;  %v8155_v24 = vld [vmem:[%s15265_s7 + $0x460] sm:$0xf]  ;;  %v9997_v34 = vld [vmem:[%s15265_s7 + $0x8a0] sm:$0xf0] }
 0x1f9   :  { %v9892_v13 = vld [vmem:[%s15265_s7 + $0x558] sm:$0xf0] }
 0x1fa   :  { %5518 = vmatpush.bf16.msra.mxu3 %v7960_v53  ;;  %2640 = vmatpush.bf16.msra.mxu1 %v7400_v3  ;;  %v9738_v53 = vld [vmem:[%s15265_s7 + $0x88] sm:$0xf0]  ;;  %v2396_v54 = vpop.f32.mrf.mxu2  ;;  %v8379_v3 = vld [vmem:[%s15265_s7 + $0x620] sm:$0xf]  ;;  %v9976_v17 = vld [vmem:[%s15265_s7 + $0x7f8] sm:$0xf0] }
 0x1fb   :  { %v7652_v1 = vor.u32 %v9738_v53, %v7651_v52  ;;  %v8380_v18 = vor.u32 %v9920_v4, %v8379_v3  ;;  %v9990_v52 = vld [vmem:[%s15265_s7 + $0x868] sm:$0xf0]  ;;  %v8827_v4 = vld [vmem:[%s15265_s7 + $0x9a0] sm:$0xf] }
 0x1fc   :  { %5504 = vmatpush.bf16.msra.mxu2 %v7764_v59  ;;  %2626 = vmatpush.bf16.msra.mxu0 %v7176_v51  ;;  %v938_v59 = vperm.slane %v12014_v43, 3  ;;  %v2411_v0 = vpop.f32.mrf.mxu3  ;;  %v7623_v51 = vld [vmem:[%s15265_s7 + $0x38] sm:$0xf] }
 0x1fd   :  { %v7624_v19 = vor.u32 %v9731_v7, %v7623_v51  ;;  %v9850_v0 = vld [vmem:[%s15265_s7 + $0x408] sm:$0xf0] }
 0x1fe   :  { %5519 = vmatpush.bf16.msra.mxu3 %v7932_v6  ;;  %2641 = vmatpush.bf16.msra.mxu1 %v7368_v20  ;;  %v2435_v31 = vpop.f32.mrf.mxu1  ;;  %v2397_v14 = vadd.f32 %v2396_v54, %v938_v59  ;;  %v8351_v20 = vld [vmem:[%s15265_s7 + $0x5e8] sm:$0xf]  ;;  %v10039_v54 = vld [vmem:[%s15265_s7 + $0x9f0] sm:$0xf0] }
 0x1ff   :  { %v8352_v39 = vor.u32 %v9913_v21, %v8351_v20  ;;  %v10025_v20 = vld [vmem:[%s15265_s7 + $0x980] sm:$0xf0] }
 0x200   :  { %5505 = vmatpush.bf16.msra.mxu2 %v7736_v10  ;;  %2627 = vmatpush.bf16.msra.mxu0 %v7144_v28  ;;  %v8911_v10 = vld [vmem:[%s15265_s7 + $0xa48] sm:$0xf]  ;;  %v2345_v28 = vadd.f32 %v12254_v58, %v937_v57  ;;  %v2410_v36 = vadd.f32 %v12408_v27, %v2397_v14  ;;  %v8883_v58 = vld [vmem:[%s15265_s7 + $0xa10] sm:$0xf]  ;;  %v8071_v14 = vld [vmem:[%s15265_s7 + $0x3b8] sm:$0xf] }
 0x201   :  { %2642 = vmatmul.bf16.vlgmr.msra.gmra.mxu1 %v11196_v63  ;;  %v9878_v63 = vld [vmem:[%s15265_s7 + $0x4e8] sm:$0xf0]  ;;  %v8912_v26 = vor.u32 %v10053_v12, %v8911_v10  ;;  %v8323_v27 = vld [vmem:[%s15265_s7 + $0x5b0] sm:$0xf]  ;;  %v8884_v53 = vor.u32 %v10046_v37, %v8883_v58  ;;  %v9135_v58 = vld [vmem:[%s15265_s7 + $0xc08] sm:$0xf] }
 0x202   :  { %5520 = vmatpush.bf16.msra.mxu3 %v7904_v22  ;;  %5542 = vmatpush.bf16.msrb.mxu1 %v8464_v30  ;;  %v8212_v6 = vor.u32 %v9878_v63, %v8211_v55  ;;  %v8184_v22 = vor.u32 %v9871_v9, %v8183_v8  ;;  %v9724_v30 = vld [vmem:[%s15265_s7 + $0x18] sm:$0xf0]  ;;  %v2358_v49 = vadd.f32 %v12209_v33, %v2345_v28  ;;  %v8855_v33 = vld [vmem:[%s15265_s7 + $0x9d8] sm:$0xf]  ;;  %v8267_v8 = vld [vmem:[%s15265_s7 + $0x540] sm:$0xf] }
 0x203   :  { %v12555_v55 = vpack.c.bf16 %v2655_v35, %v2655_v35  ;;  %v8856_v3 = vor.u32 %v10039_v54, %v8855_v33  ;;  %v8268_v21 = vor.u32 %v9892_v13, %v8267_v8  ;;  %v8043_v28 = vld [vmem:[%s15265_s7 + $0x380] sm:$0xf]  ;;  %v8771_v35 = vld [vmem:[%s15265_s7 + $0x930] sm:$0xf]  ;;  %v10109_v37 = vld [vmem:[%s15265_s7 + $0xc20] sm:$0xf0] }
 0x204   :  { %5506 = vmatpush.bf16.msra.mxu2 %v7708_v29  ;;  %2628 = vmatpush.bf16.msra.mxu0 %v7112_v46  ;;  %v2398_v29 = vpop.f32.mrf.mxu2  ;;  %v2422_v40 = vpop.f32.mrf.mxu0  ;;  %v8688_v46 = vor.u32 %v9997_v34, %v8687_v25  ;;  %v2371_v63 = vadd.f32 %v12326_v41, %v2358_v49  ;;  %v8099_v41 = vld [vmem:[%s15265_s7 + $0x3f0] sm:$0xf]  ;;  %v9969_v25 = vld [vmem:[%s15265_s7 + $0x7c0] sm:$0xf0]  ;;  %v10088_v13 = vld [vmem:[%s15265_s7 + $0xb78] sm:$0xf0] }
 0x205   :  { %v2423_v42 = vadd.f32 %v2422_v40, %v2410_v36  ;;  %v8100_v10 = vor.u32 %v9850_v0, %v8099_v41  ;;  %v9836_v29 = vld [vmem:[%s15265_s7 + $0x398] sm:$0xf0]  ;;  %v10018_v36 = vld [vmem:[%s15265_s7 + $0x948] sm:$0xf0] }
 0x206   :  { %5521 = vmatpush.bf16.msra.mxu3 %v7876_v44  ;;  %5543 = vmatpush.bf16.msrb.mxu1 %v8436_v45  ;;  %v8156_v45 = vor.u32 %v9864_v32, %v8155_v24  ;;  %v2437_v5 = vpop.f32.mrf.mxu1  ;;  %v8575_v32 = vld [vmem:[%s15265_s7 + $0x7a8] sm:$0xf]  ;;  %v8044_v40 = vor.u32 %v9836_v29, %v8043_v28  ;;  %v9826_v0 = vld [vmem:[%s15265_s7 + $0x34c] sm:$0xf]  ;;  %v9812_v29 = vld [vmem:[%s15265_s7 + $0x2dc] sm:$0xf] }
 0x207   :  { %2629 = vmatmul.bf16.vlgmr.msra.gmra.mxu0 %v11236_v23  ;;  %v7595_v23 = vld [vmem:[%s15265_s7] sm:$0xf]  ;;  %v2436_v57 = vadd.f32 %v2435_v31, %v2423_v42  ;;  %v2384_v31 = vadd.f32 %v12284_v11, %v2371_v63  ;;  %v10011_v5 = vld [vmem:[%s15265_s7 + $0x910] sm:$0xf0]  ;;  %v8519_v63 = vld [vmem:[%s15265_s7 + $0x738] sm:$0xf] }
 0x208   :  { %5507 = vmatpush.bf16.msra.mxu2 %v7680_v47  ;;  %5529 = vmatpush.bf16.msrb.mxu0 %v8240_v16  ;;  %v7596_v44 = vor.u32 %v9724_v30, %v7595_v23  ;;  %v9906_v47 = vld [vmem:[%s15265_s7 + $0x5c8] sm:$0xf0]  ;;  %v9857_v16 = vld [vmem:[%s15265_s7 + $0x440] sm:$0xf0]  ;;  %v8603_v11 = vld [vmem:[%s15265_s7 + $0x7e0] sm:$0xf] }
 0x209   :  { %v8324_v56 = vor.u32 %v9906_v47, %v8323_v27  ;;  %v8128_v59 = vor.u32 %v9857_v16, %v8127_v48  ;;  %v2650_v9 = vmul.f32 0.2, %v2436_v57  ;;  %v8772_v27 = vor.u32 %v10018_v36, %v8771_v35  ;;  %v8743_v47 = vld [vmem:[%s15265_s7 + $0x8f8] sm:$0xf]  ;;  %v9107_v16 = vld [vmem:[%s15265_s7 + $0xbd0] sm:$0xf] }
 0x20a   :  { %5522 = vmatpush.bf16.msra.mxu3 %v7848_v60  ;;  %5544 = vmatpush.bf16.msrb.mxu1 %v8408_v62  ;;  %v8660_v60 = vor.u32 %v9990_v52, %v8659_v50  ;;  %v9899_v62 = vld [vmem:[%s15265_s7 + $0x590] sm:$0xf0]  ;;  %v9136_v48 = vor.u32 %v10109_v37, %v9135_v58  ;;  %v10102_v50 = vld [vmem:[%s15265_s7 + $0xbe8] sm:$0xf0]  ;;  %v939_v52 = vperm.slane %v12014_v43, 4 }
 0x20b   :  { %v8296_v51 = vor.u32 %v9899_v62, %v8295_v61  ;;  %v2658_v23 = vmax.f32 %v2436_v57, %v2650_v9  ;;  %v8744_v57 = vor.u32 %v10011_v5, %v8743_v47  ;;  %v9108_v43 = vor.u32 %v10102_v50, %v9107_v16  ;;  %v9079_v61 = vld [vmem:[%s15265_s7 + $0xb98] sm:$0xf]  ;;  %v10095_v62 = vld [vmem:[%s15265_s7 + $0xbb0] sm:$0xf0]  ;;  %v7793_v9 = vld [vmem:[%s15265_s7 + $0x1a4] sm:$0xf0] }
 0x20c   :  { %5508 = vmatpush.bf16.msra.mxu2 %v7652_v1  ;;  %5530 = vmatpush.bf16.msrb.mxu0 %v8212_v6  ;;  %v8631_v1 = vld [vmem:[%s15265_s7 + $0x818] sm:$0xf]  ;;  %v10032_v6 = vld [vmem:[%s15265_s7 + $0x9b8] sm:$0xf0]  ;;  %v2424_v7 = vpop.f32.mrf.mxu0  ;;  %v9080_v8 = vor.u32 %v10095_v62, %v9079_v61  ;;  %v7709_v5 = vld [vmem:[%s15265_s7 + $0xfc] sm:$0xf0] }
 0x20d   :  { %v8632_v12 = vor.u32 %v9983_v2, %v8631_v1  ;;  %v8017_v1 = vld [vmem:[%s15265_s7 + $0x364] sm:$0xf0]  ;;  %v9756_v35 = vld [vmem:[%s15265_s7 + $0x11c] sm:$0xf]  ;;  %v7737_v36 = vld [vmem:[%s15265_s7 + $0x134] sm:$0xf0] }
 0x20e   :  { %5523 = vmatpush.bf16.msra.mxu3 %v7820_v15  ;;  %5545 = vmatpush.bf16.msrb.mxu1 %v8380_v18  ;;  %v9843_v15 = vld [vmem:[%s15265_s7 + $0x3d0] sm:$0xf0]  ;;  %v8828_v18 = vor.u32 %v10032_v6, %v8827_v4  ;;  %v8491_v4 = vld [vmem:[%s15265_s7 + $0x700] sm:$0xf]  ;;  %v9948_v6 = vld [vmem:[%s15265_s7 + $0x718] sm:$0xf0] }
 0x20f   :  { %v8072_v24 = vor.u32 %v9843_v15, %v8071_v14  ;;  %v9819_v14 = vld [vmem:[%s15265_s7 + $0x314] sm:$0xf]  ;;  %v7989_v15 = vld [vmem:[%s15265_s7 + $0x32c] sm:$0xf0]  ;;  %v8967_v50 = vld [vmem:[%s15265_s7 + $0xab8] sm:$0xf] }
 0x210   :  { %5509 = vmatpush.bf16.msra.mxu2 %v7624_v19  ;;  %5531 = vmatpush.bf16.msrb.mxu0 %v8184_v22  ;;  %v8799_v19 = vld [vmem:[%s15265_s7 + $0x968] sm:$0xf]  ;;  %v2649_v22 = vmul.f32 0.2, %v2384_v31 }
 0x211   :  { %5524 = vmatmul.bf16.vlgmr.msra.gmra.mxu3 %v12527_v38  ;;  %v8800_v34 = vor.u32 %v10025_v20, %v8799_v19  ;;  %v9763_v20 = vld [vmem:[%s15265_s7 + $0x154] sm:$0xf]  ;;  %v7681_v62 = vld [vmem:[%s15265_s7 + $0xc4] sm:$0xf0] }
 0x212   :  { %5568 = vmatpush.bf16.msrb.mxu3 %v8912_v26  ;;  %5546 = vmatpush.bf16.msrb.mxu1 %v8352_v39  ;;  %v8604_v26 = vor.u32 %v9976_v17, %v8603_v11  ;;  %v12634_v39 = vpack.c.bf16 %v2658_v23, %v2658_v23  ;;  %v2657_v42 = vmax.f32 %v2384_v31, %v2649_v22  ;;  %v7765_v23 = vld [vmem:[%s15265_s7 + $0x16c] sm:$0xf0] }
 0x213   :  { %v8492_v17 = vor.u32 %v9948_v6, %v8491_v4  ;;  %v10060_v4 = vld [vmem:[%s15265_s7 + $0xa98] sm:$0xf0]  ;;  %v9331_v6 = vld [vmem:[%s15265_s7 + $0xd90] sm:$0xf] }
 0x214   :  { %5510 = vmatpush.bf16.msra.mxu2 %v7596_v44  ;;  %5532 = vmatpush.bf16.msrb.mxu0 %v8156_v45  ;;  %v12608_v30 = vpop.f32.mrf.mxu3  ;;  %v8576_v44 = vor.u32 %v9969_v25, %v8575_v32  ;;  %v8547_v45 = vld [vmem:[%s15265_s7 + $0x770] sm:$0xf]  ;;  %v12656_v54 = vpack.c.bf16 %v2657_v42, %v2657_v42  ;;  %v7961_v32 = vld [vmem:[%s15265_s7 + $0x2f4] sm:$0xf0]  ;;  %v10074_v42 = vld [vmem:[%s15265_s7 + $0xb08] sm:$0xf0] }
 0x216   :  { %5569 = vmatpush.bf16.msrb.mxu3 %v8884_v53  ;;  %5547 = vmatpush.bf16.msrb.mxu1 %v8324_v56  ;;  %v9955_v56 = vld [vmem:[%s15265_s7 + $0x750] sm:$0xf0] }
 0x217   :  { %5511 = vmatmul.bf16.vlgmr.msra.gmra.mxu2 %v12555_v55 }
 0x218   :  { %5555 = vmatpush.bf16.msrb.mxu2 %v8688_v46  ;;  %5533 = vmatpush.bf16.msrb.mxu0 %v8128_v59  ;;  %v9962_v46 = vld [vmem:[%s15265_s7 + $0x788] sm:$0xf0]  ;;  %v8715_v59 = vld [vmem:[%s15265_s7 + $0x8c0] sm:$0xf] }
 0x219   :  { %v8548_v33 = vor.u32 %v9962_v46, %v8547_v45  ;;  %v9805_v45 = vld [vmem:[%s15265_s7 + $0x2a4] sm:$0xf]  ;;  %v7933_v46 = vld [vmem:[%s15265_s7 + $0x2bc] sm:$0xf0] }
 0x21a   :  { %5570 = vmatpush.bf16.msrb.mxu3 %v8856_v3  ;;  %5548 = vmatpush.bf16.msrb.mxu1 %v8296_v51  ;;  %v2448_v49 = vpop.f32.mrf.mxu2  ;;  %v8520_v3 = vor.u32 %v9955_v56, %v8519_v63  ;;  %v9770_v51 = vld [vmem:[%s15265_s7 + $0x18c] sm:$0xf]  ;;  %v9359_v63 = vld [vmem:[%s15265_s7 + $0xdc8] sm:$0xf]  ;;  %v10165_v56 = vld [vmem:[%s15265_s7 + $0xde0] sm:$0xf0] }
 0x21b   :  { %v2449_v2 = vadd.f32 %v2448_v49, %v939_v52  ;;  %v7796_v19 = vor.u32 %v9770_v51, %v7793_v9  ;;  %v9749_v49 = vld [vmem:[%s15265_s7 + $0xe4] sm:$0xf]  ;;  %v10158_v51 = vld [vmem:[%s15265_s7 + $0xda8] sm:$0xf0] }
 0x21c   :  { %5556 = vmatpush.bf16.msrb.mxu2 %v8660_v60  ;;  %5534 = vmatpush.bf16.msrb.mxu0 %v8100_v10  ;;  %v2463_v53 = vpop.f32.mrf.mxu3  ;;  %v10004_v60 = vld [vmem:[%s15265_s7 + $0x8d8] sm:$0xf0]  ;;  %v8020_v10 = vor.u32 %v9826_v0, %v8017_v1  ;;  %v7712_v61 = vor.u32 %v9749_v49, %v7709_v5  ;;  %v8939_v1 = vld [vmem:[%s15265_s7 + $0xa80] sm:$0xf]  ;;  %v9332_v9 = vor.u32 %v10158_v51, %v9331_v6  ;;  %v9994_v5 = vld [vmem:[%s15265_s7 + $0x88c] sm:$0xf] }
 0x21d   :  { %v8716_v7 = vor.u32 %v10004_v60, %v8715_v59  ;;  %v2462_v11 = vadd.f32 %v12608_v30, %v2449_v2  ;;  %v9023_v30 = vld [vmem:[%s15265_s7 + $0xb28] sm:$0xf]  ;;  %v7936_v53 = vor.u32 %v9805_v45, %v7933_v46  ;;  %v9742_v60 = vld [vmem:[%s15265_s7 + $0xac] sm:$0xf] }
 0x21e   :  { %5571 = vmatpush.bf16.msrb.mxu3 %v8828_v18  ;;  %5549 = vmatpush.bf16.msrb.mxu1 %v8268_v21  ;;  %v2487_v41 = vpop.f32.mrf.mxu1  ;;  %v7905_v59 = vld [vmem:[%s15265_s7 + $0x284] sm:$0xf0]  ;;  %v9854_v6 = vld [vmem:[%s15265_s7 + $0x42c] sm:$0xf] }
 0x21f   :  { %v8129_v51 = vld [vmem:[%s15265_s7 + $0x444] sm:$0xf0] }
 0x220   :  { %5557 = vmatpush.bf16.msrb.mxu2 %v8632_v12  ;;  %5535 = vmatpush.bf16.msrb.mxu0 %v8072_v24  ;;  %v9051_v12 = vld [vmem:[%s15265_s7 + $0xb60] sm:$0xf]  ;;  %v7992_v24 = vor.u32 %v9819_v14, %v7989_v15  ;;  %v8940_v14 = vor.u32 %v10060_v4, %v8939_v1  ;;  %v9219_v1 = vld [vmem:[%s15265_s7 + $0xcb0] sm:$0xf] }
 0x221   :  { %5550 = vmatmul.bf16.vlgmr.msrb.gmra.mxu1 %v12634_v39  ;;  %v9052_v21 = vor.u32 %v10088_v13, %v9051_v12  ;;  %v9735_v12 = vld [vmem:[%s15265_s7 + $0x74] sm:$0xf]  ;;  %v7653_v13 = vld [vmem:[%s15265_s7 + $0x8c] sm:$0xf0] }
 0x222   :  { %5572 = vmatpush.bf16.msrb.mxu3 %v8800_v34  ;;  %v2450_v31 = vpop.f32.mrf.mxu2  ;;  %v7768_v34 = vor.u32 %v9763_v20, %v7765_v23  ;;  %v7849_v20 = vld [vmem:[%s15265_s7 + $0x214] sm:$0xf0] }
 0x223   :  { %v8241_v31 = vld [vmem:[%s15265_s7 + $0x524] sm:$0xf0] }
 0x224   :  { %5558 = vmatpush.bf16.msrb.mxu2 %v8604_v26  ;;  %5536 = vmatpush.bf16.msrb.mxu0 %v8044_v40  ;;  %v2474_v18 = vpop.f32.mrf.mxu0  ;;  %v10081_v26 = vld [vmem:[%s15265_s7 + $0xb40] sm:$0xf0]  ;;  %v7964_v40 = vor.u32 %v9812_v29, %v7961_v32  ;;  %v9728_v29 = vld [vmem:[%s15265_s7 + $0x3c] sm:$0xf]  ;;  %v7625_v32 = vld [vmem:[%s15265_s7 + $0x54] sm:$0xf0] }
 0x225   :  { %v2475_v22 = vadd.f32 %v2474_v18, %v2462_v11  ;;  %v9024_v58 = vor.u32 %v10081_v26, %v9023_v30  ;;  %v9784_v11 = vld [vmem:[%s15265_s7 + $0x1fc] sm:$0xf]  ;;  %v9303_v18 = vld [vmem:[%s15265_s7 + $0xd58] sm:$0xf]  ;;  %v12830_v30 = vld [vmem:[%s15264_s6] sm:$0xff] }
 0x226   :  { %5573 = vmatpush.bf16.msrb.mxu3 %v8772_v27  ;;  %v2489_v28 = vpop.f32.mrf.mxu1  ;;  %v940_v26 = vperm.slane %v12830_v30, 5 }
 0x227   :  { %5537 = vmatmul.bf16.vlgmr.msrb.gmra.mxu0 %v12656_v54  ;;  %v2488_v25 = vadd.f32 %v2487_v41, %v2475_v22  ;;  %v9791_v41 = vld [vmem:[%s15265_s7 + $0x234] sm:$0xf]  ;;  %v8213_v22 = vld [vmem:[%s15265_s7 + $0x4ec] sm:$0xf0]  ;;  %v7656_v28 = vor.u32 %v9735_v12, %v7653_v13  ;;  %v9980_v12 = vld [vmem:[%s15265_s7 + $0x81c] sm:$0xf]  ;;  %v8132_v13 = vor.u32 %v9854_v6, %v8129_v51 }
 0x228   :  { %5559 = vmatpush.bf16.msrb.mxu2 %v8576_v44  ;;  %5581 = vmatpush.bf16.msra.mxu0 %v9136_v48  ;;  %v8995_v44 = vld [vmem:[%s15265_s7 + $0xaf0] sm:$0xf]  ;;  %v7740_v48 = vor.u32 %v9756_v35, %v7737_v36  ;;  %v9777_v35 = vld [vmem:[%s15265_s7 + $0x1c4] sm:$0xf] }
 0x229   :  { %v2651_v37 = vmul.f32 0.2, %v2488_v25  ;;  %v8996_v16 = vor.u32 %v10074_v42, %v8995_v44  ;;  %v9868_v44 = vld [vmem:[%s15265_s7 + $0x49c] sm:$0xf]  ;;  %v8185_v42 = vld [vmem:[%s15265_s7 + $0x4b4] sm:$0xf0] }
 0x22a   :  { %5574 = vmatpush.bf16.msrb.mxu3 %v8744_v57  ;;  %v9798_v57 = vld [vmem:[%s15265_s7 + $0x26c] sm:$0xf] }
 0x22b   :  { %v2659_v27 = vmax.f32 %v2488_v25, %v2651_v37  ;;  %v10144_v37 = vld [vmem:[%s15265_s7 + $0xd38] sm:$0xf0] }
 0x22c   :  { %5560 = vmatpush.bf16.msrb.mxu2 %v8548_v33  ;;  %5582 = vmatpush.bf16.msra.mxu0 %v9108_v43  ;;  %v2476_v47 = vpop.f32.mrf.mxu0  ;;  %v10067_v33 = vld [vmem:[%s15265_s7 + $0xad0] sm:$0xf0]  ;;  %v9360_v43 = vor.u32 %v10165_v56, %v9359_v63  ;;  %v8689_v63 = vld [vmem:[%s15265_s7 + $0x8a4] sm:$0xf0]  ;;  %v9861_v56 = vld [vmem:[%s15265_s7 + $0x464] sm:$0xf] }
 0x22d   :  { %v12753_v52 = vpack.c.bf16 %v2659_v27, %v2659_v27  ;;  %v8968_v0 = vor.u32 %v10067_v33, %v8967_v50  ;;  %v7628_v27 = vor.u32 %v9728_v29, %v7625_v32  ;;  %v9721_v47 = vld [vmem:[%s15265_s7 + $0x4] sm:$0xf]  ;;  %v8188_v50 = vor.u32 %v9868_v44, %v8185_v42  ;;  %v10116_v29 = vld [vmem:[%s15265_s7 + $0xc58] sm:$0xf0]  ;;  %v8073_v44 = vld [vmem:[%s15265_s7 + $0x3d4] sm:$0xf0] }
 0x22e   :  { %5575 = vmatpush.bf16.msrb.mxu3 %v8716_v7  ;;  %5594 = vmatpush.bf16.msra.mxu1 %v9360_v43  ;;  %v7877_v7 = vld [vmem:[%s15265_s7 + $0x24c] sm:$0xf0]  ;;  %v10137_v33 = vld [vmem:[%s15265_s7 + $0xd00] sm:$0xf0] }
 0x22f   :  { %v7880_v15 = vor.u32 %v9791_v41, %v7877_v7  ;;  %v9987_v41 = vld [vmem:[%s15265_s7 + $0x854] sm:$0xf] }
 0x230   :  { %5561 = vmatpush.bf16.msrb.mxu2 %v8520_v3  ;;  %5583 = vmatpush.bf16.msra.mxu0 %v9080_v8  ;;  %v7908_v3 = vor.u32 %v9798_v57, %v7905_v59  ;;  %v9882_v8 = vld [vmem:[%s15265_s7 + $0x50c] sm:$0xf]  ;;  %v8157_v57 = vld [vmem:[%s15265_s7 + $0x47c] sm:$0xf0] }
 0x232   :  { %5620 = vmatpush.bf16.msra.mxu3 %v8020_v10  ;;  %v7684_v10 = vor.u32 %v9742_v60, %v7681_v62  ;;  %5595 = vmatpush.bf16.msra.mxu1 %v9332_v9  ;;  %v8692_v62 = vor.u32 %v9994_v5, %v8689_v63 }
 0x234   :  { %5562 = vmatpush.bf16.msrb.mxu2 %v8492_v17  ;;  %5584 = vmatpush.bf16.msra.mxu0 %v9052_v21  ;;  %v12783_v2 = vpop.f32.mrf.mxu3  ;;  %v8244_v17 = vor.u32 %v9882_v8, %v8241_v31  ;;  %v9875_v21 = vld [vmem:[%s15265_s7 + $0x4d4] sm:$0xf] }
 0x235   :  { %v8216_v36 = vor.u32 %v9875_v21, %v8213_v22  ;;  %v9847_v21 = vld [vmem:[%s15265_s7 + $0x3f4] sm:$0xf]  ;;  %v8101_v22 = vld [vmem:[%s15265_s7 + $0x40c] sm:$0xf0] }
 0x236   :  { %5621 = vmatpush.bf16.msra.mxu3 %v7992_v24 }
 0x237   :  { %5563 = vmatmul.bf16.vlgmr.msrb.gmra.mxu2 %v12753_v52 }
 0x238   :  { %5607 = vmatpush.bf16.msra.mxu2 %v7796_v19  ;;  %5585 = vmatpush.bf16.msra.mxu0 %v9024_v58  ;;  %v10151_v19 = vld [vmem:[%s15265_s7 + $0xd70] sm:$0xf0]  ;;  %v9275_v58 = vld [vmem:[%s15265_s7 + $0xd20] sm:$0xf] }
 0x239   :  { %v9304_v23 = vor.u32 %v10151_v19, %v9303_v18  ;;  %v9276_v45 = vor.u32 %v10144_v37, %v9275_v58  ;;  %v8913_v18 = vld [vmem:[%s15265_s7 + $0xa64] sm:$0xf0]  ;;  %v8104_v58 = vor.u32 %v9847_v21, %v8101_v22 }
 0x23a   :  { %5622 = vmatpush.bf16.msra.mxu3 %v7964_v40  ;;  %v2500_v24 = vpop.f32.mrf.mxu2  ;;  %v7821_v40 = vld [vmem:[%s15265_s7 + $0x1dc] sm:$0xf0] }
 0x23b   :  { %5596 = vmatpush.bf16.msra.mxu1 %v9304_v23  ;;  %v2501_v49 = vadd.f32 %v2500_v24, %v940_v26  ;;  %v9973_v26 = vld [vmem:[%s15265_s7 + $0x7e4] sm:$0xf] }
 0x23c   :  { %5608 = vmatpush.bf16.msra.mxu2 %v7768_v34  ;;  %5586 = vmatpush.bf16.msra.mxu0 %v8996_v16  ;;  %v2515_v25 = vpop.f32.mrf.mxu3  ;;  %v7852_v34 = vor.u32 %v9784_v11, %v7849_v20  ;;  %v7824_v16 = vor.u32 %v9777_v35, %v7821_v40  ;;  %v8633_v11 = vld [vmem:[%s15265_s7 + $0x834] sm:$0xf0]  ;;  %v10043_v35 = vld [vmem:[%s15265_s7 + $0xa14] sm:$0xf]  ;;  %v9840_v40 = vld [vmem:[%s15265_s7 + $0x3bc] sm:$0xf] }
 0x23d   :  { %v8636_v24 = vor.u32 %v9980_v12, %v8633_v11  ;;  %v8381_v12 = vld [vmem:[%s15265_s7 + $0x63c] sm:$0xf0]  ;;  %v8801_v11 = vld [vmem:[%s15265_s7 + $0x984] sm:$0xf0] }
 0x23e   :  { %5623 = vmatpush.bf16.msra.mxu3 %v7936_v53  ;;  %v2539_v46 = vpop.f32.mrf.mxu1  ;;  %v9247_v53 = vld [vmem:[%s15265_s7 + $0xce8] sm:$0xf] }
 0x23f   :  { %5597 = vmatpush.bf16.msra.mxu1 %v9276_v45  ;;  %v9248_v59 = vor.u32 %v10137_v33, %v9247_v53  ;;  %v9938_v45 = vld [vmem:[%s15265_s7 + $0x6cc] sm:$0xf]  ;;  %v9931_v53 = vld [vmem:[%s15265_s7 + $0x694] sm:$0xf]  ;;  %v8437_v33 = vld [vmem:[%s15265_s7 + $0x6ac] sm:$0xf0] }
 0x240   :  { %5609 = vmatpush.bf16.msra.mxu2 %v7740_v48  ;;  %5587 = vmatpush.bf16.msra.mxu0 %v8968_v0  ;;  %v7597_v48 = vld [vmem:[%s15265_s7 + $0x1c] sm:$0xf0]  ;;  %v8160_v0 = vor.u32 %v9861_v56, %v8157_v57  ;;  %v8857_v56 = vld [vmem:[%s15265_s7 + $0x9f4] sm:$0xf0]  ;;  %v9833_v57 = vld [vmem:[%s15265_s7 + $0x384] sm:$0xf] }
 0x241   :  { %v7600_v60 = vor.u32 %v9721_v47, %v7597_v48  ;;  %v9966_v47 = vld [vmem:[%s15265_s7 + $0x7ac] sm:$0xf]  ;;  %v8577_v48 = vld [vmem:[%s15265_s7 + $0x7c4] sm:$0xf0] }
 0x242   :  { %5624 = vmatpush.bf16.msra.mxu3 %v7908_v3  ;;  %v2502_v43 = vpop.f32.mrf.mxu2  ;;  %v10130_v3 = vld [vmem:[%s15265_s7 + $0xcc8] sm:$0xf0] }
 0x243   :  { %5598 = vmatpush.bf16.msra.mxu1 %v9248_v59  ;;  %v9220_v7 = vor.u32 %v10130_v3, %v9219_v1  ;;  %v8045_v59 = vld [vmem:[%s15265_s7 + $0x39c] sm:$0xf0]  ;;  %v8440_v43 = vor.u32 %v9931_v53, %v8437_v33  ;;  %v9924_v1 = vld [vmem:[%s15265_s7 + $0x65c] sm:$0xf]  ;;  %v8409_v3 = vld [vmem:[%s15265_s7 + $0x674] sm:$0xf0] }
 0x244   :  { %5610 = vmatpush.bf16.msra.mxu2 %v7712_v61  ;;  %5588 = vmatpush.bf16.msra.mxu0 %v8940_v14  ;;  %v2514_v61 = vadd.f32 %v12783_v2, %v2501_v49  ;;  %v2526_v4 = vpop.f32.mrf.mxu0  ;;  %v8661_v2 = vld [vmem:[%s15265_s7 + $0x86c] sm:$0xf0]  ;;  %v9191_v14 = vld [vmem:[%s15265_s7 + $0xc78] sm:$0xf]  ;;  %v8412_v6 = vor.u32 %v9924_v1, %v8409_v3  ;;  %v10106_v3 = vld [vmem:[%s15265_s7 + $0xc0c] sm:$0xf] }
 0x246   :  { %5625 = vmatpush.bf16.msra.mxu3 %v7880_v15  ;;  %v2527_v8 = vadd.f32 %v2526_v4, %v2514_v61  ;;  %v2541_v31 = vpop.f32.mrf.mxu1  ;;  %v10123_v15 = vld [vmem:[%s15265_s7 + $0xc90] sm:$0xf0]  ;;  %v10029_v4 = vld [vmem:[%s15265_s7 + $0x9a4] sm:$0xf] }
 0x247   :  { %5599 = vmatpush.bf16.msra.mxu1 %v9220_v7  ;;  %v9192_v19 = vor.u32 %v10123_v15, %v9191_v14  ;;  %v9959_v61 = vld [vmem:[%s15265_s7 + $0x774] sm:$0xf]  ;;  %v10022_v15 = vld [vmem:[%s15265_s7 + $0x96c] sm:$0xf] }
 0x248   :  { %5611 = vmatpush.bf16.msra.mxu2 %v7684_v10  ;;  %5633 = vmatpush.bf16.msrb.mxu0 %v8244_v17  ;;  %v2540_v9 = vadd.f32 %v2539_v46, %v2527_v8  ;;  %v8664_v10 = vor.u32 %v9987_v41, %v8661_v2  ;;  %v10050_v17 = vld [vmem:[%s15265_s7 + $0xa4c] sm:$0xf]  ;;  %v8465_v46 = vld [vmem:[%s15265_s7 + $0x6e4] sm:$0xf0]  ;;  %v8549_v41 = vld [vmem:[%s15265_s7 + $0x78c] sm:$0xf0]  ;;  %v8804_v22 = vor.u32 %v10022_v15, %v8801_v11 }
 0x249   :  { %v8916_v25 = vor.u32 %v10050_v17, %v8913_v18  ;;  %v8468_v49 = vor.u32 %v9938_v45, %v8465_v46  ;;  %v8829_v2 = vld [vmem:[%s15265_s7 + $0x9bc] sm:$0xf0]  ;;  %v8552_v7 = vor.u32 %v9959_v61, %v8549_v41  ;;  %v9952_v8 = vld [vmem:[%s15265_s7 + $0x73c] sm:$0xf]  ;;  %v8325_v45 = vld [vmem:[%s15265_s7 + $0x5cc] sm:$0xf0] }
 0x24a   :  { %5626 = vmatpush.bf16.msra.mxu3 %v7852_v34  ;;  %v2652_v20 = vmul.f32 0.2, %v2540_v9  ;;  %v8605_v34 = vld [vmem:[%s15265_s7 + $0x7fc] sm:$0xf0]  ;;  %v8832_v31 = vor.u32 %v10029_v4, %v8829_v2  ;;  %v9760_v61 = vld [vmem:[%s15265_s7 + $0x138] sm:$0xf0] }
 0x24b   :  { %5600 = vmatpush.bf16.msra.mxu1 %v9192_v19  ;;  %v9945_v19 = vld [vmem:[%s15265_s7 + $0x704] sm:$0xf]  ;;  %v9830_v41 = vld [vmem:[%s15265_s7 + $0x368] sm:$0xf0]  ;;  %v9137_v4 = vld [vmem:[%s15265_s7 + $0xc24] sm:$0xf0] }
 0x24c   :  { %5612 = vmatpush.bf16.msra.mxu2 %v7656_v28  ;;  %5634 = vmatpush.bf16.msrb.mxu0 %v8216_v36  ;;  %v2660_v23 = vmax.f32 %v2540_v9, %v2652_v20  ;;  %v9163_v28 = vld [vmem:[%s15265_s7 + $0xc40] sm:$0xf]  ;;  %v2528_v32 = vpop.f32.mrf.mxu0  ;;  %v8885_v36 = vld [vmem:[%s15265_s7 + $0xa2c] sm:$0xf0]  ;;  %v8521_v9 = vld [vmem:[%s15265_s7 + $0x754] sm:$0xf0] }
 0x24d   :  { %v9164_v42 = vor.u32 %v10116_v29, %v9163_v28  ;;  %v8888_v5 = vor.u32 %v10043_v35, %v8885_v36  ;;  %v8524_v18 = vor.u32 %v9952_v8, %v8521_v9  ;;  %v8493_v20 = vld [vmem:[%s15265_s7 + $0x71c] sm:$0xf0]  ;;  %v8773_v29 = vld [vmem:[%s15265_s7 + $0x94c] sm:$0xf0]  ;;  %v7715_v9 = vld [vmem:[%s15265_s7 + $0xe8] sm:$0xf] }
 0x24e   :  { %5627 = vmatpush.bf16.msra.mxu3 %v7824_v16  ;;  %v12943_v37 = vpack.c.bf16 %v2660_v23, %v2660_v23  ;;  %v10036_v16 = vld [vmem:[%s15265_s7 + $0x9dc] sm:$0xf]  ;;  %v10015_v23 = vld [vmem:[%s15265_s7 + $0x934] sm:$0xf]  ;;  %v7799_v32 = vld [vmem:[%s15265_s7 + $0x190] sm:$0xf]  ;;  %v8496_v36 = vor.u32 %v9945_v19, %v8493_v20 }
 0x24f   :  { %5601 = vmatpush.bf16.msra.mxu1 %v9164_v42  ;;  %v9903_v42 = vld [vmem:[%s15265_s7 + $0x5b4] sm:$0xf]  ;;  %v9109_v19 = vld [vmem:[%s15265_s7 + $0xbec] sm:$0xf0] }
 0x250   :  { %5613 = vmatpush.bf16.msra.mxu2 %v7628_v27  ;;  %5635 = vmatpush.bf16.msrb.mxu0 %v8188_v50  ;;  %v8608_v27 = vor.u32 %v9973_v26, %v8605_v34  ;;  %v8076_v50 = vor.u32 %v9840_v40, %v8073_v44  ;;  %v8353_v26 = vld [vmem:[%s15265_s7 + $0x604] sm:$0xf0]  ;;  %v10008_v44 = vld [vmem:[%s15265_s7 + $0x8fc] sm:$0xf]  ;;  %v9823_v15 = vld [vmem:[%s15265_s7 + $0x330] sm:$0xf0] }
 0x251   :  { %5576 = vmatmul.bf16.vlgmr.msrb.gmra.mxu3 %v12943_v37 }
 0x252   :  { %5672 = vmatpush.bf16.msrb.mxu3 %v8916_v25  ;;  %v9774_v25 = vld [vmem:[%s15265_s7 + $0x1a8] sm:$0xf0] }
 0x253   :  { %5646 = vmatpush.bf16.msrb.mxu1 %v8468_v49  ;;  %v7800_v40 = vor.u32 %v9774_v25, %v7799_v32  ;;  %v10092_v32 = vld [vmem:[%s15265_s7 + $0xb9c] sm:$0xf]  ;;  %v9081_v25 = vld [vmem:[%s15265_s7 + $0xbb4] sm:$0xf0] }
 0x254   :  { %5614 = vmatpush.bf16.msra.mxu2 %v7600_v60  ;;  %5636 = vmatpush.bf16.msrb.mxu0 %v8160_v0  ;;  %v12973_v63 = vpop.f32.mrf.mxu3  ;;  %v8580_v60 = vor.u32 %v9966_v47, %v8577_v48  ;;  %v8048_v0 = vor.u32 %v9833_v57, %v8045_v59  ;;  %v7771_v47 = vld [vmem:[%s15265_s7 + $0x158] sm:$0xf]  ;;  %v9767_v48 = vld [vmem:[%s15265_s7 + $0x170] sm:$0xf0] }
 0x255   :  { %v7772_v33 = vor.u32 %v9767_v48, %v7771_v47  ;;  %v8297_v57 = vld [vmem:[%s15265_s7 + $0x594] sm:$0xf0] }
 0x256   :  { %5673 = vmatpush.bf16.msrb.mxu3 %v8888_v5  ;;  %v8328_v5 = vor.u32 %v9903_v42, %v8325_v45  ;;  %v9809_v42 = vld [vmem:[%s15265_s7 + $0x2c0] sm:$0xf0] }
 0x257   :  { %5615 = vmatmul.bf16.vlgmr.msra.gmra.mxu2 %v12555_v55  ;;  %5647 = vmatpush.bf16.msrb.mxu1 %v8440_v43  ;;  %v8717_v43 = vld [vmem:[%s15265_s7 + $0x8dc] sm:$0xf0]  ;;  %v10085_v45 = vld [vmem:[%s15265_s7 + $0xb64] sm:$0xf] }
 0x258   :  { %5659 = vmatpush.bf16.msrb.mxu2 %v8692_v62  ;;  %5637 = vmatpush.bf16.msrb.mxu0 %v8132_v13  ;;  %v8860_v62 = vor.u32 %v10036_v16, %v8857_v56  ;;  %v941_v13 = vperm.slane %v12830_v30, 6  ;;  %v9896_v56 = vld [vmem:[%s15265_s7 + $0x57c] sm:$0xf] }
 0x25a   :  { %v2552_v51 = vpop.f32.mrf.mxu2  ;;  %5674 = vmatpush.bf16.msrb.mxu3 %v8860_v62  ;;  %v8023_v62 = vld [vmem:[%s15265_s7 + $0x350] sm:$0xf] }
 0x25b   :  { %5648 = vmatpush.bf16.msrb.mxu1 %v8412_v6  ;;  %v2553_v28 = vadd.f32 %v2552_v51, %v941_v13  ;;  %v9889_v51 = vld [vmem:[%s15265_s7 + $0x544] sm:$0xf]  ;;  %v9140_v13 = vor.u32 %v10106_v3, %v9137_v4  ;;  %v9998_v3 = vld [vmem:[%s15265_s7 + $0x8a8] sm:$0xf0] }
 0x25c   :  { %5660 = vmatpush.bf16.msrb.mxu2 %v8664_v10  ;;  %5638 = vmatpush.bf16.msrb.mxu0 %v8104_v58  ;;  %v9917_v10 = vld [vmem:[%s15265_s7 + $0x624] sm:$0xf]  ;;  %v2567_v14 = vpop.f32.mrf.mxu3  ;;  %v8776_v58 = vor.u32 %v10015_v23, %v8773_v29  ;;  %v9746_v23 = vld [vmem:[%s15265_s7 + $0xc8] sm:$0xf0] }
 0x25d   :  { %v8384_v17 = vor.u32 %v9917_v10, %v8381_v12  ;;  %v2566_v46 = vadd.f32 %v12973_v63, %v2553_v28  ;;  %v10001_v63 = vld [vmem:[%s15265_s7 + $0x8c4] sm:$0xf]  ;;  %v7995_v14 = vld [vmem:[%s15265_s7 + $0x318] sm:$0xf]  ;;  %v9816_v28 = vld [vmem:[%s15265_s7 + $0x2f8] sm:$0xf0] }
 0x25e   :  { %v2591_v21 = vpop.f32.mrf.mxu1  ;;  %5675 = vmatpush.bf16.msrb.mxu3 %v8832_v31  ;;  %v8720_v2 = vor.u32 %v10001_v63, %v8717_v43  ;;  %v8024_v31 = vor.u32 %v9830_v41, %v8023_v62  ;;  %v9753_v10 = vld [vmem:[%s15265_s7 + $0x100] sm:$0xf0] }
 0x25f   :  { %5649 = vmatpush.bf16.msrb.mxu1 %v8384_v17  ;;  %v7716_v20 = vor.u32 %v9753_v10, %v7715_v9  ;;  %v7855_v9 = vld [vmem:[%s15265_s7 + $0x200] sm:$0xf] }
 0x260   :  { %5661 = vmatpush.bf16.msrb.mxu2 %v8636_v24  ;;  %5639 = vmatpush.bf16.msrb.mxu0 %v8076_v50  ;;  %v9910_v24 = vld [vmem:[%s15265_s7 + $0x5ec] sm:$0xf] }
 0x261   :  { %v8356_v34 = vor.u32 %v9910_v24, %v8353_v26  ;;  %5628 = vmatmul.bf16.vlgmr.msra.gmra.mxu3 %v12527_v38  ;;  %v7967_v26 = vld [vmem:[%s15265_s7 + $0x2e0] sm:$0xf] }
 0x262   :  { %v2554_v35 = vpop.f32.mrf.mxu2  ;;  %5676 = vmatpush.bf16.msrb.mxu3 %v8804_v22  ;;  %v7687_v22 = vld [vmem:[%s15265_s7 + $0xb0] sm:$0xf] }
 0x263   :  { %5650 = vmatpush.bf16.msrb.mxu1 %v8356_v34  ;;  %v7688_v34 = vor.u32 %v9746_v23, %v7687_v22  ;;  %v7968_v35 = vor.u32 %v9816_v28, %v7967_v26  ;;  %v10057_v23 = vld [vmem:[%s15265_s7 + $0xa84] sm:$0xf] }
 0x264   :  { %5662 = vmatpush.bf16.msrb.mxu2 %v8608_v27  ;;  %5640 = vmatpush.bf16.msrb.mxu0 %v8048_v0  ;;  %v8745_v27 = vld [vmem:[%s15265_s7 + $0x914] sm:$0xf0]  ;;  %v2578_v49 = vpop.f32.mrf.mxu0  ;;  %v8300_v0 = vor.u32 %v9896_v56, %v8297_v57  ;;  %v10078_v56 = vld [vmem:[%s15265_s7 + $0xb2c] sm:$0xf]  ;;  %v9025_v57 = vld [vmem:[%s15265_s7 + $0xb44] sm:$0xf0] }
 0x265   :  { %v2579_v16 = vadd.f32 %v2578_v49, %v2566_v46  ;;  %v8748_v53 = vor.u32 %v10008_v44, %v8745_v27  ;;  %v7939_v44 = vld [vmem:[%s15265_s7 + $0x2a8] sm:$0xf]  ;;  %v9053_v46 = vld [vmem:[%s15265_s7 + $0xb7c] sm:$0xf0]  ;;  %v9028_v41 = vor.u32 %v10078_v56, %v9025_v57 }
 0x266   :  { %v2593_v50 = vpop.f32.mrf.mxu1  ;;  %5677 = vmatpush.bf16.msrb.mxu3 %v8776_v58  ;;  %v9739_v58 = vld [vmem:[%s15265_s7 + $0x90] sm:$0xf0]  ;;  %v7940_v48 = vor.u32 %v9809_v42, %v7939_v44  ;;  %v7631_v49 = vld [vmem:[%s15265_s7 + $0x40] sm:$0xf]  ;;  %v9886_v44 = vld [vmem:[%s15265_s7 + $0x528] sm:$0xf0] }
 0x267   :  { %v2592_v59 = vadd.f32 %v2591_v21, %v2579_v16  ;;  %5651 = vmatpush.bf16.msrb.mxu1 %v8328_v5  ;;  %v7996_v21 = vor.u32 %v9823_v15, %v7995_v14  ;;  %v9732_v5 = vld [vmem:[%s15265_s7 + $0x58] sm:$0xf0]  ;;  %v9056_v16 = vor.u32 %v10085_v45, %v9053_v46  ;;  %v7911_v50 = vld [vmem:[%s15265_s7 + $0x270] sm:$0xf]  ;;  %v9991_v14 = vld [vmem:[%s15265_s7 + $0x870] sm:$0xf0] }
 0x268   :  { %5663 = vmatpush.bf16.msrb.mxu2 %v8580_v60  ;;  %v7743_v60 = vld [vmem:[%s15265_s7 + $0x120] sm:$0xf] }
 0x269   :  { %v2653_v1 = vmul.f32 0.2, %v2592_v59  ;;  %v7744_v6 = vor.u32 %v9760_v61, %v7743_v60  ;;  %v7603_v60 = vld [vmem:[%s15265_s7 + $0x8] sm:$0xf]  ;;  %v7883_v61 = vld [vmem:[%s15265_s7 + $0x238] sm:$0xf] }
 0x26a   :  { %5678 = vmatpush.bf16.msrb.mxu3 %v8748_v53  ;;  %v9802_v53 = vld [vmem:[%s15265_s7 + $0x288] sm:$0xf0] }
 0x26b   :  { %v2661_v8 = vmax.f32 %v2592_v59, %v2653_v1  ;;  %5652 = vmatpush.bf16.msrb.mxu1 %v8300_v0  ;;  %v7632_v59 = vor.u32 %v9732_v5, %v7631_v49  ;;  %v7912_v43 = vor.u32 %v9802_v53, %v7911_v50  ;;  %v9795_v0 = vld [vmem:[%s15265_s7 + $0x250] sm:$0xf0]  ;;  %v8695_v1 = vld [vmem:[%s15265_s7 + $0x890] sm:$0xf]  ;;  %v8611_v5 = vld [vmem:[%s15265_s7 + $0x7e8] sm:$0xf] }
 0x26c   :  { %5664 = vmatpush.bf16.msrb.mxu2 %v8552_v7  ;;  %v8269_v7 = vld [vmem:[%s15265_s7 + $0x55c] sm:$0xf0]  ;;  %v2580_v12 = vpop.f32.mrf.mxu0 }
 0x26d   :  { %v8272_v11 = vor.u32 %v9889_v51, %v8269_v7  ;;  %v13114_v17 = vpack.c.bf16 %v2661_v8, %v2661_v8  ;;  %v7884_v8 = vor.u32 %v9795_v0, %v7883_v61  ;;  %v9788_v12 = vld [vmem:[%s15265_s7 + $0x218] sm:$0xf0]  ;;  %v10155_v61 = vld [vmem:[%s15265_s7 + $0xd94] sm:$0xf]  ;;  %v8583_v0 = vld [vmem:[%s15265_s7 + $0x7b0] sm:$0xf] }
 0x26e   :  { %5679 = vmatpush.bf16.msrb.mxu3 %v8720_v2  ;;  %v10071_v2 = vld [vmem:[%s15265_s7 + $0xaf4] sm:$0xf] }
 0x26f   :  { %5589 = vmatmul.bf16.vlgmr.msra.gmra.mxu0 %v13114_v17  ;;  %5653 = vmatpush.bf16.msrb.mxu1 %v8272_v11  ;;  %v10064_v11 = vld [vmem:[%s15265_s7 + $0xabc] sm:$0xf] }
 0x270   :  { %5665 = vmatpush.bf16.msrb.mxu2 %v8524_v18  ;;  %v10099_v18 = vld [vmem:[%s15265_s7 + $0xbd4] sm:$0xf]  ;;  %5685 = vmatpush.bf16.msra.mxu0 %v9140_v13  ;;  %v8667_v13 = vld [vmem:[%s15265_s7 + $0x858] sm:$0xf] }
 0x271   :  { %v9112_v24 = vor.u32 %v10099_v18, %v9109_v19  ;;  %5680 = vmatmul.bf16.vlgmr.msrb.gmra.mxu3 %v12943_v37  ;;  %v8969_v18 = vld [vmem:[%s15265_s7 + $0xad4] sm:$0xf0]  ;;  %v8668_v22 = vor.u32 %v9991_v14, %v8667_v13 }
 0x272   :  { %5724 = vmatpush.bf16.msra.mxu3 %v8024_v31  ;;  %v8696_v31 = vor.u32 %v9998_v3, %v8695_v1  ;;  %v8972_v28 = vor.u32 %v10064_v11, %v8969_v18  ;;  %v9970_v1 = vld [vmem:[%s15265_s7 + $0x7c8] sm:$0xf0]  ;;  %v8555_v14 = vld [vmem:[%s15265_s7 + $0x778] sm:$0xf] }
 0x274   :  { %5666 = vmatpush.bf16.msrb.mxu2 %v8496_v36  ;;  %v2617_v29 = vpop.f32.mrf.mxu3  ;;  %v7659_v36 = vld [vmem:[%s15265_s7 + $0x78] sm:$0xf]  ;;  %5686 = vmatpush.bf16.msra.mxu0 %v9112_v24  ;;  %v7827_v24 = vld [vmem:[%s15265_s7 + $0x1c8] sm:$0xf] }
 0x275   :  { %v7660_v27 = vor.u32 %v9739_v58, %v7659_v36  ;;  %v8919_v36 = vld [vmem:[%s15265_s7 + $0xa50] sm:$0xf]  ;;  %v10054_v58 = vld [vmem:[%s15265_s7 + $0xa68] sm:$0xf0] }
 0x276   :  { %5725 = vmatpush.bf16.msra.mxu3 %v7996_v21  ;;  %v7856_v21 = vor.u32 %v9788_v12, %v7855_v9  ;;  %v8920_v49 = vor.u32 %v10054_v58, %v8919_v36  ;;  %v8584_v9 = vor.u32 %v9970_v1, %v8583_v0  ;;  %v9305_v12 = vld [vmem:[%s15265_s7 + $0xd74] sm:$0xf0]  ;;  %v8807_v58 = vld [vmem:[%s15265_s7 + $0x970] sm:$0xf] }
 0x277   :  { %5667 = vmatmul.bf16.vlgmr.msrb.gmra.mxu2 %v12753_v52  ;;  %v9221_v0 = vld [vmem:[%s15265_s7 + $0xccc] sm:$0xf0] }
 0x278   :  { %5711 = vmatpush.bf16.msra.mxu2 %v7800_v40  ;;  %v9084_v40 = vor.u32 %v10092_v32, %v9081_v25  ;;  %v8639_v32 = vld [vmem:[%s15265_s7 + $0x820] sm:$0xf]  ;;  %v9984_v25 = vld [vmem:[%s15265_s7 + $0x838] sm:$0xf0] }
 0x279   :  { %v8640_v46 = vor.u32 %v9984_v25, %v8639_v32  ;;  %v8527_v25 = vld [vmem:[%s15265_s7 + $0x740] sm:$0xf] }
 0x27a   :  { %v2604_v47 = vpop.f32.mrf.mxu2  ;;  %5726 = vmatpush.bf16.msra.mxu3 %v7968_v35  ;;  %5687 = vmatpush.bf16.msra.mxu0 %v9084_v40  ;;  %v8941_v35 = vld [vmem:[%s15265_s7 + $0xa9c] sm:$0xf0]  ;;  %v8247_v40 = vld [vmem:[%s15265_s7 + $0x510] sm:$0xf] }
 0x27b   :  { %v8248_v53 = vor.u32 %v9886_v44, %v8247_v40  ;;  %v10026_v40 = vld [vmem:[%s15265_s7 + $0x988] sm:$0xf0] }
 0x27c   :  { %5712 = vmatpush.bf16.msra.mxu2 %v7772_v33  ;;  %v942_v33 = vperm.slane %v12830_v30, 7  ;;  %v2619_v63 = vpop.f32.mrf.mxu3  ;;  %v9725_v30 = vld [vmem:[%s15265_s7 + $0x20] sm:$0xf0] }
 0x27d   :  { %v7604_v51 = vor.u32 %v9725_v30, %v7603_v60  ;;  %v10047_v63 = vld [vmem:[%s15265_s7 + $0xa30] sm:$0xf0] }
 0x27e   :  { %5727 = vmatpush.bf16.msra.mxu3 %v7940_v48  ;;  %v2643_v62 = vpop.f32.mrf.mxu1  ;;  %5688 = vmatpush.bf16.msra.mxu0 %v9056_v16  ;;  %v2605_v4 = vadd.f32 %v2604_v47, %v942_v33  ;;  %v9361_v47 = vld [vmem:[%s15265_s7 + $0xde4] sm:$0xf0]  ;;  %v8944_v48 = vor.u32 %v10057_v23, %v8941_v35  ;;  %v9977_v16 = vld [vmem:[%s15265_s7 + $0x800] sm:$0xf0]  ;;  %v8891_v33 = vld [vmem:[%s15265_s7 + $0xa18] sm:$0xf] }
 0x27f   :  { %5641 = vmatmul.bf16.vlgmr.msrb.gmra.mxu0 %v12656_v54  ;;  %v8612_v30 = vor.u32 %v9977_v16, %v8611_v5  ;;  %v9865_v23 = vld [vmem:[%s15265_s7 + $0x480] sm:$0xf0]  ;;  %v8808_v5 = vor.u32 %v10026_v40, %v8807_v58  ;;  %v8499_v16 = vld [vmem:[%s15265_s7 + $0x708] sm:$0xf]  ;;  %v9143_v58 = vld [vmem:[%s15265_s7 + $0xc10] sm:$0xf] }
 0x280   :  { %5713 = vmatpush.bf16.msra.mxu2 %v7744_v6  ;;  %v8997_v6 = vld [vmem:[%s15265_s7 + $0xb0c] sm:$0xf0]  ;;  %v2618_v15 = vadd.f32 %v2617_v29, %v2605_v4  ;;  %v9781_v29 = vld [vmem:[%s15265_s7 + $0x1e0] sm:$0xf0]  ;;  %v8863_v4 = vld [vmem:[%s15265_s7 + $0x9e0] sm:$0xf] }
 0x281   :  { %v9000_v10 = vor.u32 %v10071_v2, %v8997_v6  ;;  %v7828_v45 = vor.u32 %v9781_v29, %v7827_v24  ;;  %v10040_v2 = vld [vmem:[%s15265_s7 + $0x9f8] sm:$0xf0]  ;;  %v10110_v40 = vld [vmem:[%s15265_s7 + $0xc28] sm:$0xf0] }
 0x282   :  { %v2606_v7 = vpop.f32.mrf.mxu2  ;;  %5728 = vmatpush.bf16.msra.mxu3 %v7912_v43  ;;  %5689 = vmatpush.bf16.msra.mxu0 %v9028_v41  ;;  %v9879_v43 = vld [vmem:[%s15265_s7 + $0x4f0] sm:$0xf0]  ;;  %v8892_v41 = vor.u32 %v10047_v63, %v8891_v33  ;;  %v8864_v13 = vor.u32 %v10040_v2, %v8863_v4  ;;  %v8751_v2 = vld [vmem:[%s15265_s7 + $0x900] sm:$0xf] }
 0x283   :  { %v8191_v7 = vld [vmem:[%s15265_s7 + $0x4a0] sm:$0xf]  ;;  %v10019_v63 = vld [vmem:[%s15265_s7 + $0x950] sm:$0xf0] }
 0x284   :  { %5714 = vmatpush.bf16.msra.mxu2 %v7716_v20  ;;  %v2630_v19 = vpop.f32.mrf.mxu0 }
 0x285   :  { %v2631_v20 = vadd.f32 %v2630_v19, %v2618_v15  ;;  %v9963_v15 = vld [vmem:[%s15265_s7 + $0x790] sm:$0xf0]  ;;  %v8835_v19 = vld [vmem:[%s15265_s7 + $0x9a8] sm:$0xf] }
 0x286   :  { %5729 = vmatpush.bf16.msra.mxu3 %v7884_v8  ;;  %v2645_v26 = vpop.f32.mrf.mxu1  ;;  %5690 = vmatpush.bf16.msra.mxu0 %v9000_v10  ;;  %v9872_v8 = vld [vmem:[%s15265_s7 + $0x4b8] sm:$0xf0]  ;;  %v8556_v24 = vor.u32 %v9963_v15, %v8555_v14  ;;  %v9193_v14 = vld [vmem:[%s15265_s7 + $0xc94] sm:$0xf0] }
 0x287   :  { %v10148_v10 = vld [vmem:[%s15265_s7 + $0xd5c] sm:$0xf]  ;;  %v8192_v18 = vor.u32 %v9872_v8, %v8191_v7  ;;  %v10141_v26 = vld [vmem:[%s15265_s7 + $0xd24] sm:$0xf]  ;;  %v7773_v8 = vld [vmem:[%s15265_s7 + $0x174] sm:$0xf0] }
 0x288   :  { %5715 = vmatpush.bf16.msra.mxu2 %v7688_v34  ;;  %v2644_v34 = vadd.f32 %v2643_v62, %v2631_v20  ;;  %v9333_v62 = vld [vmem:[%s15265_s7 + $0xdac] sm:$0xf0]  ;;  %v10033_v20 = vld [vmem:[%s15265_s7 + $0x9c0] sm:$0xf0]  ;;  %v9764_v7 = vld [vmem:[%s15265_s7 + $0x15c] sm:$0xf] }
 0x289   :  { %v9336_v6 = vor.u32 %v10155_v61, %v9333_v62  ;;  %v8836_v32 = vor.u32 %v10033_v20, %v8835_v19  ;;  %v9851_v61 = vld [vmem:[%s15265_s7 + $0x410] sm:$0xf0]  ;;  %v8051_v19 = vld [vmem:[%s15265_s7 + $0x388] sm:$0xf] }
 0x28a   :  { %v2654_v42 = vmul.f32 0.2, %v2644_v34  ;;  %5730 = vmatpush.bf16.msra.mxu3 %v7856_v21  ;;  %5691 = vmatpush.bf16.msra.mxu0 %v8972_v28  ;;  %v9308_v21 = vor.u32 %v10148_v10, %v9305_v12  ;;  %v9277_v28 = vld [vmem:[%s15265_s7 + $0xd3c] sm:$0xf0]  ;;  %v9844_v10 = vld [vmem:[%s15265_s7 + $0x3d8] sm:$0xf0] }
 0x28b   :  { %v9280_v44 = vor.u32 %v10141_v26, %v9277_v28  ;;  %v8723_v20 = vld [vmem:[%s15265_s7 + $0x8c8] sm:$0xf]  ;;  %v7745_v26 = vld [vmem:[%s15265_s7 + $0x13c] sm:$0xf0] }
 0x28c   :  { %5716 = vmatpush.bf16.msra.mxu2 %v7660_v27  ;;  %v10162_v27 = vld [vmem:[%s15265_s7 + $0xdcc] sm:$0xf]  ;;  %v2662_v50 = vmax.f32 %v2644_v34, %v2654_v42  ;;  %v2632_v56 = vpop.f32.mrf.mxu0  ;;  %v9956_v34 = vld [vmem:[%s15265_s7 + $0x758] sm:$0xf0]  ;;  %v8135_v42 = vld [vmem:[%s15265_s7 + $0x430] sm:$0xf] }
 0x28d   :  { %v9364_v57 = vor.u32 %v10162_v27, %v9361_v47  ;;  %v8528_v27 = vor.u32 %v9956_v34, %v8527_v25  ;;  %v10134_v47 = vld [vmem:[%s15265_s7 + $0xcec] sm:$0xf]  ;;  %v9771_v56 = vld [vmem:[%s15265_s7 + $0x194] sm:$0xf]  ;;  %v8025_v34 = vld [vmem:[%s15265_s7 + $0x36c] sm:$0xf0] }
 0x28e   :  { %v13277_v60 = vpack.c.bf16 %v2662_v50, %v2662_v50  ;;  %5731 = vmatpush.bf16.msra.mxu3 %v7828_v45  ;;  %5692 = vmatpush.bf16.msra.mxu0 %v8944_v48  ;;  %v9858_v45 = vld [vmem:[%s15265_s7 + $0x448] sm:$0xf0]  ;;  %v9249_v48 = vld [vmem:[%s15265_s7 + $0xd04] sm:$0xf0]  ;;  %v9949_v50 = vld [vmem:[%s15265_s7 + $0x720] sm:$0xf0] }
 0x28f   :  { %v8136_v33 = vor.u32 %v9858_v45, %v8135_v42  ;;  %v8500_v62 = vor.u32 %v9949_v50, %v8499_v16  ;;  %v9827_v25 = vld [vmem:[%s15265_s7 + $0x354] sm:$0xf]  ;;  %v8471_v45 = vld [vmem:[%s15265_s7 + $0x6d0] sm:$0xf]  ;;  %v9144_v16 = vor.u32 %v10110_v40, %v9143_v58  ;;  %v9820_v50 = vld [vmem:[%s15265_s7 + $0x31c] sm:$0xf] }
 0x290   :  { %5717 = vmatpush.bf16.msra.mxu2 %v7632_v59  ;;  %v8219_v59 = vld [vmem:[%s15265_s7 + $0x4d8] sm:$0xf]  ;;  %5602 = vmatmul.bf16.vlgmr.msra.gmra.mxu1 %v13277_v60  ;;  %v8359_v58 = vld [vmem:[%s15265_s7 + $0x5f0] sm:$0xf]  ;;  %v9914_v40 = vld [vmem:[%s15265_s7 + $0x608] sm:$0xf0] }
 0x291   :  { %v8220_v3 = vor.u32 %v9879_v43, %v8219_v59  ;;  %5698 = vmatpush.bf16.msra.mxu1 %v9364_v57  ;;  %5732 = vmatmul.bf16.vlgmr.msra.gmra.mxu3 %v12527_v38  ;;  %v7801_v57 = vld [vmem:[%s15265_s7 + $0x1ac] sm:$0xf0]  ;;  %v9252_v43 = vor.u32 %v10134_v47, %v9249_v48  ;;  %v8028_v47 = vor.u32 %v9827_v25, %v8025_v34  ;;  %v9750_v48 = vld [vmem:[%s15265_s7 + $0xec] sm:$0xf] }
 0x292   :  { %5776 = vmatpush.bf16.msrb.mxu3 %v8920_v49  ;;  %5737 = vmatpush.bf16.msrb.mxu0 %v8248_v53  ;;  %v8779_v53 = vld [vmem:[%s15265_s7 + $0x938] sm:$0xf]  ;;  %v7804_v4 = vor.u32 %v9771_v56, %v7801_v57  ;;  %v10103_v57 = vld [vmem:[%s15265_s7 + $0xbf0] sm:$0xf0]  ;;  %v9031_v25 = vld [vmem:[%s15265_s7 + $0xb30] sm:$0xf] }
 0x293   :  { %5693 = vmatmul.bf16.vlgmr.msra.gmra.mxu0 %v13114_v17  ;;  %v9115_v56 = vld [vmem:[%s15265_s7 + $0xbd8] sm:$0xf]  ;;  %v10082_v34 = vld [vmem:[%s15265_s7 + $0xb48] sm:$0xf0] }
 0x294   :  { %5718 = vmatpush.bf16.msra.mxu2 %v7604_v51  ;;  %v3183_v51 = vld [vmem:[%s15266_s8] sm:$0xff] }
 0x295   :  { %v3185_v11 = vperm.slane %v3183_v51, 0  ;;  %5699 = vmatpush.bf16.msra.mxu1 %v9336_v6  ;;  %v10012_v51 = vld [vmem:[%s15265_s7 + $0x918] sm:$0xf0] }
 0x296   :  { %5777 = vmatpush.bf16.msrb.mxu3 %v8892_v41  ;;  %5738 = vmatpush.bf16.msrb.mxu0 %v8220_v3  ;;  %v10127_v41 = vld [vmem:[%s15265_s7 + $0xcb4] sm:$0xf]  ;;  %v8780_v3 = vor.u32 %v10019_v63, %v8779_v53  ;;  %v7997_v53 = vld [vmem:[%s15265_s7 + $0x334] sm:$0xf0] }
 0x297   :  { %5719 = vmatmul.bf16.vlgmr.msra.gmra.mxu2 %v12555_v55 }
 0x298   :  { %5763 = vmatpush.bf16.msrb.mxu2 %v8696_v31  ;;  %v5525_v31 = vpop.f32.mrf.mxu3 }
 0x299   :  { %5700 = vmatpush.bf16.msra.mxu1 %v9308_v21 }
 0x29a   :  { %v5512_v29 = vpop.f32.mrf.mxu2  ;;  %5778 = vmatpush.bf16.msrb.mxu3 %v8864_v13  ;;  %5739 = vmatpush.bf16.msrb.mxu0 %v8192_v18  ;;  %v10120_v13 = vld [vmem:[%s15265_s7 + $0xc7c] sm:$0xf]  ;;  %v7776_v18 = vor.u32 %v9764_v7, %v7773_v8  ;;  %v8415_v7 = vld [vmem:[%s15265_s7 + $0x660] sm:$0xf] }
 0x29b   :  { %v5513_v35 = vadd.f32 %v5512_v29, %v3185_v11  ;;  %v8752_v11 = vor.u32 %v10012_v51, %v8751_v2  ;;  %v9196_v29 = vor.u32 %v10120_v13, %v9193_v14  ;;  %v9087_v2 = vld [vmem:[%s15265_s7 + $0xba0] sm:$0xf]  ;;  %v9928_v8 = vld [vmem:[%s15265_s7 + $0x678] sm:$0xf0]  ;;  %v9806_v13 = vld [vmem:[%s15265_s7 + $0x2ac] sm:$0xf] }
 0x29c   :  { %5764 = vmatpush.bf16.msrb.mxu2 %v8668_v22  ;;  %v8163_v22 = vld [vmem:[%s15265_s7 + $0x468] sm:$0xf] }
 0x29d   :  { %v8164_v36 = vor.u32 %v9865_v23, %v8163_v22  ;;  %v5526_v49 = vadd.f32 %v5525_v31, %v5513_v35  ;;  %5701 = vmatpush.bf16.msra.mxu1 %v9280_v44  ;;  %v9224_v31 = vor.u32 %v10127_v41, %v9221_v0  ;;  %v10113_v22 = vld [vmem:[%s15265_s7 + $0xc44] sm:$0xf]  ;;  %v7689_v41 = vld [vmem:[%s15265_s7 + $0xcc] sm:$0xf0]  ;;  %v9116_v0 = vor.u32 %v10103_v57, %v9115_v56  ;;  %v7941_v14 = vld [vmem:[%s15265_s7 + $0x2c4] sm:$0xf0] }
 0x29e   :  { %5779 = vmatpush.bf16.msrb.mxu3 %v8836_v32  ;;  %v5551_v59 = vpop.f32.mrf.mxu1  ;;  %v10005_v23 = vld [vmem:[%s15265_s7 + $0x8e0] sm:$0xf0]  ;;  %v8331_v56 = vld [vmem:[%s15265_s7 + $0x5b8] sm:$0xf] }
 0x29f   :  { %5740 = vmatpush.bf16.msrb.mxu0 %v8164_v36  ;;  %v9837_v32 = vld [vmem:[%s15265_s7 + $0x3a0] sm:$0xf0]  ;;  %v9165_v36 = vld [vmem:[%s15265_s7 + $0xc5c] sm:$0xf0]  ;;  %v8724_v44 = vor.u32 %v10005_v23, %v8723_v20  ;;  %v8387_v20 = vld [vmem:[%s15265_s7 + $0x628] sm:$0xf] }
 0x2a0   :  { %5765 = vmatpush.bf16.msrb.mxu2 %v8640_v46  ;;  %v5527_v46 = vpop.f32.mrf.mxu3  ;;  %5654 = vmatmul.bf16.vlgmr.msrb.gmra.mxu1 %v12634_v39  ;;  %v9729_v23 = vld [vmem:[%s15265_s7 + $0x44] sm:$0xf] }
 0x2a1   :  { %5702 = vmatpush.bf16.msra.mxu1 %v9252_v43  ;;  %v9942_v46 = vld [vmem:[%s15265_s7 + $0x6e8] sm:$0xf0]  ;;  %v8443_v43 = vld [vmem:[%s15265_s7 + $0x698] sm:$0xf] }
 0x2a2   :  { %v5514_v1 = vpop.f32.mrf.mxu2  ;;  %5780 = vmatpush.bf16.msrb.mxu3 %v8808_v5  ;;  %v9168_v5 = vor.u32 %v10113_v22, %v9165_v36  ;;  %v8472_v63 = vor.u32 %v9942_v46, %v8471_v45  ;;  %v7944_v22 = vor.u32 %v9806_v13, %v7941_v14  ;;  %v7605_v45 = vld [vmem:[%s15265_s7 + $0x24] sm:$0xf0]  ;;  %v9792_v46 = vld [vmem:[%s15265_s7 + $0x23c] sm:$0xf]  ;;  %v9981_v13 = vld [vmem:[%s15265_s7 + $0x824] sm:$0xf] }
 0x2a3   :  { %5741 = vmatpush.bf16.msrb.mxu0 %v8136_v33  ;;  %v9813_v1 = vld [vmem:[%s15265_s7 + $0x2e4] sm:$0xf]  ;;  %v8641_v14 = vld [vmem:[%s15265_s7 + $0x83c] sm:$0xf0] }
 0x2a4   :  { %5766 = vmatpush.bf16.msrb.mxu2 %v8612_v30  ;;  %v8107_v30 = vld [vmem:[%s15265_s7 + $0x3f8] sm:$0xf]  ;;  %v5538_v12 = vpop.f32.mrf.mxu0 }
 0x2a5   :  { %v8108_v6 = vor.u32 %v9851_v61, %v8107_v30  ;;  %v5539_v15 = vadd.f32 %v5538_v12, %v5526_v49  ;;  %5703 = vmatpush.bf16.msra.mxu1 %v9224_v31  ;;  %v7717_v49 = vld [vmem:[%s15265_s7 + $0x104] sm:$0xf0]  ;;  %v9935_v30 = vld [vmem:[%s15265_s7 + $0x6b0] sm:$0xf0]  ;;  %v8000_v61 = vor.u32 %v9820_v50, %v7997_v53  ;;  %v8360_v50 = vor.u32 %v9914_v40, %v8359_v58  ;;  %v9003_v53 = vld [vmem:[%s15265_s7 + $0xaf8] sm:$0xf] }
 0x2a6   :  { %5781 = vmatpush.bf16.msrb.mxu3 %v8780_v3  ;;  %v5553_v28 = vpop.f32.mrf.mxu1  ;;  %v7969_v3 = vld [vmem:[%s15265_s7 + $0x2fc] sm:$0xf0]  ;;  %v10044_v40 = vld [vmem:[%s15265_s7 + $0xa1c] sm:$0xf] }
 0x2a7   :  { %5742 = vmatpush.bf16.msrb.mxu0 %v8108_v6  ;;  %v13446_v35 = vadd.f32 %v5551_v59, %v5539_v15  ;;  %v7720_v59 = vor.u32 %v9750_v48, %v7717_v49  ;;  %v10096_v6 = vld [vmem:[%s15265_s7 + $0xbb8] sm:$0xf0]  ;;  %v7972_v31 = vor.u32 %v9813_v1, %v7969_v3  ;;  %v8416_v15 = vor.u32 %v9928_v8, %v8415_v7  ;;  %v9799_v28 = vld [vmem:[%s15265_s7 + $0x274] sm:$0xf]  ;;  %v7885_v48 = vld [vmem:[%s15265_s7 + $0x254] sm:$0xf0] }
 0x2a8   :  { %5767 = vmatpush.bf16.msrb.mxu2 %v8584_v9  ;;  %v8079_v9 = vld [vmem:[%s15265_s7 + $0x3c0] sm:$0xf]  ;;  %v9088_v12 = vor.u32 %v10096_v6, %v9087_v2  ;;  %v9995_v49 = vld [vmem:[%s15265_s7 + $0x894] sm:$0xf]  ;;  %v7888_v57 = vor.u32 %v9792_v46, %v7885_v48  ;;  %v10068_v3 = vld [vmem:[%s15265_s7 + $0xad8] sm:$0xf0] }
 0x2a9   :  { %v8080_v21 = vor.u32 %v9844_v10, %v8079_v9  ;;  %5704 = vmatpush.bf16.msra.mxu1 %v9196_v29  ;;  %v9736_v9 = vld [vmem:[%s15265_s7 + $0x7c] sm:$0xf]  ;;  %v7661_v10 = vld [vmem:[%s15265_s7 + $0x94] sm:$0xf0]  ;;  %v7913_v29 = vld [vmem:[%s15265_s7 + $0x28c] sm:$0xf0] }
 0x2aa   :  { %5782 = vmatpush.bf16.msrb.mxu3 %v8752_v11  ;;  %v9059_v11 = vld [vmem:[%s15265_s7 + $0xb68] sm:$0xf]  ;;  %v8975_v1 = vld [vmem:[%s15265_s7 + $0xac0] sm:$0xf]  ;;  %v9900_v2 = vld [vmem:[%s15265_s7 + $0x598] sm:$0xf0] }
 0x2ab   :  { %5743 = vmatpush.bf16.msrb.mxu0 %v8080_v21  ;;  %v9921_v21 = vld [vmem:[%s15265_s7 + $0x640] sm:$0xf0]  ;;  %v8947_v7 = vld [vmem:[%s15265_s7 + $0xa88] sm:$0xf]  ;;  %v9778_v8 = vld [vmem:[%s15265_s7 + $0x1cc] sm:$0xf] }
 0x2ac   :  { %5768 = vmatpush.bf16.msrb.mxu2 %v8556_v24  ;;  %v9757_v24 = vld [vmem:[%s15265_s7 + $0x124] sm:$0xf]  ;;  %v5540_v33 = vpop.f32.mrf.mxu0  ;;  %v8221_v46 = vld [vmem:[%s15265_s7 + $0x4f4] sm:$0xf0]  ;;  %v10159_v48 = vld [vmem:[%s15265_s7 + $0xdb0] sm:$0xf0] }
 0x2ad   :  { %v7748_v42 = vor.u32 %v9757_v24, %v7745_v26  ;;  %5705 = vmatpush.bf16.msra.mxu1 %v9168_v5  ;;  %v7633_v24 = vld [vmem:[%s15265_s7 + $0x5c] sm:$0xf0]  ;;  %v8697_v5 = vld [vmem:[%s15265_s7 + $0x8ac] sm:$0xf0]  ;;  %v10075_v33 = vld [vmem:[%s15265_s7 + $0xb10] sm:$0xf0] }
 0x2ae   :  { %5783 = vmatpush.bf16.msrb.mxu3 %v8724_v44  ;;  %v7636_v36 = vor.u32 %v9729_v23, %v7633_v24  ;;  %v7916_v44 = vor.u32 %v9799_v28, %v7913_v29  ;;  %v8644_v24 = vor.u32 %v9981_v13, %v8641_v14  ;;  %v10166_v28 = vld [vmem:[%s15265_s7 + $0xde8] sm:$0xf0]  ;;  %v10023_v14 = vld [vmem:[%s15265_s7 + $0x974] sm:$0xf] }
 0x2b0   :  { %5769 = vmatpush.bf16.msrb.mxu2 %v8528_v27  ;;  %v8052_v27 = vor.u32 %v9837_v32, %v8051_v19  ;;  %5706 = vmatmul.bf16.vlgmr.msra.gmra.mxu1 %v13277_v60  ;;  %v7664_v19 = vor.u32 %v9736_v9, %v7661_v10  ;;  %v8388_v32 = vor.u32 %v9921_v21, %v8387_v20  ;;  %v8275_v10 = vld [vmem:[%s15265_s7 + $0x548] sm:$0xf]  ;;  %v9893_v20 = vld [vmem:[%s15265_s7 + $0x560] sm:$0xf0]  ;;  %v9883_v21 = vld [vmem:[%s15265_s7 + $0x514] sm:$0xf] }
 0x2b1   :  { %5750 = vmatpush.bf16.msrb.mxu1 %v8472_v63  ;;  %5784 = vmatmul.bf16.vlgmr.msrb.gmra.mxu3 %v12943_v37  ;;  %v8976_v9 = vor.u32 %v10068_v3, %v8975_v1  ;;  %v10030_v1 = vld [vmem:[%s15265_s7 + $0x9ac] sm:$0xf]  ;;  %v8837_v3 = vld [vmem:[%s15265_s7 + $0x9c4] sm:$0xf0] }
 0x2b2   :  { %5744 = vmatpush.bf16.msrb.mxu0 %v8052_v27  ;;  %5828 = vmatpush.bf16.msra.mxu3 %v8028_v47  ;;  %v9032_v47 = vor.u32 %v10082_v34, %v9031_v25  ;;  %v9974_v25 = vld [vmem:[%s15265_s7 + $0x7ec] sm:$0xf]  ;;  %v8613_v34 = vld [vmem:[%s15265_s7 + $0x804] sm:$0xf0] }
 0x2b4   :  { %5770 = vmatpush.bf16.msrb.mxu2 %v8500_v62  ;;  %v9743_v62 = vld [vmem:[%s15265_s7 + $0xb4] sm:$0xf] }
 0x2b5   :  { %5745 = vmatmul.bf16.vlgmr.msrb.gmra.mxu0 %v12656_v54  ;;  %v7692_v51 = vor.u32 %v9743_v62, %v7689_v41  ;;  %v9988_v62 = vld [vmem:[%s15265_s7 + $0x85c] sm:$0xf]  ;;  %v8669_v41 = vld [vmem:[%s15265_s7 + $0x874] sm:$0xf0] }
 0x2b6   :  { %5789 = vmatpush.bf16.msra.mxu0 %v9144_v16  ;;  %5829 = vmatpush.bf16.msra.mxu3 %v8000_v61  ;;  %v7857_v61 = vld [vmem:[%s15265_s7 + $0x21c] sm:$0xf0] }
 0x2b7   :  { %5771 = vmatmul.bf16.vlgmr.msrb.gmra.mxu2 %v12753_v52 }
 0x2b8   :  { %5815 = vmatpush.bf16.msra.mxu2 %v7804_v4  ;;  %v8444_v4 = vor.u32 %v9935_v30, %v8443_v43  ;;  %v9785_v43 = vld [vmem:[%s15265_s7 + $0x204] sm:$0xf]  ;;  %v9004_v30 = vor.u32 %v10075_v33, %v9003_v53 }
 0x2b9   :  { %v7860_v6 = vor.u32 %v9785_v43, %v7857_v61  ;;  %v10037_v33 = vld [vmem:[%s15265_s7 + $0x9e4] sm:$0xf]  ;;  %v9311_v43 = vld [vmem:[%s15265_s7 + $0xd60] sm:$0xf] }
 0x2ba   :  { %5790 = vmatpush.bf16.msra.mxu0 %v9116_v0  ;;  %5751 = vmatpush.bf16.msrb.mxu1 %v8444_v4  ;;  %v5564_v27 = vpop.f32.mrf.mxu2  ;;  %v8303_v4 = vld [vmem:[%s15265_s7 + $0x580] sm:$0xf] }
 0x2bb   :  { %5830 = vmatpush.bf16.msra.mxu3 %v7972_v31  ;;  %v13581_v16 = vadd.f32 %v5564_v27, %v13446_v35  ;;  %v9907_v35 = vld [vmem:[%s15265_s7 + $0x5d0] sm:$0xf0]  ;;  %v8616_v27 = vor.u32 %v9974_v25, %v8613_v34  ;;  %v7807_v25 = vld [vmem:[%s15265_s7 + $0x198] sm:$0xf] }
 0x2bc   :  { %5816 = vmatpush.bf16.msra.mxu2 %v7776_v18  ;;  %v10089_v18 = vld [vmem:[%s15265_s7 + $0xb80] sm:$0xf0]  ;;  %v8332_v0 = vor.u32 %v9907_v35, %v8331_v56  ;;  %v9775_v34 = vld [vmem:[%s15265_s7 + $0x1b0] sm:$0xf0] }
 0x2bd   :  { %v9060_v26 = vor.u32 %v10089_v18, %v9059_v11  ;;  %v10061_v11 = vld [vmem:[%s15265_s7 + $0xaa0] sm:$0xf0]  ;;  %v10051_v18 = vld [vmem:[%s15265_s7 + $0xa54] sm:$0xf] }
 0x2be   :  { %5791 = vmatpush.bf16.msra.mxu0 %v9088_v12  ;;  %5752 = vmatpush.bf16.msrb.mxu1 %v8416_v15  ;;  %v7829_v12 = vld [vmem:[%s15265_s7 + $0x1e4] sm:$0xf0]  ;;  %v8304_v15 = vor.u32 %v9900_v2, %v8303_v4  ;;  %v8948_v29 = vor.u32 %v10061_v11, %v8947_v7  ;;  %v9869_v35 = vld [vmem:[%s15265_s7 + $0x4a4] sm:$0xf]  ;;  %v9862_v2 = vld [vmem:[%s15265_s7 + $0x46c] sm:$0xf] }
 0x2bf   :  { %5831 = vmatpush.bf16.msra.mxu3 %v7944_v22  ;;  %v8249_v22 = vld [vmem:[%s15265_s7 + $0x52c] sm:$0xf0]  ;;  %v7832_v23 = vor.u32 %v9778_v8, %v7829_v12  ;;  %v9283_v7 = vld [vmem:[%s15265_s7 + $0xd28] sm:$0xf]  ;;  %v10145_v8 = vld [vmem:[%s15265_s7 + $0xd40] sm:$0xf0] }
 0x2c0   :  { %5817 = vmatpush.bf16.msra.mxu2 %v7748_v42  ;;  %v9722_v42 = vld [vmem:[%s15265_s7 + $0xc] sm:$0xf]  ;;  %v8252_v58 = vor.u32 %v9883_v21, %v8249_v22  ;;  %v8529_v12 = vld [vmem:[%s15265_s7 + $0x75c] sm:$0xf0]  ;;  %v9284_v11 = vor.u32 %v10145_v8, %v9283_v7  ;;  %v9255_v21 = vld [vmem:[%s15265_s7 + $0xcf0] sm:$0xf] }
 0x2c1   :  { %v7608_v63 = vor.u32 %v9722_v42, %v7605_v45  ;;  %v9876_v45 = vld [vmem:[%s15265_s7 + $0x4dc] sm:$0xf]  ;;  %v10138_v22 = vld [vmem:[%s15265_s7 + $0xd08] sm:$0xf0]  ;;  %v8031_v7 = vld [vmem:[%s15265_s7 + $0x358] sm:$0xf] }
 0x2c2   :  { %5792 = vmatpush.bf16.msra.mxu0 %v9060_v26  ;;  %5753 = vmatpush.bf16.msrb.mxu1 %v8388_v32  ;;  %v5566_v31 = vpop.f32.mrf.mxu2  ;;  %v9367_v26 = vld [vmem:[%s15265_s7 + $0xdd0] sm:$0xf]  ;;  %v8224_v53 = vor.u32 %v9876_v45, %v8221_v46  ;;  %v9227_v45 = vld [vmem:[%s15265_s7 + $0xcb8] sm:$0xf]  ;;  %v10131_v46 = vld [vmem:[%s15265_s7 + $0xcd0] sm:$0xf0] }
 0x2c3   :  { %5832 = vmatpush.bf16.msra.mxu3 %v7916_v44  ;;  %v8893_v44 = vld [vmem:[%s15265_s7 + $0xa34] sm:$0xf0]  ;;  %v9368_v42 = vor.u32 %v10166_v28, %v9367_v26  ;;  %v8501_v26 = vld [vmem:[%s15265_s7 + $0x724] sm:$0xf0]  ;;  %v10016_v28 = vld [vmem:[%s15265_s7 + $0x93c] sm:$0xf] }
 0x2c4   :  { %5818 = vmatpush.bf16.msra.mxu2 %v7720_v59  ;;  %v8700_v59 = vor.u32 %v9995_v49, %v8697_v5  ;;  %v8896_v49 = vor.u32 %v10044_v40, %v8893_v44  ;;  %v9967_v5 = vld [vmem:[%s15265_s7 + $0x7b4] sm:$0xf]  ;;  %v9848_v40 = vld [vmem:[%s15265_s7 + $0x3fc] sm:$0xf]  ;;  %v8109_v44 = vld [vmem:[%s15265_s7 + $0x414] sm:$0xf0] }
 0x2c5   :  { %v9831_v8 = vld [vmem:[%s15265_s7 + $0x370] sm:$0xf0] }
 0x2c6   :  { %5793 = vmatpush.bf16.msra.mxu0 %v9032_v47  ;;  %5754 = vmatpush.bf16.msrb.mxu1 %v8360_v50  ;;  %v9339_v47 = vld [vmem:[%s15265_s7 + $0xd98] sm:$0xf]  ;;  %v8585_v50 = vld [vmem:[%s15265_s7 + $0x7cc] sm:$0xf0] }
 0x2c7   :  { %5833 = vmatpush.bf16.msra.mxu3 %v7888_v57  ;;  %v9340_v56 = vor.u32 %v10159_v48, %v9339_v47  ;;  %v8193_v57 = vld [vmem:[%s15265_s7 + $0x4bc] sm:$0xf0]  ;;  %v7808_v48 = vor.u32 %v9775_v34, %v7807_v25  ;;  %v9932_v34 = vld [vmem:[%s15265_s7 + $0x69c] sm:$0xf] }
 0x2c8   :  { %5819 = vmatpush.bf16.msra.mxu2 %v7692_v51  ;;  %v8672_v51 = vor.u32 %v9988_v62, %v8669_v41  ;;  %v9960_v62 = vld [vmem:[%s15265_s7 + $0x77c] sm:$0xf]  ;;  %v8557_v41 = vld [vmem:[%s15265_s7 + $0x794] sm:$0xf0] }
 0x2ca   :  { %5794 = vmatpush.bf16.msra.mxu0 %v9004_v30  ;;  %5755 = vmatpush.bf16.msrb.mxu1 %v8332_v0  ;;  %v10152_v30 = vld [vmem:[%s15265_s7 + $0xd78] sm:$0xf0]  ;;  %v8196_v0 = vor.u32 %v9869_v35, %v8193_v57  ;;  %v8081_v35 = vld [vmem:[%s15265_s7 + $0x3dc] sm:$0xf0] }
 0x2cb   :  { %5834 = vmatpush.bf16.msra.mxu3 %v7860_v6  ;;  %v9312_v4 = vor.u32 %v10152_v30, %v9311_v43  ;;  %v8165_v6 = vld [vmem:[%s15265_s7 + $0x484] sm:$0xf0]  ;;  %v9199_v57 = vld [vmem:[%s15265_s7 + $0xc80] sm:$0xf] }
 0x2cc   :  { %5820 = vmatpush.bf16.msra.mxu2 %v7664_v19  ;;  %v8921_v19 = vld [vmem:[%s15265_s7 + $0xa6c] sm:$0xf0]  ;;  %v8168_v13 = vor.u32 %v9862_v2, %v8165_v6 }
 0x2cd   :  { %v8924_v32 = vor.u32 %v10051_v18, %v8921_v19  ;;  %v9855_v18 = vld [vmem:[%s15265_s7 + $0x434] sm:$0xf]  ;;  %v8137_v19 = vld [vmem:[%s15265_s7 + $0x44c] sm:$0xf0] }
 0x2ce   :  { %5795 = vmatpush.bf16.msra.mxu0 %v8976_v9  ;;  %5756 = vmatpush.bf16.msrb.mxu1 %v8304_v15  ;;  %v8840_v9 = vor.u32 %v10030_v1, %v8837_v3  ;;  %v8809_v15 = vld [vmem:[%s15265_s7 + $0x98c] sm:$0xf0]  ;;  %v8725_v1 = vld [vmem:[%s15265_s7 + $0x8e4] sm:$0xf0] }
 0x2cf   :  { %5835 = vmatpush.bf16.msra.mxu3 %v7832_v23  ;;  %v8812_v23 = vor.u32 %v10023_v14, %v8809_v15  ;;  %v7751_v3 = vld [vmem:[%s15265_s7 + $0x128] sm:$0xf]  ;;  %v9939_v15 = vld [vmem:[%s15265_s7 + $0x6d4] sm:$0xf] }
 0x2d0   :  { %5821 = vmatpush.bf16.msra.mxu2 %v7636_v36  ;;  %v8276_v36 = vor.u32 %v9893_v20, %v8275_v10  ;;  %v9953_v10 = vld [vmem:[%s15265_s7 + $0x744] sm:$0xf] }
 0x2d1   :  { %v8532_v20 = vor.u32 %v9953_v10, %v8529_v12  ;;  %v10107_v10 = vld [vmem:[%s15265_s7 + $0xc14] sm:$0xf]  ;;  %v9145_v12 = vld [vmem:[%s15265_s7 + $0xc2c] sm:$0xf0] }
 0x2d2   :  { %5796 = vmatpush.bf16.msra.mxu0 %v8948_v29  ;;  %5757 = vmatpush.bf16.msrb.mxu1 %v8276_v36  ;;  %v8140_v29 = vor.u32 %v9855_v18, %v8137_v19  ;;  %v8032_v19 = vor.u32 %v9831_v8, %v8031_v7 }
 0x2d3   :  { %5880 = vmatpush.bf16.msrb.mxu3 %v8924_v32  ;;  %v8781_v32 = vld [vmem:[%s15265_s7 + $0x954] sm:$0xf0] }
 0x2d4   :  { %5822 = vmatpush.bf16.msra.mxu2 %v7608_v63  ;;  %v8865_v63 = vld [vmem:[%s15265_s7 + $0x9fc] sm:$0xf0]  ;;  %5836 = vmatmul.bf16.vlgmr.msra.gmra.mxu3 %v12527_v38  ;;  %v13781_v36 = vpop.f32.mrf.mxu3  ;;  %v8784_v47 = vor.u32 %v10016_v28, %v8781_v32  ;;  %v9117_v32 = vld [vmem:[%s15265_s7 + $0xbf4] sm:$0xf0] }
 0x2d5   :  { %5797 = vmatmul.bf16.vlgmr.msra.gmra.mxu0 %v13114_v17  ;;  %5758 = vmatmul.bf16.vlgmr.msrb.gmra.mxu1 %v12634_v39  ;;  %v8868_v61 = vor.u32 %v10037_v33, %v8865_v63  ;;  %v9768_v33 = vld [vmem:[%s15265_s7 + $0x178] sm:$0xf0]  ;;  %v9228_v63 = vor.u32 %v10131_v46, %v9227_v45 }
 0x2d6   :  { %5841 = vmatpush.bf16.msrb.mxu0 %v8252_v58  ;;  %5802 = vmatpush.bf16.msra.mxu1 %v9368_v42  ;;  %v9256_v58 = vor.u32 %v10138_v22, %v9255_v21  ;;  %v9754_v21 = vld [vmem:[%s15265_s7 + $0x108] sm:$0xf0] }
 0x2d7   :  { %5823 = vmatmul.bf16.vlgmr.msra.gmra.mxu2 %v12555_v55  ;;  %5881 = vmatpush.bf16.msrb.mxu3 %v8896_v49  ;;  %v10009_v49 = vld [vmem:[%s15265_s7 + $0x904] sm:$0xf] }
 0x2d8   :  { %5867 = vmatpush.bf16.msrb.mxu2 %v8700_v59  ;;  %v8588_v59 = vor.u32 %v9967_v5, %v8585_v50  ;;  %v8112_v5 = vor.u32 %v9848_v40, %v8109_v44  ;;  %v8753_v50 = vld [vmem:[%s15265_s7 + $0x91c] sm:$0xf0]  ;;  %v7695_v44 = vld [vmem:[%s15265_s7 + $0xb8] sm:$0xf] }
 0x2d9   :  { %v8756_v43 = vor.u32 %v10009_v49, %v8753_v50  ;;  %v10093_v49 = vld [vmem:[%s15265_s7 + $0xba4] sm:$0xf] }
 0x2da   :  { %5842 = vmatpush.bf16.msrb.mxu0 %v8224_v53  ;;  %5803 = vmatpush.bf16.msra.mxu1 %v9340_v56  ;;  %v13737_v31 = vpop.f32.mrf.mxu2  ;;  %v7779_v53 = vld [vmem:[%s15265_s7 + $0x160] sm:$0xf]  ;;  %v9841_v56 = vld [vmem:[%s15265_s7 + $0x3c4] sm:$0xf] }
 0x2db   :  { %5882 = vmatpush.bf16.msrb.mxu3 %v8868_v61  ;;  %v7780_v30 = vor.u32 %v9768_v33, %v7779_v53  ;;  %v9834_v61 = vld [vmem:[%s15265_s7 + $0x38c] sm:$0xf]  ;;  %v9925_v53 = vld [vmem:[%s15265_s7 + $0x664] sm:$0xf]  ;;  %v8417_v33 = vld [vmem:[%s15265_s7 + $0x67c] sm:$0xf0] }
 0x2dc   :  { %5868 = vmatpush.bf16.msrb.mxu2 %v8672_v51  ;;  %v8560_v51 = vor.u32 %v9960_v62, %v8557_v41  ;;  %v10002_v62 = vld [vmem:[%s15265_s7 + $0x8cc] sm:$0xf]  ;;  %v8084_v41 = vor.u32 %v9841_v56, %v8081_v35  ;;  %v5579_v2 = vpop.f32.mrf.mxu3  ;;  %v7667_v56 = vld [vmem:[%s15265_s7 + $0x80] sm:$0xf]  ;;  %v9740_v35 = vld [vmem:[%s15265_s7 + $0x98] sm:$0xf0] }
 0x2dd   :  { %v7639_v2 = vld [vmem:[%s15265_s7 + $0x48] sm:$0xf] }
 0x2de   :  { %5843 = vmatpush.bf16.msrb.mxu0 %v8196_v0  ;;  %5804 = vmatpush.bf16.msra.mxu1 %v9312_v4  ;;  %v9171_v0 = vld [vmem:[%s15265_s7 + $0xc48] sm:$0xf]  ;;  %v9761_v4 = vld [vmem:[%s15265_s7 + $0x140] sm:$0xf0] }
 0x2df   :  { %5883 = vmatpush.bf16.msrb.mxu3 %v8840_v9  ;;  %v10117_v9 = vld [vmem:[%s15265_s7 + $0xc60] sm:$0xf0]  ;;  %v7752_v14 = vor.u32 %v9761_v4, %v7751_v3 }
 0x2e0   :  { %5869 = vmatpush.bf16.msrb.mxu2 %v8644_v24  ;;  %v9946_v24 = vld [vmem:[%s15265_s7 + $0x70c] sm:$0xf]  ;;  %v9172_v22 = vor.u32 %v10117_v9, %v9171_v0  ;;  %v7919_v9 = vld [vmem:[%s15265_s7 + $0x278] sm:$0xf] }
 0x2e1   :  { %v8504_v42 = vor.u32 %v9946_v24, %v8501_v26  ;;  %v8003_v24 = vld [vmem:[%s15265_s7 + $0x320] sm:$0xf]  ;;  %v9824_v26 = vld [vmem:[%s15265_s7 + $0x338] sm:$0xf0]  ;;  %v9918_v0 = vld [vmem:[%s15265_s7 + $0x62c] sm:$0xf] }
 0x2e2   :  { %5844 = vmatpush.bf16.msrb.mxu0 %v8168_v13  ;;  %5805 = vmatpush.bf16.msra.mxu1 %v9284_v11  ;;  %v8728_v13 = vor.u32 %v10002_v62, %v8725_v1  ;;  %v8473_v11 = vld [vmem:[%s15265_s7 + $0x6ec] sm:$0xf0]  ;;  %v8004_v40 = vor.u32 %v9824_v26, %v8003_v24  ;;  %v9061_v62 = vld [vmem:[%s15265_s7 + $0xb84] sm:$0xf0]  ;;  %v9796_v24 = vld [vmem:[%s15265_s7 + $0x258] sm:$0xf0] }
 0x2e3   :  { %5884 = vmatpush.bf16.msrb.mxu3 %v8812_v23  ;;  %v9148_v23 = vor.u32 %v10107_v10, %v9145_v12  ;;  %v8476_v28 = vor.u32 %v9939_v15, %v8473_v11  ;;  %v8389_v1 = vld [vmem:[%s15265_s7 + $0x644] sm:$0xf0]  ;;  %v9803_v10 = vld [vmem:[%s15265_s7 + $0x290] sm:$0xf0]  ;;  %v8703_v26 = vld [vmem:[%s15265_s7 + $0x898] sm:$0xf] }
 0x2e4   :  { %5870 = vmatpush.bf16.msrb.mxu2 %v8616_v27  ;;  %v5618_v27 = vpop.f32.mrf.mxu2  ;;  %v13892_v45 = vpop.f32.mrf.mxu3  ;;  %v8392_v12 = vor.u32 %v9918_v0, %v8389_v1  ;;  %v9911_v11 = vld [vmem:[%s15265_s7 + $0x5f4] sm:$0xf]  ;;  %v9782_v0 = vld [vmem:[%s15265_s7 + $0x1e8] sm:$0xf0]  ;;  %v8647_v1 = vld [vmem:[%s15265_s7 + $0x828] sm:$0xf] }
 0x2e5   :  { %v7975_v27 = vld [vmem:[%s15265_s7 + $0x2e8] sm:$0xf] }
 0x2e6   :  { %5845 = vmatpush.bf16.msrb.mxu0 %v8140_v29  ;;  %5806 = vmatpush.bf16.msra.mxu1 %v9256_v58  ;;  %v10100_v29 = vld [vmem:[%s15265_s7 + $0xbdc] sm:$0xf]  ;;  %v8445_v58 = vld [vmem:[%s15265_s7 + $0x6b4] sm:$0xf0] }
 0x2e7   :  { %5885 = vmatpush.bf16.msrb.mxu3 %v8784_v47  ;;  %v9120_v46 = vor.u32 %v10100_v29, %v9117_v32  ;;  %v9817_v47 = vld [vmem:[%s15265_s7 + $0x300] sm:$0xf0]  ;;  %v10072_v32 = vld [vmem:[%s15265_s7 + $0xafc] sm:$0xf] }
 0x2e8   :  { %5871 = vmatpush.bf16.msrb.mxu2 %v8588_v59  ;;  %v10124_v59 = vld [vmem:[%s15265_s7 + $0xc98] sm:$0xf0] }
 0x2e9   :  { %v9200_v6 = vor.u32 %v10124_v59, %v9199_v57  ;;  %v7947_v59 = vld [vmem:[%s15265_s7 + $0x2b0] sm:$0xf] }
 0x2ea   :  { %5846 = vmatpush.bf16.msrb.mxu0 %v8112_v5  ;;  %5807 = vmatpush.bf16.msra.mxu1 %v9228_v63  ;;  %v9089_v5 = vld [vmem:[%s15265_s7 + $0xbbc] sm:$0xf0]  ;;  %v7976_v63 = vor.u32 %v9817_v47, %v7975_v27  ;;  %v7863_v27 = vld [vmem:[%s15265_s7 + $0x208] sm:$0xf] }
 0x2eb   :  { %5886 = vmatpush.bf16.msrb.mxu3 %v8756_v43  ;;  %v9092_v57 = vor.u32 %v10093_v49, %v9089_v5  ;;  %v9810_v43 = vld [vmem:[%s15265_s7 + $0x2c8] sm:$0xf0]  ;;  %v9789_v5 = vld [vmem:[%s15265_s7 + $0x220] sm:$0xf0] }
 0x2ec   :  { %5872 = vmatpush.bf16.msrb.mxu2 %v8560_v51  ;;  %v8053_v51 = vld [vmem:[%s15265_s7 + $0x3a4] sm:$0xf0]  ;;  %v7948_v4 = vor.u32 %v9810_v43, %v7947_v59  ;;  %v5631_v7 = vpop.f32.mrf.mxu3  ;;  %v7864_v59 = vor.u32 %v9789_v5, %v7863_v27  ;;  %v9971_v27 = vld [vmem:[%s15265_s7 + $0x7d0] sm:$0xf0]  ;;  %v10041_v5 = vld [vmem:[%s15265_s7 + $0xa00] sm:$0xf0] }
 0x2ed   :  { %v8056_v18 = vor.u32 %v9834_v61, %v8053_v51  ;;  %v10086_v61 = vld [vmem:[%s15265_s7 + $0xb6c] sm:$0xf]  ;;  %v13947_v51 = vpop.f32.mrf.mxu0  ;;  %v8927_v7 = vld [vmem:[%s15265_s7 + $0xa58] sm:$0xf] }
 0x2ee   :  { %5847 = vmatpush.bf16.msrb.mxu0 %v8084_v41  ;;  %5808 = vmatpush.bf16.msra.mxu1 %v9200_v6  ;;  %v7668_v41 = vor.u32 %v9740_v35, %v7667_v56  ;;  %v9733_v6 = vld [vmem:[%s15265_s7 + $0x60] sm:$0xf0]  ;;  %v9064_v8 = vor.u32 %v10086_v61, %v9061_v62  ;;  %v8977_v56 = vld [vmem:[%s15265_s7 + $0xadc] sm:$0xf0]  ;;  %v7835_v61 = vld [vmem:[%s15265_s7 + $0x1d0] sm:$0xf] }
 0x2ef   :  { %5887 = vmatpush.bf16.msrb.mxu3 %v8728_v13  ;;  %v10079_v13 = vld [vmem:[%s15265_s7 + $0xb34] sm:$0xf]  ;;  %v7640_v15 = vor.u32 %v9733_v6, %v7639_v2  ;;  %v9897_v35 = vld [vmem:[%s15265_s7 + $0x584] sm:$0xf]  ;;  %v8949_v6 = vld [vmem:[%s15265_s7 + $0xaa4] sm:$0xf0] }
 0x2f0   :  { %5873 = vmatpush.bf16.msrb.mxu2 %v8532_v20  ;;  %v7723_v20 = vld [vmem:[%s15265_s7 + $0xf0] sm:$0xf] }
 0x2f1   :  { %v7724_v25 = vor.u32 %v9754_v21, %v7723_v20  ;;  %v7611_v20 = vld [vmem:[%s15265_s7 + $0x10] sm:$0xf]  ;;  %v9726_v21 = vld [vmem:[%s15265_s7 + $0x28] sm:$0xf0] }
 0x2f2   :  { %5848 = vmatpush.bf16.msrb.mxu0 %v8056_v18  ;;  %5809 = vmatpush.bf16.msra.mxu1 %v9172_v22  ;;  %v8361_v18 = vld [vmem:[%s15265_s7 + $0x60c] sm:$0xf0]  ;;  %v7891_v22 = vld [vmem:[%s15265_s7 + $0x240] sm:$0xf] }
 0x2f3   :  { %5932 = vmatpush.bf16.msra.mxu3 %v8032_v19  ;;  %v7920_v19 = vor.u32 %v9803_v10, %v7919_v9  ;;  %v8364_v29 = vor.u32 %v9911_v11, %v8361_v18  ;;  %v8277_v9 = vld [vmem:[%s15265_s7 + $0x564] sm:$0xf0]  ;;  %v8255_v10 = vld [vmem:[%s15265_s7 + $0x518] sm:$0xf]  ;;  %v9369_v11 = vld [vmem:[%s15265_s7 + $0xdec] sm:$0xf0] }
 0x2f4   :  { %5874 = vmatpush.bf16.msrb.mxu2 %v8504_v42  ;;  %v9747_v42 = vld [vmem:[%s15265_s7 + $0xd0] sm:$0xf0]  ;;  %5888 = vmatmul.bf16.vlgmr.msrb.gmra.mxu3 %v12943_v37 }
 0x2f5   :  { %5849 = vmatmul.bf16.vlgmr.msrb.gmra.mxu0 %v12656_v54  ;;  %v7696_v50 = vor.u32 %v9747_v42, %v7695_v44  ;;  %5810 = vmatmul.bf16.vlgmr.msra.gmra.mxu1 %v13277_v60  ;;  %v7892_v42 = vor.u32 %v9796_v24, %v7891_v22  ;;  %v5592_v47 = vpop.f32.mrf.mxu0  ;;  %v8619_v22 = vld [vmem:[%s15265_s7 + $0x7f0] sm:$0xf] }
 0x2f6   :  { %5893 = vmatpush.bf16.msra.mxu0 %v9148_v23  ;;  %5854 = vmatpush.bf16.msrb.mxu1 %v8476_v28  ;;  %v9999_v28 = vld [vmem:[%s15265_s7 + $0x8b0] sm:$0xf0] }
 0x2f7   :  { %5875 = vmatmul.bf16.vlgmr.msrb.gmra.mxu2 %v12753_v52  ;;  %5933 = vmatpush.bf16.msra.mxu3 %v8004_v40  ;;  %v8333_v40 = vld [vmem:[%s15265_s7 + $0x5d4] sm:$0xf0] }
 0x2f8   :  { %5919 = vmatpush.bf16.msra.mxu2 %v7808_v48  ;;  %v8448_v48 = vor.u32 %v9932_v34, %v8445_v58  ;;  %v7612_v34 = vor.u32 %v9726_v21, %v7611_v20  ;;  %v9904_v58 = vld [vmem:[%s15265_s7 + $0x5bc] sm:$0xf] }
 0x2fa   :  { %5894 = vmatpush.bf16.msra.mxu0 %v9120_v46  ;;  %5855 = vmatpush.bf16.msrb.mxu1 %v8448_v48  ;;  %v13939_v3 = vpop.f32.mrf.mxu2  ;;  %v8704_v46 = vor.u32 %v9999_v28, %v8703_v26  ;;  %v14000_v48 = vpop.f32.mrf.mxu3  ;;  %v8899_v28 = vld [vmem:[%s15265_s7 + $0xa20] sm:$0xf] }
 0x2fb   :  { %5934 = vmatpush.bf16.msra.mxu3 %v7976_v63  ;;  %v10065_v63 = vld [vmem:[%s15265_s7 + $0xac4] sm:$0xf] }
 0x2fc   :  { %5920 = vmatpush.bf16.msra.mxu2 %v7780_v30  ;;  %v8420_v30 = vor.u32 %v9925_v53, %v8417_v33  ;;  %v9992_v53 = vld [vmem:[%s15265_s7 + $0x878] sm:$0xf0]  ;;  %v8336_v33 = vor.u32 %v9904_v58, %v8333_v40  ;;  %v8980_v62 = vor.u32 %v10065_v63, %v8977_v56  ;;  %v10149_v56 = vld [vmem:[%s15265_s7 + $0xd64] sm:$0xf] }
 0x2fd   :  { %v14066_v18 = vpop.f32.mrf.mxu0  ;;  %v10156_v40 = vld [vmem:[%s15265_s7 + $0xd9c] sm:$0xf] }
 0x2fe   :  { %5895 = vmatpush.bf16.msra.mxu0 %v9092_v57  ;;  %5856 = vmatpush.bf16.msrb.mxu1 %v8420_v30  ;;  %v8305_v57 = vld [vmem:[%s15265_s7 + $0x59c] sm:$0xf0]  ;;  %v10058_v30 = vld [vmem:[%s15265_s7 + $0xa8c] sm:$0xf] }
 0x2ff   :  { %5935 = vmatpush.bf16.msra.mxu3 %v7948_v4  ;;  %v9985_v4 = vld [vmem:[%s15265_s7 + $0x840] sm:$0xf0]  ;;  %v8308_v2 = vor.u32 %v9897_v35, %v8305_v57  ;;  %v8952_v20 = vor.u32 %v10058_v30, %v8949_v6  ;;  %v9313_v35 = vld [vmem:[%s15265_s7 + $0xd7c] sm:$0xf0]  ;;  %v9964_v30 = vld [vmem:[%s15265_s7 + $0x798] sm:$0xf0] }
 0x300   :  { %5921 = vmatpush.bf16.msra.mxu2 %v7752_v14  ;;  %v9033_v14 = vld [vmem:[%s15265_s7 + $0xb4c] sm:$0xf0] }
 0x301   :  { %v9036_v23 = vor.u32 %v10079_v13, %v9033_v14  ;;  %v7836_v13 = vor.u32 %v9782_v0, %v7835_v61  ;;  %v8648_v14 = vor.u32 %v9985_v4, %v8647_v1  ;;  %v9316_v0 = vor.u32 %v10149_v56, %v9313_v35  ;;  %v8171_v1 = vld [vmem:[%s15265_s7 + $0x470] sm:$0xf]  ;;  %v9866_v4 = vld [vmem:[%s15265_s7 + $0x488] sm:$0xf0] }
 0x302   :  { %5896 = vmatpush.bf16.msra.mxu0 %v9064_v8  ;;  %5857 = vmatpush.bf16.msrb.mxu1 %v8392_v12  ;;  %v5670_v44 = vpop.f32.mrf.mxu2  ;;  %v10055_v8 = vld [vmem:[%s15265_s7 + $0xa70] sm:$0xf0] }
 0x303   :  { %5936 = vmatpush.bf16.msra.mxu3 %v7920_v19  ;;  %v9887_v12 = vld [vmem:[%s15265_s7 + $0x530] sm:$0xf0]  ;;  %v5683_v19 = vpop.f32.mrf.mxu3  ;;  %v8928_v21 = vor.u32 %v10055_v8, %v8927_v7  ;;  %v9341_v44 = vld [vmem:[%s15265_s7 + $0xdb4] sm:$0xf0]  ;;  %v10142_v7 = vld [vmem:[%s15265_s7 + $0xd2c] sm:$0xf] }
 0x304   :  { %5922 = vmatpush.bf16.msra.mxu2 %v7724_v25  ;;  %v9005_v25 = vld [vmem:[%s15265_s7 + $0xb14] sm:$0xf0]  ;;  %v8256_v26 = vor.u32 %v9887_v12, %v8255_v10  ;;  %v9285_v8 = vld [vmem:[%s15265_s7 + $0xd44] sm:$0xf0] }
 0x305   :  { %v9008_v49 = vor.u32 %v10072_v32, %v9005_v25  ;;  %v8227_v25 = vld [vmem:[%s15265_s7 + $0x4e0] sm:$0xf]  ;;  %v5644_v57 = vpop.f32.mrf.mxu0  ;;  %v8535_v12 = vld [vmem:[%s15265_s7 + $0x748] sm:$0xf]  ;;  %v9288_v19 = vor.u32 %v10142_v7, %v9285_v8  ;;  %v10121_v8 = vld [vmem:[%s15265_s7 + $0xc84] sm:$0xf] }
 0x306   :  { %5897 = vmatpush.bf16.msra.mxu0 %v9036_v23  ;;  %5858 = vmatpush.bf16.msrb.mxu1 %v8364_v29  ;;  %v9978_v23 = vld [vmem:[%s15265_s7 + $0x808] sm:$0xf0]  ;;  %v10048_v29 = vld [vmem:[%s15265_s7 + $0xa38] sm:$0xf0]  ;;  %v8759_v57 = vld [vmem:[%s15265_s7 + $0x908] sm:$0xf] }
 0x307   :  { %5937 = vmatpush.bf16.msra.mxu3 %v7892_v42  ;;  %v8620_v58 = vor.u32 %v9978_v23, %v8619_v22  ;;  %v8900_v42 = vor.u32 %v10048_v29, %v8899_v28  ;;  %v9257_v28 = vld [vmem:[%s15265_s7 + $0xd0c] sm:$0xf0] }
 0x308   :  { %5923 = vmatpush.bf16.msra.mxu2 %v7696_v50  ;;  %v8675_v50 = vld [vmem:[%s15265_s7 + $0x860] sm:$0xf] }
 0x309   :  { %v8676_v43 = vor.u32 %v9992_v53, %v8675_v50  ;;  %v9344_v50 = vor.u32 %v10156_v40, %v9341_v44  ;;  %v8199_v53 = vld [vmem:[%s15265_s7 + $0x4a8] sm:$0xf]  ;;  %v10020_v44 = vld [vmem:[%s15265_s7 + $0x958] sm:$0xf0] }
 0x30a   :  { %5898 = vmatpush.bf16.msra.mxu0 %v9008_v49  ;;  %5859 = vmatpush.bf16.msrb.mxu1 %v8336_v33  ;;  %v8871_v49 = vld [vmem:[%s15265_s7 + $0x9e8] sm:$0xf]  ;;  %v9873_v33 = vld [vmem:[%s15265_s7 + $0x4c0] sm:$0xf0] }
 0x30b   :  { %5938 = vmatpush.bf16.msra.mxu3 %v7864_v59  ;;  %v8872_v59 = vor.u32 %v10041_v5, %v8871_v49  ;;  %v8200_v61 = vor.u32 %v9873_v33, %v8199_v53  ;;  %v9852_v49 = vld [vmem:[%s15265_s7 + $0x418] sm:$0xf0]  ;;  %v9229_v53 = vld [vmem:[%s15265_s7 + $0xcd4] sm:$0xf0] }
 0x30c   :  { %5924 = vmatpush.bf16.msra.mxu2 %v7668_v41  ;;  %v9890_v41 = vld [vmem:[%s15265_s7 + $0x54c] sm:$0xf] }
 0x30d   :  { %v8280_v24 = vor.u32 %v9890_v41, %v8277_v9  ;;  %v10034_v41 = vld [vmem:[%s15265_s7 + $0x9c8] sm:$0xf0] }
 0x30e   :  { %5899 = vmatpush.bf16.msra.mxu0 %v8980_v62  ;;  %5860 = vmatpush.bf16.msrb.mxu1 %v8308_v2  ;;  %v8843_v62 = vld [vmem:[%s15265_s7 + $0x9b0] sm:$0xf]  ;;  %v5578_v2 = vadd.f32 %v13781_v36, %v13581_v16  ;;  %v9957_v16 = vld [vmem:[%s15265_s7 + $0x760] sm:$0xf0] }
 0x30f   :  { %5939 = vmatpush.bf16.msra.mxu3 %v7836_v13  ;;  %v8844_v10 = vor.u32 %v10034_v41, %v8843_v62  ;;  %v8172_v13 = vor.u32 %v9866_v4, %v8171_v1  ;;  %v7781_v62 = vld [vmem:[%s15265_s7 + $0x17c] sm:$0xf0]  ;;  %v8087_v4 = vld [vmem:[%s15265_s7 + $0x3c8] sm:$0xf] }
 0x310   :  { %5925 = vmatpush.bf16.msra.mxu2 %v7640_v15  ;;  %v10163_v15 = vld [vmem:[%s15265_s7 + $0xdd4] sm:$0xf]  ;;  %v5591_v36 = vadd.f32 %v13947_v51, %v5578_v2  ;;  %v14176_v29 = vpop.f32.mrf.mxu0  ;;  %v9845_v2 = vld [vmem:[%s15265_s7 + $0x3e0] sm:$0xf0] }
 0x311   :  { %v9372_v32 = vor.u32 %v10163_v15, %v9369_v11  ;;  %v10027_v15 = vld [vmem:[%s15265_s7 + $0x990] sm:$0xf0]  ;;  %v5603_v11 = vpop.f32.mrf.mxu1 }
 0x312   :  { %5900 = vmatpush.bf16.msra.mxu0 %v8952_v20  ;;  %5861 = vmatpush.bf16.msrb.mxu1 %v8280_v24  ;;  %v8143_v20 = vld [vmem:[%s15265_s7 + $0x438] sm:$0xf]  ;;  %v9859_v51 = vld [vmem:[%s15265_s7 + $0x450] sm:$0xf0]  ;;  %v5604_v23 = vadd.f32 %v5603_v11, %v5591_v36  ;;  %v8536_v24 = vor.u32 %v9957_v16, %v8535_v12  ;;  %v8059_v36 = vld [vmem:[%s15265_s7 + $0x390] sm:$0xf] }
 0x313   :  { %5984 = vmatpush.bf16.msrb.mxu3 %v8928_v21  ;;  %v14167_v21 = vld [vmem:[%s15266_s8] sm:$0xff]  ;;  %v8144_v40 = vor.u32 %v9859_v51, %v8143_v20  ;;  %v10006_v11 = vld [vmem:[%s15265_s7 + $0x8e8] sm:$0xf0]  ;;  %v7753_v20 = vld [vmem:[%s15265_s7 + $0x144] sm:$0xf0] }
 0x314   :  { %5926 = vmatpush.bf16.msra.mxu2 %v7612_v34  ;;  %v9880_v34 = vld [vmem:[%s15265_s7 + $0x4f8] sm:$0xf0]  ;;  %5940 = vmatmul.bf16.vlgmr.msra.gmra.mxu3 %v12527_v38  ;;  %v3187_v22 = vperm.slane %v14167_v21, 2  ;;  %10169 = vtanh.f32 %v5604_v23  ;;  %v3186_v7 = vperm.slane %v14167_v21, 1 }
 0x315   :  { %v8228_v47 = vor.u32 %v9880_v34, %v8227_v25  ;;  %5901 = vmatmul.bf16.vlgmr.msra.gmra.mxu0 %v13114_v17  ;;  %5862 = vmatmul.bf16.vlgmr.msrb.gmra.mxu1 %v12634_v39  ;;  %v8507_v25 = vld [vmem:[%s15265_s7 + $0x710] sm:$0xf]  ;;  %v9950_v34 = vld [vmem:[%s15265_s7 + $0x728] sm:$0xf0]  ;;  %v9828_v23 = vld [vmem:[%s15265_s7 + $0x35c] sm:$0xf] }
 0x316   :  { %5945 = vmatpush.bf16.msrb.mxu0 %v8256_v26  ;;  %5906 = vmatpush.bf16.msra.mxu1 %v9372_v32  ;;  %v10135_v26 = vld [vmem:[%s15265_s7 + $0xcf4] sm:$0xf]  ;;  %v8508_v5 = vor.u32 %v9950_v34, %v8507_v25 }
 0x317   :  { %5927 = vmatmul.bf16.vlgmr.msra.gmra.mxu2 %v12555_v55  ;;  %5985 = vmatpush.bf16.msrb.mxu3 %v8900_v42  ;;  %v9772_v42 = vld [vmem:[%s15265_s7 + $0x19c] sm:$0xf]  ;;  %v10111_v25 = vld [vmem:[%s15265_s7 + $0xc30] sm:$0xf0] }
 0x318   :  { %5971 = vmatpush.bf16.msrb.mxu2 %v8704_v46  ;;  %v8591_v46 = vld [vmem:[%s15265_s7 + $0x7b8] sm:$0xf] }
 0x319   :  { %v8592_v63 = vor.u32 %v9971_v27, %v8591_v46  ;;  %v7809_v46 = vld [vmem:[%s15265_s7 + $0x1b4] sm:$0xf0]  ;;  %v9260_v27 = vor.u32 %v10135_v26, %v9257_v28  ;;  %v5605_v41 = vpop.f32.mrf.mxu1  ;;  %v5617_v26 = vadd.f32 %v13737_v31, %v3186_v7  ;;  %v9173_v28 = vld [vmem:[%s15265_s7 + $0xc64] sm:$0xf0] }
 0x31a   :  { %5946 = vmatpush.bf16.msrb.mxu0 %v8228_v47  ;;  %5907 = vmatpush.bf16.msra.mxu1 %v9344_v50  ;;  %v5720_v9 = vpop.f32.mrf.mxu2  ;;  %v8115_v47 = vld [vmem:[%s15265_s7 + $0x400] sm:$0xf]  ;;  %v10128_v50 = vld [vmem:[%s15265_s7 + $0xcbc] sm:$0xf]  ;;  %v7812_v35 = vor.u32 %v9772_v42, %v7809_v46  ;;  %v8479_v31 = vld [vmem:[%s15265_s7 + $0x6d8] sm:$0xf] }
 0x31b   :  { %5986 = vmatpush.bf16.msrb.mxu3 %v8872_v59  ;;  %v5721_v33 = vadd.f32 %v5720_v9, %v3187_v22  ;;  %v5733_v59 = vpop.f32.mrf.mxu3  ;;  %v9232_v1 = vor.u32 %v10128_v50, %v9229_v53  ;;  %v9201_v9 = vld [vmem:[%s15265_s7 + $0xc9c] sm:$0xf0]  ;;  %v9838_v22 = vld [vmem:[%s15265_s7 + $0x3a8] sm:$0xf0]  ;;  %v7697_v41 = vld [vmem:[%s15265_s7 + $0xd4] sm:$0xf0] }
 0x31c   :  { %5972 = vmatpush.bf16.msrb.mxu2 %v8676_v43  ;;  %v8563_v43 = vld [vmem:[%s15265_s7 + $0x780] sm:$0xf]  ;;  %v9204_v51 = vor.u32 %v10121_v8, %v9201_v9  ;;  %v8060_v46 = vor.u32 %v9838_v22, %v8059_v36  ;;  %v9095_v7 = vld [vmem:[%s15265_s7 + $0xba8] sm:$0xf]  ;;  %v10097_v8 = vld [vmem:[%s15265_s7 + $0xbc0] sm:$0xf0] }
 0x31d   :  { %v8564_v6 = vor.u32 %v9964_v30, %v8563_v43  ;;  %v8116_v43 = vor.u32 %v9852_v49, %v8115_v47  ;;  %v10013_v30 = vld [vmem:[%s15265_s7 + $0x920] sm:$0xf0]  ;;  %v9751_v47 = vld [vmem:[%s15265_s7 + $0xf4] sm:$0xf]  ;;  %v7725_v49 = vld [vmem:[%s15265_s7 + $0x10c] sm:$0xf0] }
 0x31e   :  { %5947 = vmatpush.bf16.msrb.mxu0 %v8200_v61  ;;  %5908 = vmatpush.bf16.msra.mxu1 %v9316_v0  ;;  %v9765_v61 = vld [vmem:[%s15265_s7 + $0x164] sm:$0xf]  ;;  %v14220_v0 = vadd.f32 %v5733_v59, %v5721_v33  ;;  %v8760_v12 = vor.u32 %v10013_v30, %v8759_v57  ;;  %v8005_v33 = vld [vmem:[%s15265_s7 + $0x33c] sm:$0xf0]  ;;  %v10104_v57 = vld [vmem:[%s15265_s7 + $0xbf8] sm:$0xf0]  ;;  %v7728_v59 = vor.u32 %v9751_v47, %v7725_v49 }
 0x31f   :  { %5987 = vmatpush.bf16.msrb.mxu3 %v8844_v10  ;;  %v5696_v10 = vpop.f32.mrf.mxu0  ;;  %v7784_v16 = vor.u32 %v9765_v61, %v7781_v62  ;;  %v9744_v62 = vld [vmem:[%s15265_s7 + $0xbc] sm:$0xf]  ;;  %v10090_v22 = vld [vmem:[%s15265_s7 + $0xb88] sm:$0xf0]  ;;  %v8367_v47 = vld [vmem:[%s15265_s7 + $0x5f8] sm:$0xf] }
 0x320   :  { %5973 = vmatpush.bf16.msrb.mxu2 %v8648_v14  ;;  %v8815_v14 = vld [vmem:[%s15265_s7 + $0x978] sm:$0xf]  ;;  %v7700_v9 = vor.u32 %v9744_v62, %v7697_v41  ;;  %v8423_v10 = vld [vmem:[%s15265_s7 + $0x668] sm:$0xf]  ;;  %v9915_v49 = vld [vmem:[%s15265_s7 + $0x610] sm:$0xf0] }
 0x321   :  { %v8816_v32 = vor.u32 %v10027_v15, %v8815_v14  ;;  %v8088_v14 = vor.u32 %v9845_v2, %v8087_v4  ;;  %v10114_v15 = vld [vmem:[%s15265_s7 + $0xc4c] sm:$0xf]  ;;  %v7977_v2 = vld [vmem:[%s15265_s7 + $0x304] sm:$0xf0]  ;;  %v8339_v41 = vld [vmem:[%s15265_s7 + $0x5c0] sm:$0xf] }
 0x322   :  { %5948 = vmatpush.bf16.msrb.mxu0 %v8172_v13  ;;  %5909 = vmatpush.bf16.msra.mxu1 %v9288_v19  ;;  %v8731_v13 = vld [vmem:[%s15265_s7 + $0x8d0] sm:$0xf]  ;;  %v9758_v19 = vld [vmem:[%s15265_s7 + $0x12c] sm:$0xf]  ;;  %v9176_v50 = vor.u32 %v10114_v15, %v9173_v28 }
 0x323   :  { %5988 = vmatpush.bf16.msrb.mxu3 %v8816_v32  ;;  %v9151_v32 = vld [vmem:[%s15265_s7 + $0xc18] sm:$0xf]  ;;  %v8732_v34 = vor.u32 %v10006_v11, %v8731_v13  ;;  %v5735_v42 = vpop.f32.mrf.mxu3  ;;  %v9814_v4 = vld [vmem:[%s15265_s7 + $0x2ec] sm:$0xf]  ;;  %v9737_v13 = vld [vmem:[%s15265_s7 + $0x84] sm:$0xf]  ;;  %v9096_v11 = vor.u32 %v10097_v8, %v9095_v7 }
 0x324   :  { %5974 = vmatpush.bf16.msrb.mxu2 %v8620_v58  ;;  %v8787_v58 = vld [vmem:[%s15265_s7 + $0x940] sm:$0xf]  ;;  %v9152_v53 = vor.u32 %v10111_v25, %v9151_v32  ;;  %v7980_v36 = vor.u32 %v9814_v4, %v7977_v2  ;;  %v9039_v42 = vld [vmem:[%s15265_s7 + $0xb38] sm:$0xf]  ;;  %v9786_v7 = vld [vmem:[%s15265_s7 + $0x20c] sm:$0xf] }
 0x325   :  { %v8788_v56 = vor.u32 %v10020_v44, %v8787_v58  ;;  %v7756_v58 = vor.u32 %v9758_v19, %v7753_v20  ;;  %v5630_v44 = vadd.f32 %v13892_v45, %v5617_v26  ;;  %v9821_v45 = vld [vmem:[%s15265_s7 + $0x324] sm:$0xf]  ;;  %v9807_v19 = vld [vmem:[%s15265_s7 + $0x2b4] sm:$0xf]  ;;  %v9922_v26 = vld [vmem:[%s15265_s7 + $0x648] sm:$0xf0] }
 0x326   :  { %5949 = vmatpush.bf16.msrb.mxu0 %v8144_v40  ;;  %5910 = vmatpush.bf16.msra.mxu1 %v9260_v27  ;;  %v9943_v40 = vld [vmem:[%s15265_s7 + $0x6f0] sm:$0xf0]  ;;  %v8008_v61 = vor.u32 %v9821_v45, %v8005_v33  ;;  %v7613_v33 = vld [vmem:[%s15265_s7 + $0x2c] sm:$0xf0] }
 0x327   :  { %5989 = vmatpush.bf16.msrb.mxu3 %v8788_v56  ;;  %v8480_v56 = vor.u32 %v9943_v40, %v8479_v31  ;;  %v9800_v40 = vld [vmem:[%s15265_s7 + $0x27c] sm:$0xf]  ;;  %v9723_v45 = vld [vmem:[%s15265_s7 + $0x14] sm:$0xf] }
 0x328   :  { %5975 = vmatpush.bf16.msrb.mxu2 %v8592_v63  ;;  %v5722_v63 = vpop.f32.mrf.mxu2  ;;  %v7616_v62 = vor.u32 %v9723_v45, %v7613_v33 }
 0x329   :  { %v5643_v63 = vadd.f32 %v14066_v18, %v5630_v44  ;;  %v9936_v18 = vld [vmem:[%s15265_s7 + $0x6b8] sm:$0xf0]  ;;  %v7921_v44 = vld [vmem:[%s15265_s7 + $0x294] sm:$0xf0] }
 0x32a   :  { %5950 = vmatpush.bf16.msrb.mxu0 %v8116_v43  ;;  %5911 = vmatpush.bf16.msra.mxu1 %v9232_v1  ;;  %v8451_v43 = vld [vmem:[%s15265_s7 + $0x6a0] sm:$0xf] }
 0x32b   :  { %5990 = vmatpush.bf16.msrb.mxu3 %v8760_v12  ;;  %v9929_v12 = vld [vmem:[%s15265_s7 + $0x680] sm:$0xf0] }
 0x32c   :  { %5976 = vmatpush.bf16.msrb.mxu2 %v8564_v6  ;;  %v10170_v6 = vpop.eup %10169  ;;  %v8424_v20 = vor.u32 %v9929_v12, %v8423_v10  ;;  %v7865_v10 = vld [vmem:[%s15265_s7 + $0x224] sm:$0xf0]  ;;  %v9989_v12 = vld [vmem:[%s15265_s7 + $0x864] sm:$0xf] }
 0x32d   :  { %6238 = vst [vmem:[%s15267_s9] sm:$0xff] %v10170_v6  ;;  %v8452_v6 = vor.u32 %v9936_v18, %v8451_v43  ;;  %v8368_v18 = vor.u32 %v9915_v49, %v8367_v47 }
 0x32e   :  { %5951 = vmatpush.bf16.msrb.mxu0 %v8088_v14  ;;  %5912 = vmatpush.bf16.msra.mxu1 %v9204_v51  ;;  %v7669_v14 = vld [vmem:[%s15265_s7 + $0x9c] sm:$0xf0]  ;;  %v9067_v51 = vld [vmem:[%s15265_s7 + $0xb70] sm:$0xf] }
 0x32f   :  { %5991 = vmatpush.bf16.msrb.mxu3 %v8732_v34  ;;  %v9730_v34 = vld [vmem:[%s15265_s7 + $0x4c] sm:$0xf]  ;;  %v9068_v31 = vor.u32 %v10090_v22, %v9067_v51  ;;  %v8955_v51 = vld [vmem:[%s15265_s7 + $0xa90] sm:$0xf]  ;;  %v9779_v22 = vld [vmem:[%s15265_s7 + $0x1d4] sm:$0xf] }
 0x330   :  { %5977 = vmatpush.bf16.msrb.mxu2 %v8536_v24  ;;  %v8033_v24 = vld [vmem:[%s15265_s7 + $0x374] sm:$0xf0] }
 0x331   :  { %v8036_v27 = vor.u32 %v9828_v23, %v8033_v24  ;;  %v7672_v23 = vor.u32 %v9737_v13, %v7669_v14  ;;  %v8395_v24 = vld [vmem:[%s15265_s7 + $0x630] sm:$0xf]  ;;  %v8983_v13 = vld [vmem:[%s15265_s7 + $0xac8] sm:$0xf]  ;;  %v10069_v14 = vld [vmem:[%s15265_s7 + $0xae0] sm:$0xf0] }
 0x332   :  { %5952 = vmatpush.bf16.msrb.mxu0 %v8060_v46  ;;  %5913 = vmatpush.bf16.msra.mxu1 %v9176_v50  ;;  %v10083_v46 = vld [vmem:[%s15265_s7 + $0xb50] sm:$0xf0] }
 0x333   :  { %6036 = vmatpush.bf16.msra.mxu3 %v8036_v27 }
 0x334   :  { %5978 = vmatpush.bf16.msrb.mxu2 %v8508_v5  ;;  %v5655_v5 = vpop.f32.mrf.mxu1  ;;  %5992 = vmatmul.bf16.vlgmr.msrb.gmra.mxu3 %v12943_v37  ;;  %v14423_v8 = vpop.f32.mrf.mxu3 }
 0x335   :  { %v5656_v30 = vadd.f32 %v5655_v5, %v5643_v63  ;;  %5953 = vmatmul.bf16.vlgmr.msrb.gmra.mxu0 %v12656_v54  ;;  %5914 = vmatmul.bf16.vlgmr.msra.gmra.mxu1 %v13277_v60  ;;  %v14387_v5 = vpop.f32.mrf.mxu0  ;;  %v9793_v63 = vld [vmem:[%s15265_s7 + $0x244] sm:$0xf] }
 0x336   :  { %5997 = vmatpush.bf16.msra.mxu0 %v9152_v53  ;;  %5958 = vmatpush.bf16.msrb.mxu1 %v8480_v56  ;;  %v7924_v53 = vor.u32 %v9800_v40, %v7921_v44  ;;  %v10062_v44 = vld [vmem:[%s15265_s7 + $0xaa8] sm:$0xf0] }
 0x337   :  { %5979 = vmatmul.bf16.vlgmr.msrb.gmra.mxu2 %v12753_v52  ;;  %6037 = vmatpush.bf16.msra.mxu3 %v8008_v61  ;;  %v10076_v61 = vld [vmem:[%s15265_s7 + $0xb18] sm:$0xf0]  ;;  %v8956_v33 = vor.u32 %v10062_v44, %v8955_v51  ;;  %v10031_v51 = vld [vmem:[%s15265_s7 + $0x9b4] sm:$0xf]  ;;  %v8537_v44 = vld [vmem:[%s15265_s7 + $0x764] sm:$0xf0] }
 0x338   :  { %6023 = vmatpush.bf16.msra.mxu2 %v7812_v35  ;;  %v9123_v35 = vld [vmem:[%s15265_s7 + $0xbe0] sm:$0xf] }
 0x339   :  { %v9124_v1 = vor.u32 %v10104_v57, %v9123_v35  ;;  %v9040_v35 = vor.u32 %v10083_v46, %v9039_v42  ;;  %v9996_v57 = vld [vmem:[%s15265_s7 + $0x89c] sm:$0xf]  ;;  %v8929_v42 = vld [vmem:[%s15265_s7 + $0xa74] sm:$0xf0] }
 0x33a   :  { %5959 = vmatpush.bf16.msrb.mxu1 %v8452_v6  ;;  %v14360_v28 = vpop.f32.mrf.mxu2  ;;  %v9884_v46 = vld [vmem:[%s15265_s7 + $0x51c] sm:$0xf] }
 0x33b   :  { %5998 = vmatpush.bf16.msra.mxu0 %v9124_v1  ;;  %6038 = vmatpush.bf16.msra.mxu3 %v7980_v36  ;;  %v9908_v1 = vld [vmem:[%s15265_s7 + $0x5d8] sm:$0xf0] }
 0x33c   :  { %6024 = vmatpush.bf16.msra.mxu2 %v7784_v16  ;;  %v5669_v16 = vadd.f32 %v13939_v3, %v5656_v30  ;;  %v5657_v15 = vpop.f32.mrf.mxu1  ;;  %v7949_v3 = vld [vmem:[%s15265_s7 + $0x2cc] sm:$0xf0]  ;;  %v9011_v30 = vld [vmem:[%s15265_s7 + $0xb00] sm:$0xf]  ;;  %v8340_v36 = vor.u32 %v9908_v1, %v8339_v41  ;;  %v5787_v45 = vpop.f32.mrf.mxu3  ;;  %v10160_v1 = vld [vmem:[%s15265_s7 + $0xdb8] sm:$0xf0] }
 0x33d   :  { %v7952_v25 = vor.u32 %v9807_v19, %v7949_v3  ;;  %v8311_v15 = vld [vmem:[%s15265_s7 + $0x588] sm:$0xf]  ;;  %v5748_v19 = vpop.f32.mrf.mxu0  ;;  %v7868_v3 = vor.u32 %v9786_v7, %v7865_v10  ;;  %v9347_v41 = vld [vmem:[%s15265_s7 + $0xda0] sm:$0xf]  ;;  %v9263_v45 = vld [vmem:[%s15265_s7 + $0xcf8] sm:$0xf] }
 0x33e   :  { %v5682_v32 = vadd.f32 %v14000_v48, %v5669_v16  ;;  %5960 = vmatpush.bf16.msrb.mxu1 %v8424_v20  ;;  %v8396_v48 = vor.u32 %v9922_v26, %v8395_v24  ;;  %v8677_v16 = vld [vmem:[%s15265_s7 + $0x87c] sm:$0xf0]  ;;  %v8984_v24 = vor.u32 %v10069_v14, %v8983_v13  ;;  %v8283_v26 = vld [vmem:[%s15265_s7 + $0x550] sm:$0xf]  ;;  %v8873_v10 = vld [vmem:[%s15265_s7 + $0xa04] sm:$0xf0] }
 0x33f   :  { %5999 = vmatpush.bf16.msra.mxu0 %v9096_v11  ;;  %6039 = vmatpush.bf16.msra.mxu3 %v7952_v25  ;;  %v9901_v11 = vld [vmem:[%s15265_s7 + $0x5a0] sm:$0xf0]  ;;  %v8680_v20 = vor.u32 %v9989_v12, %v8677_v16  ;;  %v7837_v25 = vld [vmem:[%s15265_s7 + $0x1ec] sm:$0xf0]  ;;  %v9348_v12 = vor.u32 %v10160_v1, %v9347_v41  ;;  %v9870_v16 = vld [vmem:[%s15265_s7 + $0x4ac] sm:$0xf] }
 0x340   :  { %6025 = vmatpush.bf16.msra.mxu2 %v7756_v58  ;;  %v7641_v58 = vld [vmem:[%s15265_s7 + $0x64] sm:$0xf0]  ;;  %v5695_v50 = vadd.f32 %v14176_v29, %v5682_v32  ;;  %v7893_v29 = vld [vmem:[%s15265_s7 + $0x25c] sm:$0xf0]  ;;  %v9894_v32 = vld [vmem:[%s15265_s7 + $0x568] sm:$0xf0]  ;;  %v8312_v40 = vor.u32 %v9901_v11, %v8311_v15  ;;  %v7840_v47 = vor.u32 %v9779_v22, %v7837_v25 }
 0x341   :  { %v7644_v27 = vor.u32 %v9730_v34, %v7641_v58  ;;  %v7896_v2 = vor.u32 %v9793_v63, %v7893_v29  ;;  %v9982_v34 = vld [vmem:[%s15265_s7 + $0x82c] sm:$0xf]  ;;  %v8649_v58 = vld [vmem:[%s15265_s7 + $0x844] sm:$0xf0]  ;;  %v8284_v29 = vor.u32 %v9894_v32, %v8283_v26  ;;  %v10153_v15 = vld [vmem:[%s15265_s7 + $0xd80] sm:$0xf0] }
 0x342   :  { %5961 = vmatpush.bf16.msrb.mxu1 %v8396_v48  ;;  %v5774_v4 = vpop.f32.mrf.mxu2  ;;  %v10052_v48 = vld [vmem:[%s15265_s7 + $0xa5c] sm:$0xf]  ;;  %v8652_v49 = vor.u32 %v9982_v34, %v8649_v58  ;;  %v9319_v14 = vld [vmem:[%s15265_s7 + $0xd68] sm:$0xf]  ;;  %v9961_v19 = vld [vmem:[%s15265_s7 + $0x784] sm:$0xf] }
 0x343   :  { %6000 = vmatpush.bf16.msra.mxu0 %v9068_v31  ;;  %6040 = vmatpush.bf16.msra.mxu3 %v7924_v53  ;;  %v10167_v53 = vld [vmem:[%s15265_s7 + $0xdf0] sm:$0xf0]  ;;  %v8932_v63 = vor.u32 %v10052_v48, %v8929_v42  ;;  %v8845_v22 = vld [vmem:[%s15265_s7 + $0x9cc] sm:$0xf0]  ;;  %v10146_v34 = vld [vmem:[%s15265_s7 + $0xd48] sm:$0xf0] }
 0x344   :  { %6026 = vmatpush.bf16.msra.mxu2 %v7728_v59  ;;  %v5707_v56 = vpop.f32.mrf.mxu1  ;;  %v8705_v59 = vld [vmem:[%s15265_s7 + $0x8b4] sm:$0xf0]  ;;  %v8173_v26 = vld [vmem:[%s15265_s7 + $0x48c] sm:$0xf0]  ;;  %v10024_v42 = vld [vmem:[%s15265_s7 + $0x97c] sm:$0xf] }
 0x345   :  { %v5708_v43 = vadd.f32 %v5707_v56, %v5695_v50  ;;  %v8708_v6 = vor.u32 %v9996_v57, %v8705_v59  ;;  %v9375_v50 = vld [vmem:[%s15265_s7 + $0xdd8] sm:$0xf]  ;;  %v9975_v56 = vld [vmem:[%s15265_s7 + $0x7f4] sm:$0xf]  ;;  %v10045_v59 = vld [vmem:[%s15265_s7 + $0xa24] sm:$0xf] }
 0x346   :  { %5962 = vmatpush.bf16.msrb.mxu1 %v8368_v18  ;;  %v9376_v18 = vor.u32 %v10167_v53, %v9375_v50  ;;  %v9291_v25 = vld [vmem:[%s15265_s7 + $0xd30] sm:$0xf]  ;;  %v3188_v50 = vperm.slane %v14167_v21, 3  ;;  %v8117_v41 = vld [vmem:[%s15265_s7 + $0x41c] sm:$0xf0] }
 0x347   :  { %10171 = vtanh.f32 %v5708_v43  ;;  %6001 = vmatpush.bf16.msra.mxu0 %v9040_v35  ;;  %6041 = vmatpush.bf16.msra.mxu3 %v7896_v2  ;;  %v8621_v35 = vld [vmem:[%s15265_s7 + $0x80c] sm:$0xf0]  ;;  %v8901_v43 = vld [vmem:[%s15265_s7 + $0xa3c] sm:$0xf0]  ;;  %v9968_v2 = vld [vmem:[%s15265_s7 + $0x7bc] sm:$0xf] }
 0x348   :  { %6027 = vmatpush.bf16.msra.mxu2 %v7700_v9  ;;  %v9012_v9 = vor.u32 %v10076_v61, %v9011_v30  ;;  %v9877_v30 = vld [vmem:[%s15265_s7 + $0x4e4] sm:$0xf]  ;;  %v8229_v61 = vld [vmem:[%s15265_s7 + $0x4fc] sm:$0xf0]  ;;  %v8904_v4 = vor.u32 %v10045_v59, %v8901_v43  ;;  %v8509_v21 = vld [vmem:[%s15265_s7 + $0x72c] sm:$0xf0] }
 0x349   :  { %v8232_v7 = vor.u32 %v9877_v30, %v8229_v61  ;;  %v8789_v43 = vld [vmem:[%s15265_s7 + $0x95c] sm:$0xf0]  ;;  %v9776_v30 = vld [vmem:[%s15265_s7 + $0x1b8] sm:$0xf0] }
 0x34a   :  { %5963 = vmatpush.bf16.msrb.mxu1 %v8340_v36  ;;  %v8201_v36 = vld [vmem:[%s15265_s7 + $0x4c4] sm:$0xf0] }
 0x34b   :  { %6002 = vmatpush.bf16.msra.mxu0 %v9012_v9  ;;  %6042 = vmatpush.bf16.msra.mxu3 %v7868_v3  ;;  %v10038_v9 = vld [vmem:[%s15265_s7 + $0x9ec] sm:$0xf]  ;;  %v8565_v3 = vld [vmem:[%s15265_s7 + $0x79c] sm:$0xf0] }
 0x34c   :  { %6028 = vmatpush.bf16.msra.mxu2 %v7672_v23  ;;  %v5709_v23 = vpop.f32.mrf.mxu1  ;;  %v8876_v11 = vor.u32 %v10038_v9, %v8873_v10  ;;  %v8568_v32 = vor.u32 %v9961_v19, %v8565_v3  ;;  %v9842_v3 = vld [vmem:[%s15265_s7 + $0x3cc] sm:$0xf] }
 0x34d   :  { %v10172_v31 = vpop.eup %10171  ;;  %v9320_v23 = vor.u32 %v10153_v15, %v9319_v14  ;;  %v7787_v14 = vld [vmem:[%s15265_s7 + $0x168] sm:$0xf]  ;;  %v9769_v15 = vld [vmem:[%s15265_s7 + $0x180] sm:$0xf0] }
 0x34e   :  { %6239 = vst [vmem:[%s15267_s9 + $0x8] sm:$0xff] %v10172_v31  ;;  %5964 = vmatpush.bf16.msrb.mxu1 %v8312_v40  ;;  %v8848_v31 = vor.u32 %v10031_v51, %v8845_v22  ;;  %v9954_v40 = vld [vmem:[%s15265_s7 + $0x74c] sm:$0xf]  ;;  %v9207_v51 = vld [vmem:[%s15265_s7 + $0xc88] sm:$0xf] }
 0x34f   :  { %6003 = vmatpush.bf16.msra.mxu0 %v8984_v24  ;;  %6043 = vmatpush.bf16.msra.mxu3 %v7840_v47  ;;  %v9863_v24 = vld [vmem:[%s15265_s7 + $0x474] sm:$0xf]  ;;  %v9856_v47 = vld [vmem:[%s15265_s7 + $0x43c] sm:$0xf]  ;;  %v8540_v53 = vor.u32 %v9954_v40, %v8537_v44  ;;  %v10125_v22 = vld [vmem:[%s15265_s7 + $0xca0] sm:$0xf0] }
 0x350   :  { %6029 = vmatpush.bf16.msra.mxu2 %v7644_v27  ;;  %v8257_v27 = vld [vmem:[%s15265_s7 + $0x534] sm:$0xf0]  ;;  %v8176_v48 = vor.u32 %v9863_v24, %v8173_v26  ;;  %v7788_v26 = vor.u32 %v9769_v15, %v7787_v14  ;;  %v8733_v40 = vld [vmem:[%s15265_s7 + $0x8ec] sm:$0xf0]  ;;  %v10094_v15 = vld [vmem:[%s15265_s7 + $0xbac] sm:$0xf] }
 0x351   :  { %v8260_v57 = vor.u32 %v9884_v46, %v8257_v27  ;;  %v8817_v46 = vld [vmem:[%s15265_s7 + $0x994] sm:$0xf0]  ;;  %v9292_v27 = vor.u32 %v10146_v34, %v9291_v25  ;;  %v10003_v25 = vld [vmem:[%s15265_s7 + $0x8d4] sm:$0xf]  ;;  %v7759_v44 = vld [vmem:[%s15265_s7 + $0x130] sm:$0xf] }
 0x352   :  { %5965 = vmatpush.bf16.msrb.mxu1 %v8284_v29  ;;  %6044 = vmatmul.bf16.vlgmr.msra.gmra.mxu3 %v12527_v38  ;;  %v10017_v29 = vld [vmem:[%s15265_s7 + $0x944] sm:$0xf] }
 0x353   :  { %6004 = vmatpush.bf16.msra.mxu0 %v8956_v33  ;;  %6088 = vmatpush.bf16.msrb.mxu3 %v8932_v63  ;;  %v10139_v33 = vld [vmem:[%s15265_s7 + $0xd10] sm:$0xf0]  ;;  %v14592_v63 = vpop.f32.mrf.mxu0  ;;  %v8792_v9 = vor.u32 %v10017_v29, %v8789_v43  ;;  %v7731_v43 = vld [vmem:[%s15265_s7 + $0xf8] sm:$0xf] }
 0x354   :  { %6030 = vmatpush.bf16.msra.mxu2 %v7616_v62  ;;  %v8624_v62 = vor.u32 %v9975_v56, %v8621_v35  ;;  %v8820_v56 = vor.u32 %v10024_v42, %v8817_v46  ;;  %v9947_v35 = vld [vmem:[%s15265_s7 + $0x714] sm:$0xf]  ;;  %v9264_v61 = vor.u32 %v10139_v33, %v9263_v45  ;;  %v9208_v42 = vor.u32 %v10125_v22, %v9207_v51  ;;  %v8061_v46 = vld [vmem:[%s15265_s7 + $0x3ac] sm:$0xf0]  ;;  %v8425_v51 = vld [vmem:[%s15265_s7 + $0x684] sm:$0xf0] }
 0x355   :  { %5966 = vmatmul.bf16.vlgmr.msrb.gmra.mxu1 %v12634_v39  ;;  %v8512_v1 = vor.u32 %v9947_v35, %v8509_v21  ;;  %v8736_v45 = vor.u32 %v10003_v25, %v8733_v40  ;;  %v8481_v35 = vld [vmem:[%s15265_s7 + $0x6f4] sm:$0xf0] }
 0x356   :  { %6010 = vmatpush.bf16.msra.mxu1 %v9376_v18  ;;  %6005 = vmatmul.bf16.vlgmr.msra.gmra.mxu0 %v13114_v17  ;;  %v7815_v18 = vld [vmem:[%s15265_s7 + $0x1a0] sm:$0xf]  ;;  %v7955_v25 = vld [vmem:[%s15265_s7 + $0x2b8] sm:$0xf] }
 0x357   :  { %6031 = vmatmul.bf16.vlgmr.msra.gmra.mxu2 %v12555_v55  ;;  %6049 = vmatpush.bf16.msrb.mxu0 %v8260_v57  ;;  %v14603_v57 = vpop.f32.mrf.mxu1  ;;  %v7816_v10 = vor.u32 %v9776_v30, %v7815_v18  ;;  %v9755_v18 = vld [vmem:[%s15265_s7 + $0x110] sm:$0xf0] }
 0x358   :  { %6075 = vmatpush.bf16.msrb.mxu2 %v8708_v6  ;;  %v8593_v6 = vld [vmem:[%s15265_s7 + $0x7d4] sm:$0xf0]  ;;  %6089 = vmatpush.bf16.msrb.mxu3 %v8904_v4  ;;  %v9235_v4 = vld [vmem:[%s15265_s7 + $0xcc0] sm:$0xf] }
 0x359   :  { %v8596_v13 = vor.u32 %v9968_v2, %v8593_v6  ;;  %v10132_v2 = vld [vmem:[%s15265_s7 + $0xcd8] sm:$0xf0] }
 0x35a   :  { %6011 = vmatpush.bf16.msra.mxu1 %v9348_v12  ;;  %v5824_v58 = vpop.f32.mrf.mxu2  ;;  %v10010_v12 = vld [vmem:[%s15265_s7 + $0x90c] sm:$0xf]  ;;  %v9236_v19 = vor.u32 %v10132_v2, %v9235_v4  ;;  %v10101_v2 = vld [vmem:[%s15265_s7 + $0xbe4] sm:$0xf] }
 0x35b   :  { %6050 = vmatpush.bf16.msrb.mxu0 %v8232_v7  ;;  %v5825_v6 = vadd.f32 %v5824_v58, %v3188_v50  ;;  %v10108_v50 = vld [vmem:[%s15265_s7 + $0xc1c] sm:$0xf] }
 0x35c   :  { %6076 = vmatpush.bf16.msrb.mxu2 %v8680_v20  ;;  %v8204_v20 = vor.u32 %v9870_v16, %v8201_v36  ;;  %6090 = vmatpush.bf16.msrb.mxu3 %v8876_v11  ;;  %v5837_v16 = vpop.f32.mrf.mxu3 }
 0x35d   :  { %v14638_v11 = vadd.f32 %v5837_v16, %v5825_v6  ;;  %v9125_v6 = vld [vmem:[%s15265_s7 + $0xbfc] sm:$0xf0]  ;;  %v9748_v16 = vld [vmem:[%s15265_s7 + $0xd8] sm:$0xf0] }
 0x35e   :  { %6012 = vmatpush.bf16.msra.mxu1 %v9320_v23  ;;  %v5800_v23 = vpop.f32.mrf.mxu0 }
 0x35f   :  { %6051 = vmatpush.bf16.msrb.mxu0 %v8204_v20  ;;  %v8089_v20 = vld [vmem:[%s15265_s7 + $0x3e4] sm:$0xf0]  ;;  %v5761_v34 = vpop.f32.mrf.mxu1 }
 0x360   :  { %6077 = vmatpush.bf16.msrb.mxu2 %v8652_v49  ;;  %v8145_v49 = vld [vmem:[%s15265_s7 + $0x454] sm:$0xf0]  ;;  %6091 = vmatpush.bf16.msrb.mxu3 %v8848_v31  ;;  %v8092_v58 = vor.u32 %v9842_v3, %v8089_v20  ;;  %v9179_v31 = vld [vmem:[%s15265_s7 + $0xc50] sm:$0xf]  ;;  %v9926_v20 = vld [vmem:[%s15265_s7 + $0x66c] sm:$0xf] }
 0x361   :  { %v8148_v59 = vor.u32 %v9856_v47, %v8145_v49  ;;  %v9832_v47 = vld [vmem:[%s15265_s7 + $0x378] sm:$0xf0]  ;;  %v10118_v49 = vld [vmem:[%s15265_s7 + $0xc68] sm:$0xf0]  ;;  %v8428_v34 = vor.u32 %v9926_v20, %v8425_v51  ;;  %v9993_v20 = vld [vmem:[%s15265_s7 + $0x880] sm:$0xf0] }
 0x362   :  { %6013 = vmatpush.bf16.msra.mxu1 %v9292_v27  ;;  %v5826_v7 = vpop.f32.mrf.mxu2  ;;  %v8039_v27 = vld [vmem:[%s15265_s7 + $0x360] sm:$0xf]  ;;  %v9180_v30 = vor.u32 %v10118_v49, %v9179_v31  ;;  %v9069_v31 = vld [vmem:[%s15265_s7 + $0xb8c] sm:$0xf0]  ;;  %v9734_v49 = vld [vmem:[%s15265_s7 + $0x68] sm:$0xf0] }
 0x363   :  { %6052 = vmatpush.bf16.msrb.mxu0 %v8176_v48  ;;  %v9762_v48 = vld [vmem:[%s15265_s7 + $0x148] sm:$0xf0]  ;;  %v7732_v7 = vor.u32 %v9755_v18, %v7731_v43 }
 0x364   :  { %6078 = vmatpush.bf16.msrb.mxu2 %v8624_v62  ;;  %v9849_v62 = vld [vmem:[%s15265_s7 + $0x404] sm:$0xf]  ;;  %6092 = vmatpush.bf16.msrb.mxu3 %v8820_v56  ;;  %v7760_v33 = vor.u32 %v9762_v48, %v7759_v44  ;;  %v9940_v56 = vld [vmem:[%s15265_s7 + $0x6dc] sm:$0xf]  ;;  %v5839_v21 = vpop.f32.mrf.mxu3  ;;  %v9919_v44 = vld [vmem:[%s15265_s7 + $0x634] sm:$0xf] }
 0x365   :  { %v8120_v36 = vor.u32 %v9849_v62, %v8117_v41  ;;  %v8011_v62 = vld [vmem:[%s15265_s7 + $0x328] sm:$0xf]  ;;  %v9825_v41 = vld [vmem:[%s15265_s7 + $0x340] sm:$0xf0]  ;;  %v8484_v4 = vor.u32 %v9940_v56, %v8481_v35  ;;  %v8397_v48 = vld [vmem:[%s15265_s7 + $0x64c] sm:$0xf0] }
 0x366   :  { %6014 = vmatpush.bf16.msra.mxu1 %v9264_v61  ;;  %v9041_v56 = vld [vmem:[%s15265_s7 + $0xb54] sm:$0xf0]  ;;  %v9912_v21 = vld [vmem:[%s15265_s7 + $0x5fc] sm:$0xf] }
 0x367   :  { %6053 = vmatpush.bf16.msrb.mxu0 %v8148_v59  ;;  %v8040_v59 = vor.u32 %v9832_v47, %v8039_v27  ;;  %v7647_v47 = vld [vmem:[%s15265_s7 + $0x50] sm:$0xf] }
 0x368   :  { %6079 = vmatpush.bf16.msrb.mxu2 %v8596_v13  ;;  %v8761_v13 = vld [vmem:[%s15265_s7 + $0x924] sm:$0xf0]  ;;  %6093 = vmatpush.bf16.msrb.mxu3 %v8792_v9  ;;  %v9933_v9 = vld [vmem:[%s15265_s7 + $0x6a4] sm:$0xf]  ;;  %v7648_v35 = vor.u32 %v9734_v49, %v7647_v47  ;;  %v9986_v47 = vld [vmem:[%s15265_s7 + $0x848] sm:$0xf0] }
 0x369   :  { %v8764_v24 = vor.u32 %v10010_v12, %v8761_v13  ;;  %v7703_v12 = vld [vmem:[%s15265_s7 + $0xc0] sm:$0xf]  ;;  %v7983_v13 = vld [vmem:[%s15265_s7 + $0x2f0] sm:$0xf] }
 0x36a   :  { %6015 = vmatpush.bf16.msra.mxu1 %v9236_v19  ;;  %v9097_v19 = vld [vmem:[%s15265_s7 + $0xbc4] sm:$0xf0]  ;;  %v7704_v3 = vor.u32 %v9748_v16, %v7703_v12  ;;  %v8341_v12 = vld [vmem:[%s15265_s7 + $0x5dc] sm:$0xf0] }
 0x36b   :  { %6054 = vmatpush.bf16.msrb.mxu0 %v8120_v36  ;;  %v9128_v36 = vor.u32 %v10101_v2, %v9125_v6  ;;  %v10000_v2 = vld [vmem:[%s15265_s7 + $0x8b8] sm:$0xf0] }
 0x36c   :  { %6080 = vmatpush.bf16.msrb.mxu2 %v8568_v32  ;;  %v9835_v32 = vld [vmem:[%s15265_s7 + $0x394] sm:$0xf]  ;;  %6094 = vmatpush.bf16.msrb.mxu3 %v8764_v24  ;;  %v7675_v24 = vld [vmem:[%s15265_s7 + $0x88] sm:$0xf] }
 0x36d   :  { %v8064_v29 = vor.u32 %v9835_v32, %v8061_v46  ;;  %v9100_v32 = vor.u32 %v10094_v15, %v9097_v19  ;;  %v9790_v19 = vld [vmem:[%s15265_s7 + $0x228] sm:$0xf0] }
 0x36e   :  { %6016 = vmatpush.bf16.msra.mxu1 %v9208_v42 }
 0x36f   :  { %6055 = vmatpush.bf16.msrb.mxu0 %v8092_v58  ;;  %v10087_v58 = vld [vmem:[%s15265_s7 + $0xb74] sm:$0xf] }
 0x370   :  { %6081 = vmatpush.bf16.msrb.mxu2 %v8540_v53  ;;  %v9153_v53 = vld [vmem:[%s15265_s7 + $0xc34] sm:$0xf0]  ;;  %6095 = vmatpush.bf16.msrb.mxu3 %v8736_v45  ;;  %v8400_v45 = vor.u32 %v9919_v44, %v8397_v48  ;;  %v9891_v44 = vld [vmem:[%s15265_s7 + $0x554] sm:$0xf]  ;;  %v8285_v48 = vld [vmem:[%s15265_s7 + $0x56c] sm:$0xf0] }
 0x371   :  { %v9156_v61 = vor.u32 %v10108_v50, %v9153_v53  ;;  %v9072_v50 = vor.u32 %v10087_v58, %v9069_v31  ;;  %v7927_v53 = vld [vmem:[%s15265_s7 + $0x280] sm:$0xf]  ;;  %v7843_v58 = vld [vmem:[%s15265_s7 + $0x1d8] sm:$0xf] }
 0x372   :  { %6017 = vmatpush.bf16.msra.mxu1 %v9180_v30  ;;  %v14802_v43 = vpop.f32.mrf.mxu0  ;;  %v7619_v30 = vld [vmem:[%s15265_s7 + $0x18] sm:$0xf] }
 0x373   :  { %6056 = vmatpush.bf16.msrb.mxu0 %v8064_v29  ;;  %6096 = vmatmul.bf16.vlgmr.msrb.gmra.mxu3 %v12943_v37  ;;  %v8369_v29 = vld [vmem:[%s15265_s7 + $0x614] sm:$0xf0] }
 0x374   :  { %6082 = vmatpush.bf16.msrb.mxu2 %v8512_v1  ;;  %v5747_v1 = vadd.f32 %v14387_v5, %v14220_v0  ;;  %v8453_v0 = vld [vmem:[%s15265_s7 + $0x6bc] sm:$0xf0]  ;;  %6140 = vmatpush.bf16.msra.mxu3 %v8040_v59 }
 0x375   :  { %v8456_v14 = vor.u32 %v9933_v9, %v8453_v0  ;;  %6018 = vmatmul.bf16.vlgmr.msra.gmra.mxu1 %v13277_v60  ;;  %v10073_v9 = vld [vmem:[%s15265_s7 + $0xb04] sm:$0xf]  ;;  %v9013_v0 = vld [vmem:[%s15265_s7 + $0xb1c] sm:$0xf0] }
 0x376   :  { %v5760_v5 = vadd.f32 %v14603_v57, %v5747_v1  ;;  %v9818_v57 = vld [vmem:[%s15265_s7 + $0x308] sm:$0xf0]  ;;  %6062 = vmatpush.bf16.msrb.mxu1 %v8484_v4  ;;  %6057 = vmatmul.bf16.vlgmr.msrb.gmra.mxu0 %v12656_v54  ;;  %v8711_v4 = vld [vmem:[%s15265_s7 + $0x8a0] sm:$0xf]  ;;  %v9016_v15 = vor.u32 %v10073_v9, %v9013_v0  ;;  %v10157_v0 = vld [vmem:[%s15265_s7 + $0xda4] sm:$0xf] }
 0x377   :  { %6083 = vmatmul.bf16.vlgmr.msrb.gmra.mxu2 %v12753_v52  ;;  %6101 = vmatpush.bf16.msra.mxu0 %v9156_v61  ;;  %v7984_v23 = vor.u32 %v9818_v57, %v7983_v13  ;;  %v9727_v61 = vld [vmem:[%s15265_s7 + $0x30] sm:$0xf0]  ;;  %v8712_v13 = vor.u32 %v10000_v2, %v8711_v4  ;;  %v7871_v57 = vld [vmem:[%s15265_s7 + $0x210] sm:$0xf]  ;;  %v10049_v4 = vld [vmem:[%s15265_s7 + $0xa40] sm:$0xf0] }
 0x378   :  { %6127 = vmatpush.bf16.msra.mxu2 %v7816_v10  ;;  %v8012_v10 = vor.u32 %v9825_v41, %v8011_v62  ;;  %v5773_v22 = vadd.f32 %v14360_v28, %v5760_v5  ;;  %v9811_v28 = vld [vmem:[%s15265_s7 + $0x2d0] sm:$0xf0]  ;;  %v7899_v62 = vld [vmem:[%s15265_s7 + $0x248] sm:$0xf]  ;;  %v5811_v41 = vpop.f32.mrf.mxu1  ;;  %v7620_v5 = vor.u32 %v9727_v61, %v7619_v30  ;;  %v8627_v61 = vld [vmem:[%s15265_s7 + $0x7f8] sm:$0xf] }
 0x379   :  { %v7956_v27 = vor.u32 %v9811_v28, %v7955_v25  ;;  %v7872_v25 = vor.u32 %v9790_v19, %v7871_v57  ;;  %v10042_v57 = vld [vmem:[%s15265_s7 + $0xa08] sm:$0xf0]  ;;  %v8207_v19 = vld [vmem:[%s15265_s7 + $0x4b0] sm:$0xf] }
 0x37a   :  { %6141 = vmatpush.bf16.msra.mxu3 %v8012_v10  ;;  %6063 = vmatpush.bf16.msrb.mxu1 %v8456_v14  ;;  %v5786_v42 = vadd.f32 %v14423_v8, %v5773_v22  ;;  %v14775_v46 = vpop.f32.mrf.mxu2  ;;  %v9804_v8 = vld [vmem:[%s15265_s7 + $0x298] sm:$0xf0]  ;;  %v9905_v10 = vld [vmem:[%s15265_s7 + $0x5c4] sm:$0xf]  ;;  %v14837_v14 = vpop.f32.mrf.mxu3  ;;  %v10066_v22 = vld [vmem:[%s15265_s7 + $0xacc] sm:$0xf] }
 0x37b   :  { %6102 = vmatpush.bf16.msra.mxu0 %v9128_v36  ;;  %v7928_v18 = vor.u32 %v9804_v8, %v7927_v53  ;;  %v8344_v51 = vor.u32 %v9905_v10, %v8341_v12  ;;  %v8957_v53 = vld [vmem:[%s15265_s7 + $0xaac] sm:$0xf0]  ;;  %v8935_v8 = vld [vmem:[%s15265_s7 + $0xa60] sm:$0xf] }
 0x37c   :  { %6128 = vmatpush.bf16.msra.mxu2 %v7788_v26  ;;  %v9741_v26 = vld [vmem:[%s15265_s7 + $0xa0] sm:$0xf0]  ;;  %v5799_v59 = vadd.f32 %v14592_v63, %v5786_v42  ;;  %v9783_v42 = vld [vmem:[%s15265_s7 + $0x1f0] sm:$0xf0]  ;;  %v8599_v12 = vld [vmem:[%s15265_s7 + $0x7c0] sm:$0xf] }
 0x37d   :  { %v7676_v40 = vor.u32 %v9741_v26, %v7675_v24  ;;  %v9797_v63 = vld [vmem:[%s15265_s7 + $0x260] sm:$0xf0]  ;;  %v9898_v24 = vld [vmem:[%s15265_s7 + $0x58c] sm:$0xf]  ;;  %v8313_v26 = vld [vmem:[%s15265_s7 + $0x5a4] sm:$0xf0] }
 0x37e   :  { %6142 = vmatpush.bf16.msra.mxu3 %v7984_v23  ;;  %6064 = vmatpush.bf16.msrb.mxu1 %v8428_v34  ;;  %v5812_v6 = vadd.f32 %v5811_v41, %v5799_v59  ;;  %v7900_v36 = vor.u32 %v9797_v63, %v7899_v62  ;;  %v8985_v23 = vld [vmem:[%s15265_s7 + $0xae4] sm:$0xf0]  ;;  %v10059_v34 = vld [vmem:[%s15265_s7 + $0xa94] sm:$0xf]  ;;  %v8288_v41 = vor.u32 %v9891_v44, %v8285_v48  ;;  %v9293_v44 = vld [vmem:[%s15265_s7 + $0xd4c] sm:$0xf0] }
 0x37f   :  { %6103 = vmatpush.bf16.msra.mxu0 %v9100_v32  ;;  %v5852_v32 = vpop.f32.mrf.mxu0  ;;  %v9979_v62 = vld [vmem:[%s15265_s7 + $0x810] sm:$0xf0]  ;;  %v8907_v63 = vld [vmem:[%s15265_s7 + $0xa28] sm:$0xf] }
 0x380   :  { %6129 = vmatpush.bf16.msra.mxu2 %v7760_v33  ;;  %v10080_v33 = vld [vmem:[%s15265_s7 + $0xb3c] sm:$0xf]  ;;  %10173 = vtanh.f32 %v5812_v6  ;;  %v5813_v31 = vpop.f32.mrf.mxu1  ;;  %v8235_v6 = vld [vmem:[%s15265_s7 + $0x4e8] sm:$0xf]  ;;  %v8628_v9 = vor.u32 %v9979_v62, %v8627_v61  ;;  %v8908_v10 = vor.u32 %v10049_v4, %v8907_v63  ;;  %v8851_v32 = vld [vmem:[%s15265_s7 + $0x9b8] sm:$0xf] }
 0x381   :  { %v9044_v1 = vor.u32 %v10080_v33, %v9041_v56  ;;  %v9888_v33 = vld [vmem:[%s15265_s7 + $0x538] sm:$0xf0]  ;;  %v7844_v56 = vor.u32 %v9783_v42, %v7843_v58  ;;  %v9867_v58 = vld [vmem:[%s15265_s7 + $0x490] sm:$0xf0]  ;;  %v10021_v63 = vld [vmem:[%s15265_s7 + $0x960] sm:$0xf0] }
 0x382   :  { %6143 = vmatpush.bf16.msra.mxu3 %v7956_v27  ;;  %6065 = vmatpush.bf16.msrb.mxu1 %v8400_v45  ;;  %v5878_v16 = vpop.f32.mrf.mxu2  ;;  %v8655_v27 = vld [vmem:[%s15265_s7 + $0x830] sm:$0xf]  ;;  %v10056_v45 = vld [vmem:[%s15265_s7 + $0xa78] sm:$0xf0]  ;;  %v5891_v59 = vpop.f32.mrf.mxu3  ;;  %v9951_v61 = vld [vmem:[%s15265_s7 + $0x730] sm:$0xf0] }
 0x383   :  { %6104 = vmatpush.bf16.msra.mxu0 %v9072_v50  ;;  %v8316_v50 = vor.u32 %v9898_v24, %v8313_v26  ;;  %v8936_v30 = vor.u32 %v10056_v45, %v8935_v8  ;;  %v9972_v16 = vld [vmem:[%s15265_s7 + $0x7d8] sm:$0xf0]  ;;  %v9965_v24 = vld [vmem:[%s15265_s7 + $0x7a0] sm:$0xf0]  ;;  %v8151_v45 = vld [vmem:[%s15265_s7 + $0x440] sm:$0xf] }
 0x384   :  { %6130 = vmatpush.bf16.msra.mxu2 %v7732_v7  ;;  %v8372_v7 = vor.u32 %v9912_v21, %v8369_v29  ;;  %v10164_v21 = vld [vmem:[%s15265_s7 + $0xddc] sm:$0xf]  ;;  %v9377_v29 = vld [vmem:[%s15265_s7 + $0xdf4] sm:$0xf0] }
 0x385   :  { %v9380_v2 = vor.u32 %v10164_v21, %v9377_v29  ;;  %v15008_v21 = vld [vmem:[%s15266_s8] sm:$0xff] }
 0x386   :  { %6144 = vmatpush.bf16.msra.mxu3 %v7928_v18  ;;  %6066 = vmatpush.bf16.msrb.mxu1 %v8372_v7  ;;  %v10174_v49 = vpop.eup %10173  ;;  %v8960_v18 = vor.u32 %v10059_v34, %v8957_v53  ;;  %v9881_v7 = vld [vmem:[%s15265_s7 + $0x500] sm:$0xf0]  ;;  %v8179_v34 = vld [vmem:[%s15265_s7 + $0x478] sm:$0xf]  ;;  %v10028_v53 = vld [vmem:[%s15265_s7 + $0x998] sm:$0xf0] }
 0x387   :  { %6105 = vmatpush.bf16.msra.mxu0 %v9044_v1  ;;  %6240 = vst [vmem:[%s15267_s9 + $0x10] sm:$0xff] %v10174_v49  ;;  %v8180_v49 = vor.u32 %v9867_v58, %v8179_v34  ;;  %v3189_v29 = vperm.slane %v15008_v21, 4  ;;  %v10115_v34 = vld [vmem:[%s15265_s7 + $0xc54] sm:$0xf]  ;;  %v8067_v58 = vld [vmem:[%s15265_s7 + $0x398] sm:$0xf] }
 0x388   :  { %6131 = vmatpush.bf16.msra.mxu2 %v7704_v3  ;;  %v8683_v3 = vld [vmem:[%s15265_s7 + $0x868] sm:$0xf] }
 0x389   :  { %v8684_v28 = vor.u32 %v9993_v20, %v8683_v3  ;;  %v9874_v3 = vld [vmem:[%s15265_s7 + $0x4c8] sm:$0xf0]  ;;  %v8600_v20 = vor.u32 %v9972_v16, %v8599_v12 }
 0x38a   :  { %6145 = vmatpush.bf16.msra.mxu3 %v7900_v36  ;;  %6067 = vmatpush.bf16.msrb.mxu1 %v8344_v51  ;;  %v8236_v36 = vor.u32 %v9881_v7, %v8235_v6  ;;  %v10150_v51 = vld [vmem:[%s15265_s7 + $0xd6c] sm:$0xf]  ;;  %v8208_v26 = vor.u32 %v9874_v3, %v8207_v19  ;;  %v9853_v6 = vld [vmem:[%s15265_s7 + $0x420] sm:$0xf0]  ;;  %v8095_v3 = vld [vmem:[%s15265_s7 + $0x3d0] sm:$0xf] }
 0x38b   :  { %6106 = vmatpush.bf16.msra.mxu0 %v9016_v15 }
 0x38c   :  { %6132 = vmatpush.bf16.msra.mxu2 %v7676_v40  ;;  %v8988_v40 = vor.u32 %v10066_v22, %v8985_v23  ;;  %v8571_v23 = vld [vmem:[%s15265_s7 + $0x788] sm:$0xf] }
 0x38d   :  { %v8572_v31 = vor.u32 %v9965_v24, %v8571_v23 }
 0x38e   :  { %6146 = vmatpush.bf16.msra.mxu3 %v7872_v25  ;;  %6068 = vmatpush.bf16.msrb.mxu1 %v8316_v50  ;;  %v10035_v25 = vld [vmem:[%s15265_s7 + $0x9d0] sm:$0xf0]  ;;  %v8823_v50 = vld [vmem:[%s15265_s7 + $0x980] sm:$0xf] }
 0x38f   :  { %6107 = vmatpush.bf16.msra.mxu0 %v8988_v40  ;;  %v10143_v40 = vld [vmem:[%s15265_s7 + $0xd34] sm:$0xf]  ;;  %v8852_v42 = vor.u32 %v10035_v25, %v8851_v32  ;;  %v8739_v32 = vld [vmem:[%s15265_s7 + $0x8d8] sm:$0xf] }
 0x390   :  { %6133 = vmatpush.bf16.msra.mxu2 %v7648_v35  ;;  %v8656_v35 = vor.u32 %v9986_v47, %v8655_v27  ;;  %v8543_v27 = vld [vmem:[%s15265_s7 + $0x750] sm:$0xf]  ;;  %v9958_v47 = vld [vmem:[%s15265_s7 + $0x768] sm:$0xf0]  ;;  %v9296_v8 = vor.u32 %v10143_v40, %v9293_v44  ;;  %v10007_v25 = vld [vmem:[%s15265_s7 + $0x8f0] sm:$0xf0] }
 0x391   :  { %v9181_v40 = vld [vmem:[%s15265_s7 + $0xc6c] sm:$0xf0]  ;;  %v10112_v44 = vld [vmem:[%s15265_s7 + $0xc38] sm:$0xf0] }
 0x392   :  { %6147 = vmatpush.bf16.msra.mxu3 %v7844_v56  ;;  %6069 = vmatpush.bf16.msrb.mxu1 %v8288_v41  ;;  %v10136_v56 = vld [vmem:[%s15265_s7 + $0xcfc] sm:$0xf]  ;;  %v15011_v59 = vpop.f32.mrf.mxu0  ;;  %v15019_v62 = vpop.f32.mrf.mxu1 }
 0x393   :  { %6108 = vmatpush.bf16.msra.mxu0 %v8960_v18  ;;  %v8824_v18 = vor.u32 %v10028_v53, %v8823_v50  ;;  %v9184_v50 = vor.u32 %v10115_v34, %v9181_v40 }
 0x394   :  { %6134 = vmatpush.bf16.msra.mxu2 %v7620_v5  ;;  %v9349_v5 = vld [vmem:[%s15265_s7 + $0xdbc] sm:$0xf0] }
 0x395   :  { %6148 = vmatmul.bf16.vlgmr.msra.gmra.mxu3 %v12527_v38  ;;  %v9352_v15 = vor.u32 %v10157_v0, %v9349_v5  ;;  %v9321_v38 = vld [vmem:[%s15265_s7 + $0xd84] sm:$0xf0]  ;;  %6070 = vmatmul.bf16.vlgmr.msrb.gmra.mxu1 %v12634_v39  ;;  %v9237_v0 = vld [vmem:[%s15265_s7 + $0xcdc] sm:$0xf0] }
 0x396   :  { %6192 = vmatpush.bf16.msrb.mxu3 %v8936_v30  ;;  %6114 = vmatpush.bf16.msra.mxu1 %v9380_v2  ;;  %v8515_v30 = vld [vmem:[%s15265_s7 + $0x718] sm:$0xf]  ;;  %v8123_v2 = vld [vmem:[%s15265_s7 + $0x408] sm:$0xf] }
 0x397   :  { %6135 = vmatmul.bf16.vlgmr.msra.gmra.mxu2 %v12555_v55  ;;  %v8263_v55 = vld [vmem:[%s15265_s7 + $0x520] sm:$0xf]  ;;  %6109 = vmatmul.bf16.vlgmr.msra.gmra.mxu0 %v13114_v17  ;;  %v8516_v7 = vor.u32 %v9951_v61, %v8515_v30  ;;  %v5941_v16 = vpop.f32.mrf.mxu3  ;;  %v10098_v30 = vld [vmem:[%s15265_s7 + $0xbc8] sm:$0xf0]  ;;  %v8431_v61 = vld [vmem:[%s15265_s7 + $0x670] sm:$0xf] }
 0x398   :  { %6179 = vmatpush.bf16.msrb.mxu2 %v8712_v13  ;;  %v8264_v1 = vor.u32 %v9888_v33, %v8263_v55  ;;  %v8879_v13 = vld [vmem:[%s15265_s7 + $0x9f0] sm:$0xf]  ;;  %v9860_v55 = vld [vmem:[%s15265_s7 + $0x458] sm:$0xf0]  ;;  %v8544_v33 = vor.u32 %v9958_v47, %v8543_v27 }
 0x399   :  { %v8880_v22 = vor.u32 %v10042_v57, %v8879_v13  ;;  %v8152_v41 = vor.u32 %v9860_v55, %v8151_v45  ;;  %v8767_v13 = vld [vmem:[%s15265_s7 + $0x910] sm:$0xf]  ;;  %v10014_v57 = vld [vmem:[%s15265_s7 + $0x928] sm:$0xf0]  ;;  %v9944_v27 = vld [vmem:[%s15265_s7 + $0x6f8] sm:$0xf0] }
 0x39a   :  { %6153 = vmatpush.bf16.msrb.mxu0 %v8264_v1  ;;  %6193 = vmatpush.bf16.msrb.mxu3 %v8908_v10  ;;  %v5928_v48 = vpop.f32.mrf.mxu2  ;;  %v8795_v1 = vld [vmem:[%s15265_s7 + $0x948] sm:$0xf]  ;;  %v8768_v23 = vor.u32 %v10014_v57, %v8767_v13  ;;  %v5865_v24 = vpop.f32.mrf.mxu1 }
 0x39b   :  { %6115 = vmatpush.bf16.msra.mxu1 %v9352_v15  ;;  %v5929_v5 = vadd.f32 %v5928_v48, %v3189_v29  ;;  %v8796_v12 = vor.u32 %v10021_v63, %v8795_v1  ;;  %v8740_v48 = vor.u32 %v10007_v25, %v8739_v32  ;;  %v9131_v55 = vld [vmem:[%s15265_s7 + $0xbe8] sm:$0xf]  ;;  %v10091_v63 = vld [vmem:[%s15265_s7 + $0xb90] sm:$0xf0]  ;;  %v10070_v32 = vld [vmem:[%s15265_s7 + $0xae8] sm:$0xf0] }
 0x39c   :  { %6180 = vmatpush.bf16.msrb.mxu2 %v8684_v28  ;;  %v9324_v28 = vor.u32 %v10150_v51, %v9321_v38  ;;  %v10122_v51 = vld [vmem:[%s15265_s7 + $0xc8c] sm:$0xf]  ;;  %v9209_v38 = vld [vmem:[%s15265_s7 + $0xca4] sm:$0xf0]  ;;  %v8319_v25 = vld [vmem:[%s15265_s7 + $0x590] sm:$0xf] }
 0x39d   :  { %v15045_v15 = vadd.f32 %v5941_v16, %v5929_v5  ;;  %v10084_v5 = vld [vmem:[%s15265_s7 + $0xb58] sm:$0xf0] }
 0x39e   :  { %6154 = vmatpush.bf16.msrb.mxu0 %v8236_v36  ;;  %6194 = vmatpush.bf16.msrb.mxu3 %v8880_v22  ;;  %v8124_v36 = vor.u32 %v9853_v6, %v8123_v2  ;;  %v5904_v22 = vpop.f32.mrf.mxu0 }
 0x39f   :  { %6116 = vmatpush.bf16.msra.mxu1 %v9324_v28  ;;  %v9212_v28 = vor.u32 %v10122_v51, %v9209_v38  ;;  %v5943_v47 = vpop.f32.mrf.mxu3  ;;  %v9909_v51 = vld [vmem:[%s15265_s7 + $0x5e0] sm:$0xf0] }
 0x3a0   :  { %6181 = vmatpush.bf16.msrb.mxu2 %v8656_v35  ;;  %v9265_v35 = vld [vmem:[%s15265_s7 + $0xd14] sm:$0xf0]  ;;  %v9383_v47 = vld [vmem:[%s15265_s7 + $0xde0] sm:$0xf] }
 0x3a1   :  { %v9268_v4 = vor.u32 %v10136_v56, %v9265_v35  ;;  %v8459_v56 = vld [vmem:[%s15265_s7 + $0x6a8] sm:$0xf]  ;;  %v9937_v35 = vld [vmem:[%s15265_s7 + $0x6c0] sm:$0xf0] }
 0x3a2   :  { %6155 = vmatpush.bf16.msrb.mxu0 %v8208_v26  ;;  %6195 = vmatpush.bf16.msrb.mxu3 %v8852_v42  ;;  %v5930_v10 = vpop.f32.mrf.mxu2  ;;  %v8487_v42 = vld [vmem:[%s15265_s7 + $0x6e0] sm:$0xf]  ;;  %v8460_v29 = vor.u32 %v9937_v35, %v8459_v56  ;;  %v9327_v35 = vld [vmem:[%s15265_s7 + $0xd70] sm:$0xf] }
 0x3a3   :  { %6117 = vmatpush.bf16.msra.mxu1 %v9296_v8  ;;  %v5851_v8 = vadd.f32 %v14802_v43, %v14638_v11  ;;  %v8488_v45 = vor.u32 %v9944_v27, %v8487_v42  ;;  %v8375_v10 = vld [vmem:[%s15265_s7 + $0x600] sm:$0xf]  ;;  %v8291_v42 = vld [vmem:[%s15265_s7 + $0x558] sm:$0xf]  ;;  %v9895_v27 = vld [vmem:[%s15265_s7 + $0x570] sm:$0xf0] }
 0x3a4   :  { %6182 = vmatpush.bf16.msrb.mxu2 %v8628_v9  ;;  %v10129_v9 = vld [vmem:[%s15265_s7 + $0xcc4] sm:$0xf] }
 0x3a5   :  { %v9240_v19 = vor.u32 %v10129_v9, %v9237_v0  ;;  %v5864_v11 = vadd.f32 %v15019_v62, %v5851_v8  ;;  %v9930_v62 = vld [vmem:[%s15265_s7 + $0x688] sm:$0xf0]  ;;  %v9047_v0 = vld [vmem:[%s15265_s7 + $0xb40] sm:$0xf]  ;;  %v8292_v8 = vor.u32 %v9895_v27, %v8291_v42 }
 0x3a6   :  { %6156 = vmatpush.bf16.msrb.mxu0 %v8180_v49  ;;  %6196 = vmatpush.bf16.msrb.mxu3 %v8824_v18  ;;  %v9103_v18 = vld [vmem:[%s15265_s7 + $0xbb0] sm:$0xf]  ;;  %v8432_v1 = vor.u32 %v9930_v62, %v8431_v61  ;;  %v9048_v13 = vor.u32 %v10084_v5, %v9047_v0  ;;  %v9271_v61 = vld [vmem:[%s15265_s7 + $0xd00] sm:$0xf]  ;;  %v3190_v62 = vperm.slane %v15008_v21, 5 }
 0x3a7   :  { %6118 = vmatpush.bf16.msra.mxu1 %v9268_v4  ;;  %v8403_v4 = vld [vmem:[%s15265_s7 + $0x638] sm:$0xf]  ;;  %v9215_v0 = vld [vmem:[%s15265_s7 + $0xc90] sm:$0xf]  ;;  %v10126_v5 = vld [vmem:[%s15265_s7 + $0xca8] sm:$0xf0] }
 0x3a8   :  { %6183 = vmatpush.bf16.msrb.mxu2 %v8600_v20  ;;  %v9846_v20 = vld [vmem:[%s15265_s7 + $0x3e8] sm:$0xf0] }
 0x3a9   :  { %v8096_v26 = vor.u32 %v9846_v20, %v8095_v3  ;;  %v9019_v3 = vld [vmem:[%s15265_s7 + $0xb08] sm:$0xf]  ;;  %v10077_v20 = vld [vmem:[%s15265_s7 + $0xb20] sm:$0xf0] }
 0x3aa   :  { %6157 = vmatpush.bf16.msrb.mxu0 %v8152_v41  ;;  %6197 = vmatpush.bf16.msrb.mxu3 %v8796_v12  ;;  %v9104_v41 = vor.u32 %v10098_v30, %v9103_v18 }
 0x3ab   :  { %6119 = vmatpush.bf16.msra.mxu1 %v9240_v19 }
 0x3ac   :  { %6184 = vmatpush.bf16.msrb.mxu2 %v8572_v31  ;;  %v9839_v31 = vld [vmem:[%s15265_s7 + $0x3b0] sm:$0xf0] }
 0x3ad   :  { %v8068_v49 = vor.u32 %v9839_v31, %v8067_v58 }
 0x3ae   :  { %6158 = vmatpush.bf16.msrb.mxu0 %v8124_v36  ;;  %6198 = vmatpush.bf16.msrb.mxu3 %v8768_v23  ;;  %v9020_v23 = vor.u32 %v10077_v20, %v9019_v3 }
 0x3af   :  { %6120 = vmatpush.bf16.msra.mxu1 %v9212_v28  ;;  %v9902_v28 = vld [vmem:[%s15265_s7 + $0x5a8] sm:$0xf0] }
 0x3b0   :  { %6185 = vmatpush.bf16.msrb.mxu2 %v8544_v33  ;;  %v10105_v33 = vld [vmem:[%s15265_s7 + $0xc00] sm:$0xf0] }
 0x3b1   :  { %v9132_v43 = vor.u32 %v10105_v33, %v9131_v55  ;;  %v9355_v55 = vld [vmem:[%s15265_s7 + $0xda8] sm:$0xf]  ;;  %v10161_v33 = vld [vmem:[%s15265_s7 + $0xdc0] sm:$0xf0] }
 0x3b2   :  { %6159 = vmatpush.bf16.msrb.mxu0 %v8096_v26  ;;  %6199 = vmatpush.bf16.msrb.mxu3 %v8740_v48  ;;  %v15149_v16 = vpop.f32.mrf.mxu0  ;;  %v5915_v36 = vpop.f32.mrf.mxu1  ;;  %v8991_v26 = vld [vmem:[%s15265_s7 + $0xad0] sm:$0xf]  ;;  %v10063_v48 = vld [vmem:[%s15265_s7 + $0xab0] sm:$0xf0]  ;;  %v9356_v56 = vor.u32 %v10161_v33, %v9355_v55 }
 0x3b3   :  { %6121 = vmatpush.bf16.msra.mxu1 %v9184_v50  ;;  %v8992_v31 = vor.u32 %v10070_v32, %v8991_v26  ;;  %v5955_v3 = vadd.f32 %v15149_v16, %v15045_v15 }
 0x3b4   :  { %6186 = vmatpush.bf16.msrb.mxu2 %v8516_v7 }
 0x3b5   :  { %6200 = vmatmul.bf16.vlgmr.msrb.gmra.mxu3 %v12943_v37  ;;  %v5877_v37 = vadd.f32 %v14775_v46, %v5864_v11  ;;  %v9923_v46 = vld [vmem:[%s15265_s7 + $0x650] sm:$0xf0]  ;;  %v10154_v11 = vld [vmem:[%s15265_s7 + $0xd88] sm:$0xf0] }
 0x3b6   :  { %6160 = vmatpush.bf16.msrb.mxu0 %v8068_v49  ;;  %6122 = vmatmul.bf16.vlgmr.msra.gmra.mxu1 %v13277_v60  ;;  %v8404_v9 = vor.u32 %v9923_v46, %v8403_v4  ;;  %v10168_v49 = vld [vmem:[%s15265_s7 + $0xdf8] sm:$0xf0] }
 0x3b7   :  { %6187 = vmatmul.bf16.vlgmr.msrb.gmra.mxu2 %v12753_v52  ;;  %v9159_v52 = vld [vmem:[%s15265_s7 + $0xc20] sm:$0xf]  ;;  %6166 = vmatpush.bf16.msrb.mxu1 %v8488_v45  ;;  %v5890_v2 = vadd.f32 %v14837_v14, %v5877_v37  ;;  %v9916_v14 = vld [vmem:[%s15265_s7 + $0x618] sm:$0xf0]  ;;  %v15163_v22 = vpop.f32.mrf.mxu3  ;;  %v9384_v45 = vor.u32 %v10168_v49, %v9383_v47 }
 0x3b8   :  { %v9160_v53 = vor.u32 %v10112_v44, %v9159_v52  ;;  %v8376_v19 = vor.u32 %v9916_v14, %v8375_v10  ;;  %v8320_v52 = vor.u32 %v9902_v28, %v8319_v25  ;;  %v8963_v44 = vld [vmem:[%s15265_s7 + $0xa98] sm:$0xf] }
 0x3b9   :  { %6161 = vmatmul.bf16.vlgmr.msrb.gmra.mxu0 %v12656_v54  ;;  %v9075_v54 = vld [vmem:[%s15265_s7 + $0xb78] sm:$0xf]  ;;  %v5903_v12 = vadd.f32 %v15011_v59, %v5890_v2  ;;  %v8347_v59 = vld [vmem:[%s15265_s7 + $0x5c8] sm:$0xf] }
 0x3ba   :  { %6205 = vmatpush.bf16.msra.mxu0 %v9160_v53  ;;  %v15134_v6 = vpop.f32.mrf.mxu2  ;;  %v9076_v7 = vor.u32 %v10091_v63, %v9075_v54  ;;  %v8348_v24 = vor.u32 %v9909_v51, %v8347_v59  ;;  %v5956_v34 = vpop.f32.mrf.mxu0  ;;  %v8964_v53 = vor.u32 %v10063_v48, %v8963_v44  ;;  %v9243_v54 = vld [vmem:[%s15265_s7 + $0xcc8] sm:$0xf]  ;;  %v10133_v63 = vld [vmem:[%s15265_s7 + $0xce0] sm:$0xf0] }
 0x3bb   :  { %6167 = vmatpush.bf16.msrb.mxu1 %v8460_v29  ;;  %v5916_v57 = vadd.f32 %v5915_v36, %v5903_v12  ;;  %v5917_v58 = vpop.f32.mrf.mxu1  ;;  %v9299_v29 = vld [vmem:[%s15265_s7 + $0xd38] sm:$0xf]  ;;  %v9216_v12 = vor.u32 %v10126_v5, %v9215_v0 }
 0x3bc   :  { %v9187_v36 = vld [vmem:[%s15265_s7 + $0xc58] sm:$0xf] }
 0x3bd   :  { %10175 = vtanh.f32 %v5916_v57 }
 0x3be   :  { %6206 = vmatpush.bf16.msra.mxu0 %v9132_v43  ;;  %v9328_v43 = vor.u32 %v10154_v11, %v9327_v35 }
 0x3bf   :  { %6168 = vmatpush.bf16.msrb.mxu1 %v8432_v1  ;;  %v5995_v50 = vpop.f32.mrf.mxu3 }
 0x3c2   :  { %6207 = vmatpush.bf16.msra.mxu0 %v9104_v41  ;;  %v5982_v38 = vpop.f32.mrf.mxu2 }
 0x3c3   :  { %6169 = vmatpush.bf16.msrb.mxu1 %v8404_v9  ;;  %v10176_v40 = vpop.eup %10175  ;;  %v9244_v9 = vor.u32 %v10133_v63, %v9243_v54 }
 0x3c4   :  { %6241 = vst [vmem:[%s15267_s9 + $0x18] sm:$0xff] %v10176_v40 }
 0x3c6   :  { %6208 = vmatpush.bf16.msra.mxu0 %v9076_v7 }
 0x3c7   :  { %6170 = vmatpush.bf16.msrb.mxu1 %v8376_v19 }
 0x3ca   :  { %6209 = vmatpush.bf16.msra.mxu0 %v9048_v13  ;;  %v10119_v13 = vld [vmem:[%s15265_s7 + $0xc70] sm:$0xf0] }
 0x3cb   :  { %6171 = vmatpush.bf16.msrb.mxu1 %v8348_v24  ;;  %v9188_v19 = vor.u32 %v10119_v13, %v9187_v36 }
 0x3ce   :  { %6210 = vmatpush.bf16.msra.mxu0 %v9020_v23 }
 0x3cf   :  { %6172 = vmatpush.bf16.msrb.mxu1 %v8320_v52 }
 0x3d2   :  { %6211 = vmatpush.bf16.msra.mxu0 %v8992_v31  ;;  %v5967_v41 = vpop.f32.mrf.mxu1 }
 0x3d3   :  { %6173 = vmatpush.bf16.msrb.mxu1 %v8292_v8  ;;  %v6006_v37 = vpop.f32.mrf.mxu0  ;;  %v5968_v20 = vadd.f32 %v5967_v41, %v5955_v3 }
 0x3d5   :  { %v6045_v2 = vpop.f32.mrf.mxu3  ;;  %v5981_v59 = vadd.f32 %v15134_v6, %v5968_v20 }
 0x3d6   :  { %6212 = vmatpush.bf16.msra.mxu0 %v8964_v53  ;;  %6174 = vmatmul.bf16.vlgmr.msrb.gmra.mxu1 %v12634_v39  ;;  %v10140_v39 = vld [vmem:[%s15265_s7 + $0xd18] sm:$0xf0] }
 0x3d7   :  { %6218 = vmatpush.bf16.msra.mxu1 %v9384_v45  ;;  %v9272_v1 = vor.u32 %v10140_v39, %v9271_v61  ;;  %v5994_v51 = vadd.f32 %v15163_v22, %v5981_v59 }
 0x3d9   :  { %6213 = vmatmul.bf16.vlgmr.msra.gmra.mxu0 %v13114_v17  ;;  %v10147_v17 = vld [vmem:[%s15265_s7 + $0xd50] sm:$0xf0]  ;;  %v6007_v23 = vadd.f32 %v6006_v37, %v5994_v51 }
 0x3da   :  { %v6032_v18 = vpop.f32.mrf.mxu2  ;;  %v9300_v30 = vor.u32 %v10147_v17, %v9299_v29  ;;  %v5969_v14 = vpop.f32.mrf.mxu1 }
 0x3db   :  { %6219 = vmatpush.bf16.msra.mxu1 %v9356_v56  ;;  %v6033_v4 = vadd.f32 %v6032_v18, %v3190_v62  ;;  %v6008_v10 = vpop.f32.mrf.mxu0 }
 0x3dd   :  { %v6046_v7 = vadd.f32 %v6045_v2, %v6033_v4  ;;  %v6047_v57 = vpop.f32.mrf.mxu3 }
 0x3df   :  { %6220 = vmatpush.bf16.msra.mxu1 %v9328_v43 }
 0x3e2   :  { %v6034_v46 = vpop.f32.mrf.mxu2 }
 0x3e3   :  { %6221 = vmatpush.bf16.msra.mxu1 %v9300_v30 }
 0x3e7   :  { %6222 = vmatpush.bf16.msra.mxu1 %v9272_v1 }
 0x3eb   :  { %6223 = vmatpush.bf16.msra.mxu1 %v9244_v9 }
 0x3ef   :  { %6224 = vmatpush.bf16.msra.mxu1 %v9216_v12 }
 0x3f2   :  { %v6019_v26 = vpop.f32.mrf.mxu1 }
 0x3f3   :  { %6225 = vmatpush.bf16.msra.mxu1 %v9188_v19  ;;  %v6058_v24 = vpop.f32.mrf.mxu0  ;;  %v6020_v32 = vadd.f32 %v6019_v26, %v6007_v23 }
 0x3f4   :  { %v6059_v49 = vadd.f32 %v6058_v24, %v6046_v7 }
 0x3f5   :  { %10177 = vtanh.f32 %v6020_v32 }
 0x3f6   :  { %6226 = vmatmul.bf16.vlgmr.msra.gmra.mxu1 %v13277_v60  ;;  %v6097_v28 = vpop.f32.mrf.mxu3  ;;  %v3191_v60 = vperm.slane %v15008_v21, 6 }
 0x3fa   :  { %v6084_v38 = vpop.f32.mrf.mxu2  ;;  %v6021_v58 = vpop.f32.mrf.mxu1 }
 0x3fb   :  { %v6060_v34 = vpop.f32.mrf.mxu0  ;;  %v10178_v31 = vpop.eup %10177 }
 0x3fc   :  { %6242 = vst [vmem:[%s15267_s9 + $0x20] sm:$0xff] %v10178_v31 }
 0x3fe   :  { %v6099_v15 = vpop.f32.mrf.mxu3 }
 0x402   :  { %v6086_v25 = vpop.f32.mrf.mxu2 }
 0x412   :  { %v6071_v22 = vpop.f32.mrf.mxu1 }
 0x413   :  { %v6072_v50 = vadd.f32 %v6071_v22, %v6059_v49 }
 0x414   :  { %v6110_v16 = vpop.f32.mrf.mxu0 }
 0x415   :  { %v6085_v53 = vadd.f32 %v6084_v38, %v6072_v50 }
 0x417   :  { %v6098_v8 = vadd.f32 %v6097_v28, %v6085_v53 }
 0x418   :  { %v6149_v44 = vpop.f32.mrf.mxu3 }
 0x419   :  { %v6111_v55 = vadd.f32 %v6110_v16, %v6098_v8 }
 0x41a   :  { %v6136_v6 = vpop.f32.mrf.mxu2  ;;  %v6073_v27 = vpop.f32.mrf.mxu1 }
 0x41b   :  { %v6137_v40 = vadd.f32 %v6136_v6, %v3191_v60 }
 0x41c   :  { %v6112_v42 = vpop.f32.mrf.mxu0 }
 0x41d   :  { %v6150_v48 = vadd.f32 %v6149_v44, %v6137_v40 }
 0x420   :  { %v6151_v47 = vpop.f32.mrf.mxu3 }
 0x422   :  { %v6138_v52 = vpop.f32.mrf.mxu2 }
 0x433   :  { %v6123_v56 = vpop.f32.mrf.mxu1 }
 0x434   :  { %v6124_v35 = vadd.f32 %v6123_v56, %v6111_v55 }
 0x436   :  { %v6162_v33 = vpop.f32.mrf.mxu0  ;;  %10179 = vtanh.f32 %v6124_v35 }
 0x437   :  { %v6163_v37 = vadd.f32 %v6162_v33, %v6150_v48 }
 0x438   :  { %v6201_v11 = vpop.f32.mrf.mxu3 }
 0x43a   :  { %v6188_v45 = vpop.f32.mrf.mxu2 }
 0x43b   :  { %v6125_v29 = vpop.f32.mrf.mxu1 }
 0x43c   :  { %v10180_v17 = vpop.eup %10179 }
 0x43d   :  { %6243 = vst [vmem:[%s15267_s9 + $0x28] sm:$0xff] %v10180_v17 }
 0x43e   :  { %v6164_v43 = vpop.f32.mrf.mxu0 }
 0x440   :  { %v6203_v18 = vpop.f32.mrf.mxu3 }
 0x442   :  { %v6190_v21 = vpop.f32.mrf.mxu2 }
 0x453   :  { %v6175_v61 = vpop.f32.mrf.mxu1 }
 0x454   :  { %v6176_v41 = vadd.f32 %v6175_v61, %v6163_v37 }
 0x456   :  { %v6214_v30 = vpop.f32.mrf.mxu0  ;;  %v6189_v1 = vadd.f32 %v6188_v45, %v6176_v41 }
 0x458   :  { %v6202_v54 = vadd.f32 %v6201_v11, %v6189_v1 }
 0x45a   :  { %v6215_v63 = vadd.f32 %v6214_v30, %v6202_v54 }
 0x45b   :  { %v6177_v62 = vpop.f32.mrf.mxu1 }
 0x45e   :  { %v6216_v39 = vpop.f32.mrf.mxu0 }
 0x473   :  { %v6227_v4 = vpop.f32.mrf.mxu1 }
 0x474   :  { %v6228_v46 = vadd.f32 %v6227_v4, %v6215_v63 }
 0x476   :  { %10181 = vtanh.f32 %v6228_v46 }
 0x47b   :  { %v6229_v2 = vpop.f32.mrf.mxu1 }
 0x47c   :  { %v10182_v7 = vpop.eup %10181 }
 0x47d   :  { %6244 = vst [vmem:[%s15267_s9 + $0x30] sm:$0xff] %v10182_v7 }

</bundles_post_ra>
